<compile_context>
chip_gen: v6e
topology: v6e:2x2x1
jax: 0.10.0
libtpu: 0.0.40
codegen_flags: <defaults>
</compile_context>

<pallas_src>
import functools
import math

import jax
import jax.numpy as jnp
from jax import lax
from jax.experimental import pallas as pl
from jax.experimental.pallas import tpu as pltpu

NEG_INF = -1e9


# ---------------------------------------------------------------------------
# Fused whole-forward kernel: grid = (batch,)
# ---------------------------------------------------------------------------

def _decoder_kernel(hub_ref, tgt_ref,                       # per-batch inputs
                    aw_ref, lw_ref, pes_ref, pet_ref,       # prologue (bias in PE)
                    wsq_ref, bsq_ref,                       # self-attn fused QKV
                    wcq_ref, bcq_ref, wck_ref, bck_ref,     # cross-attn Q / fused KV
                    wao_ref, bao_ref, ln_ref,               # attn out proj + LN
                    fw1_ref, fb1_ref, fw2_ref, fb2_ref,     # FFN
                    wout_ref, bout_ref,                     # padded merged output proj
                    out_ref,                                # output [1, S, 128]
                    *, nhead, num_layers, main_dim):
    f32 = jnp.float32
    bf16 = jnp.bfloat16

    # ---- input projections + positional encoding (proj biases pre-folded in PE) ----
    mem = jnp.dot(hub_ref[0].astype(bf16), aw_ref[...],
                  preferred_element_type=f32) + pes_ref[...]        # [Ta, D]
    x = jnp.dot(tgt_ref[0].astype(bf16), lw_ref[...],
                preferred_element_type=f32) + pet_ref[...]          # [S,  D]

    S, D = x.shape
    Dh = D // nhead
    scale = 1.0 / math.sqrt(Dh)

    # causal additive mask, built once per batch element (no DMA)
    row = lax.broadcasted_iota(jnp.int32, (S, S), 0)
    col = lax.broadcasted_iota(jnp.int32, (S, S), 1)
    causal_neg = jnp.where(col > row, NEG_INF, 0.0).astype(f32)

    mem_b = mem.astype(bf16)   # reused by every layer's cross-attn KV projection

    def layer_norm(y, g, b):
        # one-pass variance: var = E[y^2] - mean^2
        mean = jnp.mean(y, axis=-1, keepdims=True)
        mean_sq = jnp.mean(y * y, axis=-1, keepdims=True)
        var = mean_sq - mean * mean
        return (y - mean) * lax.rsqrt(var + 1e-5) * g + b

    def mha(qb, kb, vb, w_o, b_o, neg):
        # qb [Tq, D], kb/vb [Tk, D] in bf16; per-head static lane slices.
        heads = []
        for h in range(nhead):
            sl = slice(h * Dh, (h + 1) * Dh)
            s = lax.dot_general(qb[:, sl], kb[:, sl], (((1,), (1,)), ((), ())),
                                preferred_element_type=f32) * scale
            if neg is not None:
                s = s + neg
            m = jnp.max(s, axis=-1, keepdims=True)
            e = jnp.exp(s - m)
            p = e * pl.reciprocal(jnp.sum(e, axis=-1, keepdims=True), approx=True)
            heads.append(jnp.dot(p.astype(bf16), vb[:, sl],
                                 preferred_element_type=f32))        # [Tq, Dh]
        o = jnp.concatenate(heads, axis=-1)                          # [Tq, D]
        # single full-width output projection (== concat-of-heads @ Wo)
        return jnp.dot(o.astype(bf16), w_o, preferred_element_type=f32) + b_o

    # ---- decoder layers (post-norm, as nn.TransformerDecoderLayer); unrolled ----
    for l in range(num_layers):
        ln = ln_ref[l]                                   # [6, D] = g1,b1,g2,b2,g3,b3

        # self-attention: fused QKV projection  [S, D] @ [D, 3D]
        qkv = (jnp.dot(x.astype(bf16), wsq_ref[l],
                       preferred_element_type=f32) + bsq_ref[l]).astype(bf16)
        sa = mha(qkv[:, :D], qkv[:, D:2 * D], qkv[:, 2 * D:],
                 wao_ref[l, 0], bao_ref[l, 0], causal_neg)
        x = layer_norm(x + sa, ln[0:1, :], ln[1:2, :])

        # cross-attention: Q from x, fused KV from encoded audio memory
        q_b = (jnp.dot(x.astype(bf16), wcq_ref[l],
                       preferred_element_type=f32) + bcq_ref[l]).astype(bf16)
        kv = (jnp.dot(mem_b, wck_ref[l],
                      preferred_element_type=f32) + bck_ref[l]).astype(bf16)
        ca = mha(q_b, kv[:, :D], kv[:, D:], wao_ref[l, 1], bao_ref[l, 1], None)
        x = layer_norm(x + ca, ln[2:3, :], ln[3:4, :])

        # feed-forward (ReLU)
        hdn = jnp.maximum(
            jnp.dot(x.astype(bf16), fw1_ref[l],
                    preferred_element_type=f32) + fb1_ref[l], 0.0)
        ff = jnp.dot(hdn.astype(bf16), fw2_ref[l],
                     preferred_element_type=f32) + fb2_ref[l]
        x = layer_norm(x + ff, ln[4:5, :], ln[5:6, :])

    # ---- merged, lane-padded split-output projection (sigmoid | tanh) ----
    y = (jnp.dot(x.astype(bf16), wout_ref[...], preferred_element_type=f32)
         + bout_ref[...])                                            # [S, 128]
    lane = lax.broadcasted_iota(jnp.int32, y.shape, 1)
    sig = 1.0 / (1.0 + jnp.exp(-y))
    out_ref[0] = jnp.where(lane < main_dim, sig, jnp.tanh(y))


# ---------------------------------------------------------------------------
# Wrapper
# ---------------------------------------------------------------------------

def simple_decoder_forward(params, hubert_feats, tgt_landmarks, start_frame, *,
                           nhead, main_dim=52, aux_dim=3):
    B, Ta, Fd = hubert_feats.shape
    tgt_in = jnp.concatenate([start_frame[:, None, :], tgt_landmarks], axis=1)
    S, Ld = tgt_in.shape[1], tgt_in.shape[2]
    D = params["audio_proj_w"].shape[1]
    L = params["w_self_qkv"].shape[0]
    F = params["ffn_w1"].shape[2]
    out_pad = params["out_w"].shape[1]

    pe_src = params["pe_audio"][:Ta]     # [Ta, D], audio_proj bias pre-added
    pe_tgt = params["pe_lmk"][:S]        # [S,  D], landmark_proj bias pre-added

    kernel = functools.partial(_decoder_kernel, nhead=nhead,
                               num_layers=L, main_dim=main_dim)

    def _rep(shape):
        n = len(shape)
        return pl.BlockSpec(shape, lambda b: (0,) * n)   # whole array, VMEM-resident

    in_specs = [
        pl.BlockSpec((1, Ta, Fd), lambda b: (b, 0, 0)),   # hubert feats (per batch)
        pl.BlockSpec((1, S, Ld), lambda b: (b, 0, 0)),    # tgt = start + landmarks
        _rep((Fd, D)),                                    # audio_proj W (bf16)
        _rep((Ld, D)),                                    # landmark_proj W (bf16)
        _rep((Ta, D)),                                    # PE(src) + audio bias
        _rep((S, D)),                                     # PE(tgt) + landmark bias
        _rep((L, D, 3 * D)),                              # self-attn fused QKV W
        _rep((L, 1, 3 * D)),                              # self-attn fused QKV b
        _rep((L, D, D)),                                  # cross-attn Q W
        _rep((L, 1, D)),                                  # cross-attn Q b
        _rep((L, D, 2 * D)),                              # cross-attn fused KV W
        _rep((L, 1, 2 * D)),                              # cross-attn fused KV b
        _rep((L, 2, D, D)),                               # attn out proj W (self,cross)
        _rep((L, 2, 1, D)),                               # attn out proj b
        _rep((L, 6, D)),                                  # layernorm g/b x3
        _rep((L, D, F)),                                  # ffn W1
        _rep((L, 1, F)),                                  # ffn b1
        _rep((L, F, D)),                                  # ffn W2
        _rep((L, 1, D)),                                  # ffn b2
        _rep((D, out_pad)),                               # merged padded out W
        _rep((1, out_pad)),                               # merged padded out b
    ]

    out = pl.pallas_call(
        kernel,
        grid=(B,),
        in_specs=in_specs,
        out_specs=pl.BlockSpec((1, S, out_pad), lambda b: (b, 0, 0)),
        out_shape=jax.ShapeDtypeStruct((B, S, out_pad), jnp.float32),
        compiler_params=pltpu.CompilerParams(
            dimension_semantics=("parallel",)),
    )(hubert_feats, tgt_in,
      params["audio_proj_w"], params["landmark_proj_w"],
      pe_src, pe_tgt,
      params["w_self_qkv"], params["b_self_qkv"],
      params["w_cross_q"], params["b_cross_q"],
      params["w_cross_kv"], params["b_cross_kv"],
      params["w_attn_out"], params["b_attn_out"],
      params["ln"],
      params["ffn_w1"], params["ffn_b1"], params["ffn_w2"], params["ffn_b2"],
      params["out_w"], params["out_b"])
    # drop the start-frame position, strip lane padding -> [B, T, 55]
    return out[:, 1:, :main_dim + aux_dim]


# ---------------------------------------------------------------------------
# Deterministic parameter init (xavier uniform weights, zero biases),
# pre-packed into the fused / stacked kernel layout (bf16 weights, f32 biases).
# ---------------------------------------------------------------------------

def xavier_uniform(key, shape):
    bound = math.sqrt(6.0 / (shape[0] + shape[1]))
    return jax.random.uniform(key, shape, jnp.float32, -bound, bound)


def make_pe(max_len, d_model):
    pos = jnp.arange(max_len, dtype=jnp.float32)[:, None]
    div = jnp.exp(jnp.arange(0, d_model, 2, dtype=jnp.float32)
                  * (-math.log(10000.0) / d_model))
    pe = jnp.zeros((max_len, d_model), jnp.float32)
    pe = pe.at[:, 0::2].set(jnp.sin(pos * div))
    pe = pe.at[:, 1::2].set(jnp.cos(pos * div))
    return pe   # [max_len, d_model]


def init_params(key, *, feature_dim, landmark_dim, d_model, nhead, num_layers, dff,
                main_dim=52, aux_dim=3, max_len=64, out_pad=128):
    keys = iter(jax.random.split(key, 256))
    bf16 = jnp.bfloat16

    def lin(in_d, out_d):
        return (xavier_uniform(next(keys), (in_d, out_d)),
                jnp.zeros((out_d,), jnp.float32))

    p = {}
    aw, ab = lin(feature_dim, d_model)
    lw, lb = lin(landmark_dim, d_model)
    p["audio_proj_w"] = aw.astype(bf16)
    p["landmark_proj_w"] = lw.astype(bf16)
    pe = make_pe(max_len, d_model)
    p["pe_audio"] = pe + ab[None, :]     # PE with audio_proj bias folded in
    p["pe_lmk"] = pe + lb[None, :]       # PE with landmark_proj bias folded in

    w_sq, b_sq, w_cq, b_cq, w_ck, b_ck = [], [], [], [], [], []
    w_ao, b_ao, lns = [], [], []
    fw1s, fb1s, fw2s, fb2s = [], [], [], []
    for _ in range(num_layers):
        # self-attention: fused QKV [D, 3D]
        wq, bq = lin(d_model, d_model)
        wk, bk = lin(d_model, d_model)
        wv, bv = lin(d_model, d_model)
        wo_s, bo_s = lin(d_model, d_model)
        w_sq.append(jnp.concatenate([wq, wk, wv], axis=1))
        b_sq.append(jnp.concatenate([bq, bk, bv]).reshape(1, 3 * d_model))
        # cross-attention: Q [D, D], fused KV [D, 2D]
        cq, cbq = lin(d_model, d_model)
        ck, cbk = lin(d_model, d_model)
        cv, cbv = lin(d_model, d_model)
        wo_c, bo_c = lin(d_model, d_model)
        w_cq.append(cq)
        b_cq.append(cbq.reshape(1, d_model))
        w_ck.append(jnp.concatenate([ck, cv], axis=1))
        b_ck.append(jnp.concatenate([cbk, cbv]).reshape(1, 2 * d_model))
        # output projections (un-split; heads concatenated in-kernel)
        w_ao.append(jnp.stack([wo_s, wo_c], axis=0))                       # [2, D, D]
        b_ao.append(jnp.stack([bo_s.reshape(1, d_model),
                               bo_c.reshape(1, d_model)], axis=0))         # [2, 1, D]
        # FFN
        w1, b1 = lin(d_model, dff)
        w2, b2 = lin(dff, d_model)
        fw1s.append(w1); fb1s.append(b1.reshape(1, dff))
        fw2s.append(w2); fb2s.append(b2.reshape(1, d_model))
        # layernorm params
        ones = jnp.ones((d_model,), jnp.float32)
        zeros = jnp.zeros((d_model,), jnp.float32)
        lns.append(jnp.stack([ones, zeros, ones, zeros, ones, zeros], axis=0))

    p["w_self_qkv"] = jnp.stack(w_sq).astype(bf16)     # [L, D, 3D]
    p["b_self_qkv"] = jnp.stack(b_sq)                  # [L, 1, 3D]
    p["w_cross_q"] = jnp.stack(w_cq).astype(bf16)      # [L, D, D]
    p["b_cross_q"] = jnp.stack(b_cq)                   # [L, 1, D]
    p["w_cross_kv"] = jnp.stack(w_ck).astype(bf16)     # [L, D, 2D]
    p["b_cross_kv"] = jnp.stack(b_ck)                  # [L, 1, 2D]
    p["w_attn_out"] = jnp.stack(w_ao).astype(bf16)     # [L, 2, D, D]
    p["b_attn_out"] = jnp.stack(b_ao)                  # [L, 2, 1, D]
    p["ln"] = jnp.stack(lns)                           # [L, 6, D]
    p["ffn_w1"] = jnp.stack(fw1s).astype(bf16)         # [L, D, F]
    p["ffn_b1"] = jnp.stack(fb1s)                      # [L, 1, F]
    p["ffn_w2"] = jnp.stack(fw2s).astype(bf16)         # [L, F, D]
    p["ffn_b2"] = jnp.stack(fb2s)                      # [L, 1, D]

    # merged split output projection, zero-padded to a full 128-lane width
    wm, bm = lin(d_model, main_dim)
    wa, ba = lin(d_model, aux_dim)
    ow = jnp.zeros((d_model, out_pad), jnp.float32)
    ow = ow.at[:, :main_dim].set(wm).at[:, main_dim:main_dim + aux_dim].set(wa)
    ob = jnp.zeros((1, out_pad), jnp.float32)
    ob = ob.at[0, :main_dim].set(bm).at[0, main_dim:main_dim + aux_dim].set(ba)
    p["out_w"] = ow.astype(bf16)                       # [D, 128]
    p["out_b"] = ob                                    # [1, 128]
    return p


# ---------------------------------------------------------------------------
# Main
# ---------------------------------------------------------------------------

if __name__ == "__main__":
    # Small shapes implied by the module
    B, T_audio, T = 2, 10, 8
    d_model, nhead, num_layers, dff = 32, 4, 2, 64
    feature_dim = 48          # stand-in for hubert feature_dim
    landmark_dim = 55         # 52 main + 3 aux

    key = jax.random.PRNGKey(0)
    k_feat, k_lmk, k_start, k_param = jax.random.split(key, 4)

    hubert_features = jax.random.normal(k_feat, (B, T_audio, feature_dim), jnp.float32)
    tgt_landmarks = jax.random.normal(k_lmk, (B, T, landmark_dim), jnp.float32)
    start_frame = jax.random.normal(k_start, (B, landmark_dim), jnp.float32)

    params = init_params(k_param, feature_dim=feature_dim, landmark_dim=landmark_dim,
                         d_model=d_model, nhead=nhead, num_layers=num_layers, dff=dff)

    fwd = jax.jit(functools.partial(simple_decoder_forward, nhead=nhead))
    out = fwd(params, hubert_features, tgt_landmarks, start_frame)
    jax.block_until_ready(out)

    assert out.shape == (B, T, 55), out.shape
    assert jnp.all(jnp.isfinite(out))
    print("KERNEL_OK")
</pallas_src>

<mosaic_0001>
module attributes {stable_mosaic.version = 11 : i64} {
  func.func @_decoder_kernel(%arg0: i32, %arg1: memref<1x10x48xf32, #tpu.memory_space<vmem>>, %arg2: memref<1x9x55xf32, #tpu.memory_space<vmem>>, %arg3: memref<48x32xbf16, #tpu.memory_space<vmem>>, %arg4: memref<55x32xbf16, #tpu.memory_space<vmem>>, %arg5: memref<10x32xf32, #tpu.memory_space<vmem>>, %arg6: memref<9x32xf32, #tpu.memory_space<vmem>>, %arg7: memref<2x32x96xbf16, #tpu.memory_space<vmem>>, %arg8: memref<2x1x96xf32, #tpu.memory_space<vmem>>, %arg9: memref<2x32x32xbf16, #tpu.memory_space<vmem>>, %arg10: memref<2x1x32xf32, #tpu.memory_space<vmem>>, %arg11: memref<2x32x64xbf16, #tpu.memory_space<vmem>>, %arg12: memref<2x1x64xf32, #tpu.memory_space<vmem>>, %arg13: memref<2x2x32x32xbf16, #tpu.memory_space<vmem>>, %arg14: memref<2x2x1x32xf32, #tpu.memory_space<vmem>>, %arg15: memref<2x6x32xf32, #tpu.memory_space<vmem>>, %arg16: memref<2x32x64xbf16, #tpu.memory_space<vmem>>, %arg17: memref<2x1x64xf32, #tpu.memory_space<vmem>>, %arg18: memref<2x64x32xbf16, #tpu.memory_space<vmem>>, %arg19: memref<2x1x32xf32, #tpu.memory_space<vmem>>, %arg20: memref<32x128xbf16, #tpu.memory_space<vmem>>, %arg21: memref<1x128xf32, #tpu.memory_space<vmem>>, %arg22: memref<1x9x128xf32, #tpu.memory_space<vmem>>) attributes {dimension_semantics = [#tpu.dimension_semantics<parallel>], iteration_bounds = array<i64: 2>, scalar_prefetch = 0 : i64, scratch_operands = 0 : i64, tpu.core_type = #tpu.core_type<tc>, window_params = [{transform_indices = @transform_0, window_bounds = array<i64: 1, 10, 48>}, {transform_indices = @transform_1, window_bounds = array<i64: 1, 9, 55>}, {pipeline_mode = #tpu.pipeline_mode<synchronous>, transform_indices = @transform_2, window_bounds = array<i64: 48, 32>}, {pipeline_mode = #tpu.pipeline_mode<synchronous>, transform_indices = @transform_3, window_bounds = array<i64: 55, 32>}, {pipeline_mode = #tpu.pipeline_mode<synchronous>, transform_indices = @transform_4, window_bounds = array<i64: 10, 32>}, {pipeline_mode = #tpu.pipeline_mode<synchronous>, transform_indices = @transform_5, window_bounds = array<i64: 9, 32>}, {pipeline_mode = #tpu.pipeline_mode<synchronous>, transform_indices = @transform_6, window_bounds = array<i64: 2, 32, 96>}, {pipeline_mode = #tpu.pipeline_mode<synchronous>, transform_indices = @transform_7, window_bounds = array<i64: 2, 1, 96>}, {pipeline_mode = #tpu.pipeline_mode<synchronous>, transform_indices = @transform_8, window_bounds = array<i64: 2, 32, 32>}, {pipeline_mode = #tpu.pipeline_mode<synchronous>, transform_indices = @transform_9, window_bounds = array<i64: 2, 1, 32>}, {pipeline_mode = #tpu.pipeline_mode<synchronous>, transform_indices = @transform_10, window_bounds = array<i64: 2, 32, 64>}, {pipeline_mode = #tpu.pipeline_mode<synchronous>, transform_indices = @transform_11, window_bounds = array<i64: 2, 1, 64>}, {pipeline_mode = #tpu.pipeline_mode<synchronous>, transform_indices = @transform_12, window_bounds = array<i64: 2, 2, 32, 32>}, {pipeline_mode = #tpu.pipeline_mode<synchronous>, transform_indices = @transform_13, window_bounds = array<i64: 2, 2, 1, 32>}, {pipeline_mode = #tpu.pipeline_mode<synchronous>, transform_indices = @transform_14, window_bounds = array<i64: 2, 6, 32>}, {pipeline_mode = #tpu.pipeline_mode<synchronous>, transform_indices = @transform_15, window_bounds = array<i64: 2, 32, 64>}, {pipeline_mode = #tpu.pipeline_mode<synchronous>, transform_indices = @transform_16, window_bounds = array<i64: 2, 1, 64>}, {pipeline_mode = #tpu.pipeline_mode<synchronous>, transform_indices = @transform_17, window_bounds = array<i64: 2, 64, 32>}, {pipeline_mode = #tpu.pipeline_mode<synchronous>, transform_indices = @transform_18, window_bounds = array<i64: 2, 1, 32>}, {pipeline_mode = #tpu.pipeline_mode<synchronous>, transform_indices = @transform_19, window_bounds = array<i64: 32, 128>}, {pipeline_mode = #tpu.pipeline_mode<synchronous>, transform_indices = @transform_20, window_bounds = array<i64: 1, 128>}, {transform_indices = @transform_21, window_bounds = array<i64: 1, 9, 128>}]} {
    %c0 = arith.constant 0 : index
    %c0_0 = arith.constant 0 : index
    %c0_1 = arith.constant 0 : index
    %0 = vector.load %arg1[%c0, %c0_0, %c0_1] : memref<1x10x48xf32, #tpu.memory_space<vmem>>, vector<1x10x48xf32>
    %1 = vector.shape_cast %0 : vector<1x10x48xf32> to vector<10x48xf32>
    %2 = arith.truncf %1 : vector<10x48xf32> to vector<10x48xbf16>
    %c0_2 = arith.constant 0 : index
    %c0_3 = arith.constant 0 : index
    %3 = vector.load %arg3[%c0_2, %c0_3] : memref<48x32xbf16, #tpu.memory_space<vmem>>, vector<48x32xbf16>
    %cst = arith.constant dense<0.000000e+00> : vector<10x32xf32>
    %4 = tpu.matmul %2, %3, %cst {dimension_numbers = #tpu.dot_dimension_numbers<[1], [0], [0], [1], [0, 0, 1, 1], [], []>} : vector<10x48xbf16>, vector<48x32xbf16>, vector<10x32xf32> -> vector<10x32xf32>
    %c0_4 = arith.constant 0 : index
    %c0_5 = arith.constant 0 : index
    %5 = vector.load %arg5[%c0_4, %c0_5] : memref<10x32xf32, #tpu.memory_space<vmem>>, vector<10x32xf32>
    %6 = arith.addf %4, %5 : vector<10x32xf32>
    %c0_6 = arith.constant 0 : index
    %c0_7 = arith.constant 0 : index
    %c0_8 = arith.constant 0 : index
    %7 = vector.load %arg2[%c0_6, %c0_7, %c0_8] : memref<1x9x55xf32, #tpu.memory_space<vmem>>, vector<1x9x55xf32>
    %8 = vector.shape_cast %7 : vector<1x9x55xf32> to vector<9x55xf32>
    %9 = arith.truncf %8 : vector<9x55xf32> to vector<9x55xbf16>
    %c0_9 = arith.constant 0 : index
    %c0_10 = arith.constant 0 : index
    %10 = vector.load %arg4[%c0_9, %c0_10] : memref<55x32xbf16, #tpu.memory_space<vmem>>, vector<55x32xbf16>
    %cst_11 = arith.constant dense<0.000000e+00> : vector<9x32xf32>
    %11 = tpu.matmul %9, %10, %cst_11 {dimension_numbers = #tpu.dot_dimension_numbers<[1], [0], [0], [1], [0, 0, 1, 1], [], []>} : vector<9x55xbf16>, vector<55x32xbf16>, vector<9x32xf32> -> vector<9x32xf32>
    %c0_12 = arith.constant 0 : index
    %c0_13 = arith.constant 0 : index
    %12 = vector.load %arg6[%c0_12, %c0_13] : memref<9x32xf32, #tpu.memory_space<vmem>>, vector<9x32xf32>
    %13 = arith.addf %11, %12 : vector<9x32xf32>
    %14 = tpu.iota {dimensions = array<i32: 0>} : vector<9x9xi32>
    %15 = tpu.iota {dimensions = array<i32: 1>} : vector<9x9xi32>
    %16 = arith.cmpi sgt, %15, %14 : vector<9x9xi32>
    %cst_14 = arith.constant -1.000000e+09 : f32
    %cst_15 = arith.constant 0.000000e+00 : f32
    %17 = vector.broadcast %cst_14 : f32 to vector<9x9xf32>
    %18 = vector.broadcast %cst_15 : f32 to vector<9x9xf32>
    %19 = arith.select %16, %17, %18 : vector<9x9xi1>, vector<9x9xf32>
    %20 = arith.truncf %6 : vector<10x32xf32> to vector<10x32xbf16>
    %c0_16 = arith.constant 0 : index
    %c0_17 = arith.constant 0 : index
    %c0_18 = arith.constant 0 : index
    %21 = vector.load %arg15[%c0_16, %c0_17, %c0_18] : memref<2x6x32xf32, #tpu.memory_space<vmem>>, vector<1x6x32xf32>
    %22 = vector.shape_cast %21 : vector<1x6x32xf32> to vector<6x32xf32>
    %23 = arith.truncf %13 : vector<9x32xf32> to vector<9x32xbf16>
    %c0_19 = arith.constant 0 : index
    %c0_20 = arith.constant 0 : index
    %c0_21 = arith.constant 0 : index
    %24 = vector.load %arg7[%c0_19, %c0_20, %c0_21] : memref<2x32x96xbf16, #tpu.memory_space<vmem>>, vector<1x32x96xbf16>
    %25 = vector.shape_cast %24 : vector<1x32x96xbf16> to vector<32x96xbf16>
    %cst_22 = arith.constant dense<0.000000e+00> : vector<9x96xf32>
    %26 = tpu.matmul %23, %25, %cst_22 {dimension_numbers = #tpu.dot_dimension_numbers<[1], [0], [0], [1], [0, 0, 1, 1], [], []>} : vector<9x32xbf16>, vector<32x96xbf16>, vector<9x96xf32> -> vector<9x96xf32>
    %c0_23 = arith.constant 0 : index
    %c0_24 = arith.constant 0 : index
    %c0_25 = arith.constant 0 : index
    %27 = vector.load %arg8[%c0_23, %c0_24, %c0_25] : memref<2x1x96xf32, #tpu.memory_space<vmem>>, vector<1x1x96xf32>
    %28 = vector.shape_cast %27 : vector<1x1x96xf32> to vector<1x96xf32>
    %29 = vector.broadcast %28 : vector<1x96xf32> to vector<9x96xf32>
    %30 = arith.addf %26, %29 : vector<9x96xf32>
    %31 = arith.truncf %30 : vector<9x96xf32> to vector<9x96xbf16>
    %32 = vector.extract_strided_slice %31 {offsets = [0, 0], sizes = [9, 32], strides = [1, 1]} : vector<9x96xbf16> to vector<9x32xbf16>
    %33 = vector.extract_strided_slice %31 {offsets = [0, 32], sizes = [9, 32], strides = [1, 1]} : vector<9x96xbf16> to vector<9x32xbf16>
    %34 = vector.extract_strided_slice %31 {offsets = [0, 64], sizes = [9, 32], strides = [1, 1]} : vector<9x96xbf16> to vector<9x32xbf16>
    %c0_26 = arith.constant 0 : index
    %c0_27 = arith.constant 0 : index
    %c0_28 = arith.constant 0 : index
    %c0_29 = arith.constant 0 : index
    %35 = vector.load %arg13[%c0_26, %c0_27, %c0_28, %c0_29] : memref<2x2x32x32xbf16, #tpu.memory_space<vmem>>, vector<1x1x32x32xbf16>
    %36 = vector.shape_cast %35 : vector<1x1x32x32xbf16> to vector<32x32xbf16>
    %c0_30 = arith.constant 0 : index
    %c0_31 = arith.constant 0 : index
    %c0_32 = arith.constant 0 : index
    %c0_33 = arith.constant 0 : index
    %37 = vector.load %arg14[%c0_30, %c0_31, %c0_32, %c0_33] : memref<2x2x1x32xf32, #tpu.memory_space<vmem>>, vector<1x1x1x32xf32>
    %38 = vector.shape_cast %37 : vector<1x1x1x32xf32> to vector<1x32xf32>
    %39 = vector.extract_strided_slice %32 {offsets = [0, 0], sizes = [9, 8], strides = [1, 1]} : vector<9x32xbf16> to vector<9x8xbf16>
    %40 = vector.extract_strided_slice %33 {offsets = [0, 0], sizes = [9, 8], strides = [1, 1]} : vector<9x32xbf16> to vector<9x8xbf16>
    %cst_34 = arith.constant dense<0.000000e+00> : vector<9x9xf32>
    %41 = tpu.matmul %39, %40, %cst_34 {dimension_numbers = #tpu.dot_dimension_numbers<[1], [1], [0], [0], [0, 0, 1, 0], [], []>} : vector<9x8xbf16>, vector<9x8xbf16>, vector<9x9xf32> -> vector<9x9xf32>
    %cst_35 = arith.constant 0.353553385 : f32
    %42 = vector.broadcast %cst_35 : f32 to vector<9x9xf32>
    %43 = arith.mulf %41, %42 : vector<9x9xf32>
    %44 = arith.addf %43, %19 : vector<9x9xf32>
    %cst_36 = arith.constant dense<0xFF800000> : vector<9xf32>
    %45 = vector.multi_reduction <maximumf>, %44, %cst_36 [1] : vector<9x9xf32> to vector<9xf32>
    %46 = vector.shape_cast %45 : vector<9xf32> to vector<9x1xf32>
    %47 = vector.broadcast %46 : vector<9x1xf32> to vector<9x9xf32>
    %48 = arith.subf %44, %47 : vector<9x9xf32>
    %49 = math.exp %48 : vector<9x9xf32>
    %cst_37 = arith.constant dense<0.000000e+00> : vector<9xf32>
    %50 = vector.multi_reduction <add>, %49, %cst_37 [1] : vector<9x9xf32> to vector<9xf32>
    %51 = vector.shape_cast %50 : vector<9xf32> to vector<9x1xf32>
    %52 = tpu.reciprocal %51 {approx = true} : vector<9x1xf32> -> vector<9x1xf32>
    %53 = vector.broadcast %52 : vector<9x1xf32> to vector<9x9xf32>
    %54 = arith.mulf %49, %53 : vector<9x9xf32>
    %55 = arith.truncf %54 : vector<9x9xf32> to vector<9x9xbf16>
    %56 = vector.extract_strided_slice %34 {offsets = [0, 0], sizes = [9, 8], strides = [1, 1]} : vector<9x32xbf16> to vector<9x8xbf16>
    %cst_38 = arith.constant dense<0.000000e+00> : vector<9x8xf32>
    %57 = tpu.matmul %55, %56, %cst_38 {dimension_numbers = #tpu.dot_dimension_numbers<[1], [0], [0], [1], [0, 0, 1, 1], [], []>} : vector<9x9xbf16>, vector<9x8xbf16>, vector<9x8xf32> -> vector<9x8xf32>
    %58 = vector.extract_strided_slice %32 {offsets = [0, 8], sizes = [9, 8], strides = [1, 1]} : vector<9x32xbf16> to vector<9x8xbf16>
    %59 = vector.extract_strided_slice %33 {offsets = [0, 8], sizes = [9, 8], strides = [1, 1]} : vector<9x32xbf16> to vector<9x8xbf16>
    %cst_39 = arith.constant dense<0.000000e+00> : vector<9x9xf32>
    %60 = tpu.matmul %58, %59, %cst_39 {dimension_numbers = #tpu.dot_dimension_numbers<[1], [1], [0], [0], [0, 0, 1, 0], [], []>} : vector<9x8xbf16>, vector<9x8xbf16>, vector<9x9xf32> -> vector<9x9xf32>
    %cst_40 = arith.constant 0.353553385 : f32
    %61 = vector.broadcast %cst_40 : f32 to vector<9x9xf32>
    %62 = arith.mulf %60, %61 : vector<9x9xf32>
    %63 = arith.addf %62, %19 : vector<9x9xf32>
    %cst_41 = arith.constant dense<0xFF800000> : vector<9xf32>
    %64 = vector.multi_reduction <maximumf>, %63, %cst_41 [1] : vector<9x9xf32> to vector<9xf32>
    %65 = vector.shape_cast %64 : vector<9xf32> to vector<9x1xf32>
    %66 = vector.broadcast %65 : vector<9x1xf32> to vector<9x9xf32>
    %67 = arith.subf %63, %66 : vector<9x9xf32>
    %68 = math.exp %67 : vector<9x9xf32>
    %cst_42 = arith.constant dense<0.000000e+00> : vector<9xf32>
    %69 = vector.multi_reduction <add>, %68, %cst_42 [1] : vector<9x9xf32> to vector<9xf32>
    %70 = vector.shape_cast %69 : vector<9xf32> to vector<9x1xf32>
    %71 = tpu.reciprocal %70 {approx = true} : vector<9x1xf32> -> vector<9x1xf32>
    %72 = vector.broadcast %71 : vector<9x1xf32> to vector<9x9xf32>
    %73 = arith.mulf %68, %72 : vector<9x9xf32>
    %74 = arith.truncf %73 : vector<9x9xf32> to vector<9x9xbf16>
    %75 = vector.extract_strided_slice %34 {offsets = [0, 8], sizes = [9, 8], strides = [1, 1]} : vector<9x32xbf16> to vector<9x8xbf16>
    %cst_43 = arith.constant dense<0.000000e+00> : vector<9x8xf32>
    %76 = tpu.matmul %74, %75, %cst_43 {dimension_numbers = #tpu.dot_dimension_numbers<[1], [0], [0], [1], [0, 0, 1, 1], [], []>} : vector<9x9xbf16>, vector<9x8xbf16>, vector<9x8xf32> -> vector<9x8xf32>
    %77 = vector.extract_strided_slice %32 {offsets = [0, 16], sizes = [9, 8], strides = [1, 1]} : vector<9x32xbf16> to vector<9x8xbf16>
    %78 = vector.extract_strided_slice %33 {offsets = [0, 16], sizes = [9, 8], strides = [1, 1]} : vector<9x32xbf16> to vector<9x8xbf16>
    %cst_44 = arith.constant dense<0.000000e+00> : vector<9x9xf32>
    %79 = tpu.matmul %77, %78, %cst_44 {dimension_numbers = #tpu.dot_dimension_numbers<[1], [1], [0], [0], [0, 0, 1, 0], [], []>} : vector<9x8xbf16>, vector<9x8xbf16>, vector<9x9xf32> -> vector<9x9xf32>
    %cst_45 = arith.constant 0.353553385 : f32
    %80 = vector.broadcast %cst_45 : f32 to vector<9x9xf32>
    %81 = arith.mulf %79, %80 : vector<9x9xf32>
    %82 = arith.addf %81, %19 : vector<9x9xf32>
    %cst_46 = arith.constant dense<0xFF800000> : vector<9xf32>
    %83 = vector.multi_reduction <maximumf>, %82, %cst_46 [1] : vector<9x9xf32> to vector<9xf32>
    %84 = vector.shape_cast %83 : vector<9xf32> to vector<9x1xf32>
    %85 = vector.broadcast %84 : vector<9x1xf32> to vector<9x9xf32>
    %86 = arith.subf %82, %85 : vector<9x9xf32>
    %87 = math.exp %86 : vector<9x9xf32>
    %cst_47 = arith.constant dense<0.000000e+00> : vector<9xf32>
    %88 = vector.multi_reduction <add>, %87, %cst_47 [1] : vector<9x9xf32> to vector<9xf32>
    %89 = vector.shape_cast %88 : vector<9xf32> to vector<9x1xf32>
    %90 = tpu.reciprocal %89 {approx = true} : vector<9x1xf32> -> vector<9x1xf32>
    %91 = vector.broadcast %90 : vector<9x1xf32> to vector<9x9xf32>
    %92 = arith.mulf %87, %91 : vector<9x9xf32>
    %93 = arith.truncf %92 : vector<9x9xf32> to vector<9x9xbf16>
    %94 = vector.extract_strided_slice %34 {offsets = [0, 16], sizes = [9, 8], strides = [1, 1]} : vector<9x32xbf16> to vector<9x8xbf16>
    %cst_48 = arith.constant dense<0.000000e+00> : vector<9x8xf32>
    %95 = tpu.matmul %93, %94, %cst_48 {dimension_numbers = #tpu.dot_dimension_numbers<[1], [0], [0], [1], [0, 0, 1, 1], [], []>} : vector<9x9xbf16>, vector<9x8xbf16>, vector<9x8xf32> -> vector<9x8xf32>
    %96 = vector.extract_strided_slice %32 {offsets = [0, 24], sizes = [9, 8], strides = [1, 1]} : vector<9x32xbf16> to vector<9x8xbf16>
    %97 = vector.extract_strided_slice %33 {offsets = [0, 24], sizes = [9, 8], strides = [1, 1]} : vector<9x32xbf16> to vector<9x8xbf16>
    %cst_49 = arith.constant dense<0.000000e+00> : vector<9x9xf32>
    %98 = tpu.matmul %96, %97, %cst_49 {dimension_numbers = #tpu.dot_dimension_numbers<[1], [1], [0], [0], [0, 0, 1, 0], [], []>} : vector<9x8xbf16>, vector<9x8xbf16>, vector<9x9xf32> -> vector<9x9xf32>
    %cst_50 = arith.constant 0.353553385 : f32
    %99 = vector.broadcast %cst_50 : f32 to vector<9x9xf32>
    %100 = arith.mulf %98, %99 : vector<9x9xf32>
    %101 = arith.addf %100, %19 : vector<9x9xf32>
    %cst_51 = arith.constant dense<0xFF800000> : vector<9xf32>
    %102 = vector.multi_reduction <maximumf>, %101, %cst_51 [1] : vector<9x9xf32> to vector<9xf32>
    %103 = vector.shape_cast %102 : vector<9xf32> to vector<9x1xf32>
    %104 = vector.broadcast %103 : vector<9x1xf32> to vector<9x9xf32>
    %105 = arith.subf %101, %104 : vector<9x9xf32>
    %106 = math.exp %105 : vector<9x9xf32>
    %cst_52 = arith.constant dense<0.000000e+00> : vector<9xf32>
    %107 = vector.multi_reduction <add>, %106, %cst_52 [1] : vector<9x9xf32> to vector<9xf32>
    %108 = vector.shape_cast %107 : vector<9xf32> to vector<9x1xf32>
    %109 = tpu.reciprocal %108 {approx = true} : vector<9x1xf32> -> vector<9x1xf32>
    %110 = vector.broadcast %109 : vector<9x1xf32> to vector<9x9xf32>
    %111 = arith.mulf %106, %110 : vector<9x9xf32>
    %112 = arith.truncf %111 : vector<9x9xf32> to vector<9x9xbf16>
    %113 = vector.extract_strided_slice %34 {offsets = [0, 24], sizes = [9, 8], strides = [1, 1]} : vector<9x32xbf16> to vector<9x8xbf16>
    %cst_53 = arith.constant dense<0.000000e+00> : vector<9x8xf32>
    %114 = tpu.matmul %112, %113, %cst_53 {dimension_numbers = #tpu.dot_dimension_numbers<[1], [0], [0], [1], [0, 0, 1, 1], [], []>} : vector<9x9xbf16>, vector<9x8xbf16>, vector<9x8xf32> -> vector<9x8xf32>
    %115 = tpu.concatenate %57, %76, %95, %114 in 1 : vector<9x8xf32>, vector<9x8xf32>, vector<9x8xf32>, vector<9x8xf32> -> vector<9x32xf32>
    %116 = arith.truncf %115 : vector<9x32xf32> to vector<9x32xbf16>
    %cst_54 = arith.constant dense<0.000000e+00> : vector<9x32xf32>
    %117 = tpu.matmul %116, %36, %cst_54 {dimension_numbers = #tpu.dot_dimension_numbers<[1], [0], [0], [1], [0, 0, 1, 1], [], []>} : vector<9x32xbf16>, vector<32x32xbf16>, vector<9x32xf32> -> vector<9x32xf32>
    %118 = vector.broadcast %38 : vector<1x32xf32> to vector<9x32xf32>
    %119 = arith.addf %117, %118 : vector<9x32xf32>
    %120 = arith.addf %13, %119 : vector<9x32xf32>
    %121 = vector.extract_strided_slice %22 {offsets = [0, 0], sizes = [1, 32], strides = [1, 1]} : vector<6x32xf32> to vector<1x32xf32>
    %122 = vector.extract_strided_slice %22 {offsets = [1, 0], sizes = [1, 32], strides = [1, 1]} : vector<6x32xf32> to vector<1x32xf32>
    %cst_55 = arith.constant dense<0.000000e+00> : vector<9xf32>
    %123 = vector.multi_reduction <add>, %120, %cst_55 [1] : vector<9x32xf32> to vector<9xf32>
    %124 = vector.shape_cast %123 : vector<9xf32> to vector<9x1xf32>
    %cst_56 = arith.constant 3.200000e+01 : f32
    %125 = vector.broadcast %cst_56 : f32 to vector<9x1xf32>
    %126 = arith.divf %124, %125 : vector<9x1xf32>
    %127 = arith.mulf %120, %120 : vector<9x32xf32>
    %cst_57 = arith.constant dense<0.000000e+00> : vector<9xf32>
    %128 = vector.multi_reduction <add>, %127, %cst_57 [1] : vector<9x32xf32> to vector<9xf32>
    %129 = vector.shape_cast %128 : vector<9xf32> to vector<9x1xf32>
    %cst_58 = arith.constant 3.200000e+01 : f32
    %130 = vector.broadcast %cst_58 : f32 to vector<9x1xf32>
    %131 = arith.divf %129, %130 : vector<9x1xf32>
    %132 = arith.mulf %126, %126 : vector<9x1xf32>
    %133 = arith.subf %131, %132 : vector<9x1xf32>
    %134 = vector.broadcast %126 : vector<9x1xf32> to vector<9x32xf32>
    %135 = arith.subf %120, %134 : vector<9x32xf32>
    %cst_59 = arith.constant 9.99999974E-6 : f32
    %136 = vector.broadcast %cst_59 : f32 to vector<9x1xf32>
    %137 = arith.addf %133, %136 : vector<9x1xf32>
    %138 = math.rsqrt %137 : vector<9x1xf32>
    %139 = vector.broadcast %138 : vector<9x1xf32> to vector<9x32xf32>
    %140 = arith.mulf %135, %139 : vector<9x32xf32>
    %141 = vector.broadcast %121 : vector<1x32xf32> to vector<9x32xf32>
    %142 = arith.mulf %140, %141 : vector<9x32xf32>
    %143 = vector.broadcast %122 : vector<1x32xf32> to vector<9x32xf32>
    %144 = arith.addf %142, %143 : vector<9x32xf32>
    %145 = arith.truncf %144 : vector<9x32xf32> to vector<9x32xbf16>
    %c0_60 = arith.constant 0 : index
    %c0_61 = arith.constant 0 : index
    %c0_62 = arith.constant 0 : index
    %146 = vector.load %arg9[%c0_60, %c0_61, %c0_62] : memref<2x32x32xbf16, #tpu.memory_space<vmem>>, vector<1x32x32xbf16>
    %147 = vector.shape_cast %146 : vector<1x32x32xbf16> to vector<32x32xbf16>
    %cst_63 = arith.constant dense<0.000000e+00> : vector<9x32xf32>
    %148 = tpu.matmul %145, %147, %cst_63 {dimension_numbers = #tpu.dot_dimension_numbers<[1], [0], [0], [1], [0, 0, 1, 1], [], []>} : vector<9x32xbf16>, vector<32x32xbf16>, vector<9x32xf32> -> vector<9x32xf32>
    %c0_64 = arith.constant 0 : index
    %c0_65 = arith.constant 0 : index
    %c0_66 = arith.constant 0 : index
    %149 = vector.load %arg10[%c0_64, %c0_65, %c0_66] : memref<2x1x32xf32, #tpu.memory_space<vmem>>, vector<1x1x32xf32>
    %150 = vector.shape_cast %149 : vector<1x1x32xf32> to vector<1x32xf32>
    %151 = vector.broadcast %150 : vector<1x32xf32> to vector<9x32xf32>
    %152 = arith.addf %148, %151 : vector<9x32xf32>
    %153 = arith.truncf %152 : vector<9x32xf32> to vector<9x32xbf16>
    %c0_67 = arith.constant 0 : index
    %c0_68 = arith.constant 0 : index
    %c0_69 = arith.constant 0 : index
    %154 = vector.load %arg11[%c0_67, %c0_68, %c0_69] : memref<2x32x64xbf16, #tpu.memory_space<vmem>>, vector<1x32x64xbf16>
    %155 = vector.shape_cast %154 : vector<1x32x64xbf16> to vector<32x64xbf16>
    %cst_70 = arith.constant dense<0.000000e+00> : vector<10x64xf32>
    %156 = tpu.matmul %20, %155, %cst_70 {dimension_numbers = #tpu.dot_dimension_numbers<[1], [0], [0], [1], [0, 0, 1, 1], [], []>} : vector<10x32xbf16>, vector<32x64xbf16>, vector<10x64xf32> -> vector<10x64xf32>
    %c0_71 = arith.constant 0 : index
    %c0_72 = arith.constant 0 : index
    %c0_73 = arith.constant 0 : index
    %157 = vector.load %arg12[%c0_71, %c0_72, %c0_73] : memref<2x1x64xf32, #tpu.memory_space<vmem>>, vector<1x1x64xf32>
    %158 = vector.shape_cast %157 : vector<1x1x64xf32> to vector<1x64xf32>
    %159 = vector.broadcast %158 : vector<1x64xf32> to vector<10x64xf32>
    %160 = arith.addf %156, %159 : vector<10x64xf32>
    %161 = arith.truncf %160 : vector<10x64xf32> to vector<10x64xbf16>
    %162 = vector.extract_strided_slice %161 {offsets = [0, 0], sizes = [10, 32], strides = [1, 1]} : vector<10x64xbf16> to vector<10x32xbf16>
    %163 = vector.extract_strided_slice %161 {offsets = [0, 32], sizes = [10, 32], strides = [1, 1]} : vector<10x64xbf16> to vector<10x32xbf16>
    %c0_74 = arith.constant 0 : index
    %c1 = arith.constant 1 : index
    %c0_75 = arith.constant 0 : index
    %c0_76 = arith.constant 0 : index
    %164 = vector.load %arg13[%c0_74, %c1, %c0_75, %c0_76] : memref<2x2x32x32xbf16, #tpu.memory_space<vmem>>, vector<1x1x32x32xbf16>
    %165 = vector.shape_cast %164 : vector<1x1x32x32xbf16> to vector<32x32xbf16>
    %c0_77 = arith.constant 0 : index
    %c1_78 = arith.constant 1 : index
    %c0_79 = arith.constant 0 : index
    %c0_80 = arith.constant 0 : index
    %166 = vector.load %arg14[%c0_77, %c1_78, %c0_79, %c0_80] : memref<2x2x1x32xf32, #tpu.memory_space<vmem>>, vector<1x1x1x32xf32>
    %167 = vector.shape_cast %166 : vector<1x1x1x32xf32> to vector<1x32xf32>
    %168 = vector.extract_strided_slice %153 {offsets = [0, 0], sizes = [9, 8], strides = [1, 1]} : vector<9x32xbf16> to vector<9x8xbf16>
    %169 = vector.extract_strided_slice %162 {offsets = [0, 0], sizes = [10, 8], strides = [1, 1]} : vector<10x32xbf16> to vector<10x8xbf16>
    %cst_81 = arith.constant dense<0.000000e+00> : vector<9x10xf32>
    %170 = tpu.matmul %168, %169, %cst_81 {dimension_numbers = #tpu.dot_dimension_numbers<[1], [1], [0], [0], [0, 0, 1, 0], [], []>} : vector<9x8xbf16>, vector<10x8xbf16>, vector<9x10xf32> -> vector<9x10xf32>
    %cst_82 = arith.constant 0.353553385 : f32
    %171 = vector.broadcast %cst_82 : f32 to vector<9x10xf32>
    %172 = arith.mulf %170, %171 : vector<9x10xf32>
    %cst_83 = arith.constant dense<0xFF800000> : vector<9xf32>
    %173 = vector.multi_reduction <maximumf>, %172, %cst_83 [1] : vector<9x10xf32> to vector<9xf32>
    %174 = vector.shape_cast %173 : vector<9xf32> to vector<9x1xf32>
    %175 = vector.broadcast %174 : vector<9x1xf32> to vector<9x10xf32>
    %176 = arith.subf %172, %175 : vector<9x10xf32>
    %177 = math.exp %176 : vector<9x10xf32>
    %cst_84 = arith.constant dense<0.000000e+00> : vector<9xf32>
    %178 = vector.multi_reduction <add>, %177, %cst_84 [1] : vector<9x10xf32> to vector<9xf32>
    %179 = vector.shape_cast %178 : vector<9xf32> to vector<9x1xf32>
    %180 = tpu.reciprocal %179 {approx = true} : vector<9x1xf32> -> vector<9x1xf32>
    %181 = vector.broadcast %180 : vector<9x1xf32> to vector<9x10xf32>
    %182 = arith.mulf %177, %181 : vector<9x10xf32>
    %183 = arith.truncf %182 : vector<9x10xf32> to vector<9x10xbf16>
    %184 = vector.extract_strided_slice %163 {offsets = [0, 0], sizes = [10, 8], strides = [1, 1]} : vector<10x32xbf16> to vector<10x8xbf16>
    %cst_85 = arith.constant dense<0.000000e+00> : vector<9x8xf32>
    %185 = tpu.matmul %183, %184, %cst_85 {dimension_numbers = #tpu.dot_dimension_numbers<[1], [0], [0], [1], [0, 0, 1, 1], [], []>} : vector<9x10xbf16>, vector<10x8xbf16>, vector<9x8xf32> -> vector<9x8xf32>
    %186 = vector.extract_strided_slice %153 {offsets = [0, 8], sizes = [9, 8], strides = [1, 1]} : vector<9x32xbf16> to vector<9x8xbf16>
    %187 = vector.extract_strided_slice %162 {offsets = [0, 8], sizes = [10, 8], strides = [1, 1]} : vector<10x32xbf16> to vector<10x8xbf16>
    %cst_86 = arith.constant dense<0.000000e+00> : vector<9x10xf32>
    %188 = tpu.matmul %186, %187, %cst_86 {dimension_numbers = #tpu.dot_dimension_numbers<[1], [1], [0], [0], [0, 0, 1, 0], [], []>} : vector<9x8xbf16>, vector<10x8xbf16>, vector<9x10xf32> -> vector<9x10xf32>
    %cst_87 = arith.constant 0.353553385 : f32
    %189 = vector.broadcast %cst_87 : f32 to vector<9x10xf32>
    %190 = arith.mulf %188, %189 : vector<9x10xf32>
    %cst_88 = arith.constant dense<0xFF800000> : vector<9xf32>
    %191 = vector.multi_reduction <maximumf>, %190, %cst_88 [1] : vector<9x10xf32> to vector<9xf32>
    %192 = vector.shape_cast %191 : vector<9xf32> to vector<9x1xf32>
    %193 = vector.broadcast %192 : vector<9x1xf32> to vector<9x10xf32>
    %194 = arith.subf %190, %193 : vector<9x10xf32>
    %195 = math.exp %194 : vector<9x10xf32>
    %cst_89 = arith.constant dense<0.000000e+00> : vector<9xf32>
    %196 = vector.multi_reduction <add>, %195, %cst_89 [1] : vector<9x10xf32> to vector<9xf32>
    %197 = vector.shape_cast %196 : vector<9xf32> to vector<9x1xf32>
    %198 = tpu.reciprocal %197 {approx = true} : vector<9x1xf32> -> vector<9x1xf32>
    %199 = vector.broadcast %198 : vector<9x1xf32> to vector<9x10xf32>
    %200 = arith.mulf %195, %199 : vector<9x10xf32>
    %201 = arith.truncf %200 : vector<9x10xf32> to vector<9x10xbf16>
    %202 = vector.extract_strided_slice %163 {offsets = [0, 8], sizes = [10, 8], strides = [1, 1]} : vector<10x32xbf16> to vector<10x8xbf16>
    %cst_90 = arith.constant dense<0.000000e+00> : vector<9x8xf32>
    %203 = tpu.matmul %201, %202, %cst_90 {dimension_numbers = #tpu.dot_dimension_numbers<[1], [0], [0], [1], [0, 0, 1, 1], [], []>} : vector<9x10xbf16>, vector<10x8xbf16>, vector<9x8xf32> -> vector<9x8xf32>
    %204 = vector.extract_strided_slice %153 {offsets = [0, 16], sizes = [9, 8], strides = [1, 1]} : vector<9x32xbf16> to vector<9x8xbf16>
    %205 = vector.extract_strided_slice %162 {offsets = [0, 16], sizes = [10, 8], strides = [1, 1]} : vector<10x32xbf16> to vector<10x8xbf16>
    %cst_91 = arith.constant dense<0.000000e+00> : vector<9x10xf32>
    %206 = tpu.matmul %204, %205, %cst_91 {dimension_numbers = #tpu.dot_dimension_numbers<[1], [1], [0], [0], [0, 0, 1, 0], [], []>} : vector<9x8xbf16>, vector<10x8xbf16>, vector<9x10xf32> -> vector<9x10xf32>
    %cst_92 = arith.constant 0.353553385 : f32
    %207 = vector.broadcast %cst_92 : f32 to vector<9x10xf32>
    %208 = arith.mulf %206, %207 : vector<9x10xf32>
    %cst_93 = arith.constant dense<0xFF800000> : vector<9xf32>
    %209 = vector.multi_reduction <maximumf>, %208, %cst_93 [1] : vector<9x10xf32> to vector<9xf32>
    %210 = vector.shape_cast %209 : vector<9xf32> to vector<9x1xf32>
    %211 = vector.broadcast %210 : vector<9x1xf32> to vector<9x10xf32>
    %212 = arith.subf %208, %211 : vector<9x10xf32>
    %213 = math.exp %212 : vector<9x10xf32>
    %cst_94 = arith.constant dense<0.000000e+00> : vector<9xf32>
    %214 = vector.multi_reduction <add>, %213, %cst_94 [1] : vector<9x10xf32> to vector<9xf32>
    %215 = vector.shape_cast %214 : vector<9xf32> to vector<9x1xf32>
    %216 = tpu.reciprocal %215 {approx = true} : vector<9x1xf32> -> vector<9x1xf32>
    %217 = vector.broadcast %216 : vector<9x1xf32> to vector<9x10xf32>
    %218 = arith.mulf %213, %217 : vector<9x10xf32>
    %219 = arith.truncf %218 : vector<9x10xf32> to vector<9x10xbf16>
    %220 = vector.extract_strided_slice %163 {offsets = [0, 16], sizes = [10, 8], strides = [1, 1]} : vector<10x32xbf16> to vector<10x8xbf16>
    %cst_95 = arith.constant dense<0.000000e+00> : vector<9x8xf32>
    %221 = tpu.matmul %219, %220, %cst_95 {dimension_numbers = #tpu.dot_dimension_numbers<[1], [0], [0], [1], [0, 0, 1, 1], [], []>} : vector<9x10xbf16>, vector<10x8xbf16>, vector<9x8xf32> -> vector<9x8xf32>
    %222 = vector.extract_strided_slice %153 {offsets = [0, 24], sizes = [9, 8], strides = [1, 1]} : vector<9x32xbf16> to vector<9x8xbf16>
    %223 = vector.extract_strided_slice %162 {offsets = [0, 24], sizes = [10, 8], strides = [1, 1]} : vector<10x32xbf16> to vector<10x8xbf16>
    %cst_96 = arith.constant dense<0.000000e+00> : vector<9x10xf32>
    %224 = tpu.matmul %222, %223, %cst_96 {dimension_numbers = #tpu.dot_dimension_numbers<[1], [1], [0], [0], [0, 0, 1, 0], [], []>} : vector<9x8xbf16>, vector<10x8xbf16>, vector<9x10xf32> -> vector<9x10xf32>
    %cst_97 = arith.constant 0.353553385 : f32
    %225 = vector.broadcast %cst_97 : f32 to vector<9x10xf32>
    %226 = arith.mulf %224, %225 : vector<9x10xf32>
    %cst_98 = arith.constant dense<0xFF800000> : vector<9xf32>
    %227 = vector.multi_reduction <maximumf>, %226, %cst_98 [1] : vector<9x10xf32> to vector<9xf32>
    %228 = vector.shape_cast %227 : vector<9xf32> to vector<9x1xf32>
    %229 = vector.broadcast %228 : vector<9x1xf32> to vector<9x10xf32>
    %230 = arith.subf %226, %229 : vector<9x10xf32>
    %231 = math.exp %230 : vector<9x10xf32>
    %cst_99 = arith.constant dense<0.000000e+00> : vector<9xf32>
    %232 = vector.multi_reduction <add>, %231, %cst_99 [1] : vector<9x10xf32> to vector<9xf32>
    %233 = vector.shape_cast %232 : vector<9xf32> to vector<9x1xf32>
    %234 = tpu.reciprocal %233 {approx = true} : vector<9x1xf32> -> vector<9x1xf32>
    %235 = vector.broadcast %234 : vector<9x1xf32> to vector<9x10xf32>
    %236 = arith.mulf %231, %235 : vector<9x10xf32>
    %237 = arith.truncf %236 : vector<9x10xf32> to vector<9x10xbf16>
    %238 = vector.extract_strided_slice %163 {offsets = [0, 24], sizes = [10, 8], strides = [1, 1]} : vector<10x32xbf16> to vector<10x8xbf16>
    %cst_100 = arith.constant dense<0.000000e+00> : vector<9x8xf32>
    %239 = tpu.matmul %237, %238, %cst_100 {dimension_numbers = #tpu.dot_dimension_numbers<[1], [0], [0], [1], [0, 0, 1, 1], [], []>} : vector<9x10xbf16>, vector<10x8xbf16>, vector<9x8xf32> -> vector<9x8xf32>
    %240 = tpu.concatenate %185, %203, %221, %239 in 1 : vector<9x8xf32>, vector<9x8xf32>, vector<9x8xf32>, vector<9x8xf32> -> vector<9x32xf32>
    %241 = arith.truncf %240 : vector<9x32xf32> to vector<9x32xbf16>
    %cst_101 = arith.constant dense<0.000000e+00> : vector<9x32xf32>
    %242 = tpu.matmul %241, %165, %cst_101 {dimension_numbers = #tpu.dot_dimension_numbers<[1], [0], [0], [1], [0, 0, 1, 1], [], []>} : vector<9x32xbf16>, vector<32x32xbf16>, vector<9x32xf32> -> vector<9x32xf32>
    %243 = vector.broadcast %167 : vector<1x32xf32> to vector<9x32xf32>
    %244 = arith.addf %242, %243 : vector<9x32xf32>
    %245 = arith.addf %144, %244 : vector<9x32xf32>
    %246 = vector.extract_strided_slice %22 {offsets = [2, 0], sizes = [1, 32], strides = [1, 1]} : vector<6x32xf32> to vector<1x32xf32>
    %247 = vector.extract_strided_slice %22 {offsets = [3, 0], sizes = [1, 32], strides = [1, 1]} : vector<6x32xf32> to vector<1x32xf32>
    %cst_102 = arith.constant dense<0.000000e+00> : vector<9xf32>
    %248 = vector.multi_reduction <add>, %245, %cst_102 [1] : vector<9x32xf32> to vector<9xf32>
    %249 = vector.shape_cast %248 : vector<9xf32> to vector<9x1xf32>
    %cst_103 = arith.constant 3.200000e+01 : f32
    %250 = vector.broadcast %cst_103 : f32 to vector<9x1xf32>
    %251 = arith.divf %249, %250 : vector<9x1xf32>
    %252 = arith.mulf %245, %245 : vector<9x32xf32>
    %cst_104 = arith.constant dense<0.000000e+00> : vector<9xf32>
    %253 = vector.multi_reduction <add>, %252, %cst_104 [1] : vector<9x32xf32> to vector<9xf32>
    %254 = vector.shape_cast %253 : vector<9xf32> to vector<9x1xf32>
    %cst_105 = arith.constant 3.200000e+01 : f32
    %255 = vector.broadcast %cst_105 : f32 to vector<9x1xf32>
    %256 = arith.divf %254, %255 : vector<9x1xf32>
    %257 = arith.mulf %251, %251 : vector<9x1xf32>
    %258 = arith.subf %256, %257 : vector<9x1xf32>
    %259 = vector.broadcast %251 : vector<9x1xf32> to vector<9x32xf32>
    %260 = arith.subf %245, %259 : vector<9x32xf32>
    %cst_106 = arith.constant 9.99999974E-6 : f32
    %261 = vector.broadcast %cst_106 : f32 to vector<9x1xf32>
    %262 = arith.addf %258, %261 : vector<9x1xf32>
    %263 = math.rsqrt %262 : vector<9x1xf32>
    %264 = vector.broadcast %263 : vector<9x1xf32> to vector<9x32xf32>
    %265 = arith.mulf %260, %264 : vector<9x32xf32>
    %266 = vector.broadcast %246 : vector<1x32xf32> to vector<9x32xf32>
    %267 = arith.mulf %265, %266 : vector<9x32xf32>
    %268 = vector.broadcast %247 : vector<1x32xf32> to vector<9x32xf32>
    %269 = arith.addf %267, %268 : vector<9x32xf32>
    %270 = arith.truncf %269 : vector<9x32xf32> to vector<9x32xbf16>
    %c0_107 = arith.constant 0 : index
    %c0_108 = arith.constant 0 : index
    %c0_109 = arith.constant 0 : index
    %271 = vector.load %arg16[%c0_107, %c0_108, %c0_109] : memref<2x32x64xbf16, #tpu.memory_space<vmem>>, vector<1x32x64xbf16>
    %272 = vector.shape_cast %271 : vector<1x32x64xbf16> to vector<32x64xbf16>
    %cst_110 = arith.constant dense<0.000000e+00> : vector<9x64xf32>
    %273 = tpu.matmul %270, %272, %cst_110 {dimension_numbers = #tpu.dot_dimension_numbers<[1], [0], [0], [1], [0, 0, 1, 1], [], []>} : vector<9x32xbf16>, vector<32x64xbf16>, vector<9x64xf32> -> vector<9x64xf32>
    %c0_111 = arith.constant 0 : index
    %c0_112 = arith.constant 0 : index
    %c0_113 = arith.constant 0 : index
    %274 = vector.load %arg17[%c0_111, %c0_112, %c0_113] : memref<2x1x64xf32, #tpu.memory_space<vmem>>, vector<1x1x64xf32>
    %275 = vector.shape_cast %274 : vector<1x1x64xf32> to vector<1x64xf32>
    %276 = vector.broadcast %275 : vector<1x64xf32> to vector<9x64xf32>
    %277 = arith.addf %273, %276 : vector<9x64xf32>
    %cst_114 = arith.constant 0.000000e+00 : f32
    %278 = vector.broadcast %cst_114 : f32 to vector<9x64xf32>
    %279 = arith.maximumf %277, %278 : vector<9x64xf32>
    %280 = arith.truncf %279 : vector<9x64xf32> to vector<9x64xbf16>
    %c0_115 = arith.constant 0 : index
    %c0_116 = arith.constant 0 : index
    %c0_117 = arith.constant 0 : index
    %281 = vector.load %arg18[%c0_115, %c0_116, %c0_117] : memref<2x64x32xbf16, #tpu.memory_space<vmem>>, vector<1x64x32xbf16>
    %282 = vector.shape_cast %281 : vector<1x64x32xbf16> to vector<64x32xbf16>
    %cst_118 = arith.constant dense<0.000000e+00> : vector<9x32xf32>
    %283 = tpu.matmul %280, %282, %cst_118 {dimension_numbers = #tpu.dot_dimension_numbers<[1], [0], [0], [1], [0, 0, 1, 1], [], []>} : vector<9x64xbf16>, vector<64x32xbf16>, vector<9x32xf32> -> vector<9x32xf32>
    %c0_119 = arith.constant 0 : index
    %c0_120 = arith.constant 0 : index
    %c0_121 = arith.constant 0 : index
    %284 = vector.load %arg19[%c0_119, %c0_120, %c0_121] : memref<2x1x32xf32, #tpu.memory_space<vmem>>, vector<1x1x32xf32>
    %285 = vector.shape_cast %284 : vector<1x1x32xf32> to vector<1x32xf32>
    %286 = vector.broadcast %285 : vector<1x32xf32> to vector<9x32xf32>
    %287 = arith.addf %283, %286 : vector<9x32xf32>
    %288 = arith.addf %269, %287 : vector<9x32xf32>
    %289 = vector.extract_strided_slice %22 {offsets = [4, 0], sizes = [1, 32], strides = [1, 1]} : vector<6x32xf32> to vector<1x32xf32>
    %290 = vector.extract_strided_slice %22 {offsets = [5, 0], sizes = [1, 32], strides = [1, 1]} : vector<6x32xf32> to vector<1x32xf32>
    %cst_122 = arith.constant dense<0.000000e+00> : vector<9xf32>
    %291 = vector.multi_reduction <add>, %288, %cst_122 [1] : vector<9x32xf32> to vector<9xf32>
    %292 = vector.shape_cast %291 : vector<9xf32> to vector<9x1xf32>
    %cst_123 = arith.constant 3.200000e+01 : f32
    %293 = vector.broadcast %cst_123 : f32 to vector<9x1xf32>
    %294 = arith.divf %292, %293 : vector<9x1xf32>
    %295 = arith.mulf %288, %288 : vector<9x32xf32>
    %cst_124 = arith.constant dense<0.000000e+00> : vector<9xf32>
    %296 = vector.multi_reduction <add>, %295, %cst_124 [1] : vector<9x32xf32> to vector<9xf32>
    %297 = vector.shape_cast %296 : vector<9xf32> to vector<9x1xf32>
    %cst_125 = arith.constant 3.200000e+01 : f32
    %298 = vector.broadcast %cst_125 : f32 to vector<9x1xf32>
    %299 = arith.divf %297, %298 : vector<9x1xf32>
    %300 = arith.mulf %294, %294 : vector<9x1xf32>
    %301 = arith.subf %299, %300 : vector<9x1xf32>
    %302 = vector.broadcast %294 : vector<9x1xf32> to vector<9x32xf32>
    %303 = arith.subf %288, %302 : vector<9x32xf32>
    %cst_126 = arith.constant 9.99999974E-6 : f32
    %304 = vector.broadcast %cst_126 : f32 to vector<9x1xf32>
    %305 = arith.addf %301, %304 : vector<9x1xf32>
    %306 = math.rsqrt %305 : vector<9x1xf32>
    %307 = vector.broadcast %306 : vector<9x1xf32> to vector<9x32xf32>
    %308 = arith.mulf %303, %307 : vector<9x32xf32>
    %309 = vector.broadcast %289 : vector<1x32xf32> to vector<9x32xf32>
    %310 = arith.mulf %308, %309 : vector<9x32xf32>
    %311 = vector.broadcast %290 : vector<1x32xf32> to vector<9x32xf32>
    %312 = arith.addf %310, %311 : vector<9x32xf32>
    %c1_127 = arith.constant 1 : index
    %c0_128 = arith.constant 0 : index
    %c0_129 = arith.constant 0 : index
    %313 = vector.load %arg15[%c1_127, %c0_128, %c0_129] : memref<2x6x32xf32, #tpu.memory_space<vmem>>, vector<1x6x32xf32>
    %314 = vector.shape_cast %313 : vector<1x6x32xf32> to vector<6x32xf32>
    %315 = arith.truncf %312 : vector<9x32xf32> to vector<9x32xbf16>
    %c1_130 = arith.constant 1 : index
    %c0_131 = arith.constant 0 : index
    %c0_132 = arith.constant 0 : index
    %316 = vector.load %arg7[%c1_130, %c0_131, %c0_132] : memref<2x32x96xbf16, #tpu.memory_space<vmem>>, vector<1x32x96xbf16>
    %317 = vector.shape_cast %316 : vector<1x32x96xbf16> to vector<32x96xbf16>
    %cst_133 = arith.constant dense<0.000000e+00> : vector<9x96xf32>
    %318 = tpu.matmul %315, %317, %cst_133 {dimension_numbers = #tpu.dot_dimension_numbers<[1], [0], [0], [1], [0, 0, 1, 1], [], []>} : vector<9x32xbf16>, vector<32x96xbf16>, vector<9x96xf32> -> vector<9x96xf32>
    %c1_134 = arith.constant 1 : index
    %c0_135 = arith.constant 0 : index
    %c0_136 = arith.constant 0 : index
    %319 = vector.load %arg8[%c1_134, %c0_135, %c0_136] : memref<2x1x96xf32, #tpu.memory_space<vmem>>, vector<1x1x96xf32>
    %320 = vector.shape_cast %319 : vector<1x1x96xf32> to vector<1x96xf32>
    %321 = vector.broadcast %320 : vector<1x96xf32> to vector<9x96xf32>
    %322 = arith.addf %318, %321 : vector<9x96xf32>
    %323 = arith.truncf %322 : vector<9x96xf32> to vector<9x96xbf16>
    %324 = vector.extract_strided_slice %323 {offsets = [0, 0], sizes = [9, 32], strides = [1, 1]} : vector<9x96xbf16> to vector<9x32xbf16>
    %325 = vector.extract_strided_slice %323 {offsets = [0, 32], sizes = [9, 32], strides = [1, 1]} : vector<9x96xbf16> to vector<9x32xbf16>
    %326 = vector.extract_strided_slice %323 {offsets = [0, 64], sizes = [9, 32], strides = [1, 1]} : vector<9x96xbf16> to vector<9x32xbf16>
    %c1_137 = arith.constant 1 : index
    %c0_138 = arith.constant 0 : index
    %c0_139 = arith.constant 0 : index
    %c0_140 = arith.constant 0 : index
    %327 = vector.load %arg13[%c1_137, %c0_138, %c0_139, %c0_140] : memref<2x2x32x32xbf16, #tpu.memory_space<vmem>>, vector<1x1x32x32xbf16>
    %328 = vector.shape_cast %327 : vector<1x1x32x32xbf16> to vector<32x32xbf16>
    %c1_141 = arith.constant 1 : index
    %c0_142 = arith.constant 0 : index
    %c0_143 = arith.constant 0 : index
    %c0_144 = arith.constant 0 : index
    %329 = vector.load %arg14[%c1_141, %c0_142, %c0_143, %c0_144] : memref<2x2x1x32xf32, #tpu.memory_space<vmem>>, vector<1x1x1x32xf32>
    %330 = vector.shape_cast %329 : vector<1x1x1x32xf32> to vector<1x32xf32>
    %331 = vector.extract_strided_slice %324 {offsets = [0, 0], sizes = [9, 8], strides = [1, 1]} : vector<9x32xbf16> to vector<9x8xbf16>
    %332 = vector.extract_strided_slice %325 {offsets = [0, 0], sizes = [9, 8], strides = [1, 1]} : vector<9x32xbf16> to vector<9x8xbf16>
    %cst_145 = arith.constant dense<0.000000e+00> : vector<9x9xf32>
    %333 = tpu.matmul %331, %332, %cst_145 {dimension_numbers = #tpu.dot_dimension_numbers<[1], [1], [0], [0], [0, 0, 1, 0], [], []>} : vector<9x8xbf16>, vector<9x8xbf16>, vector<9x9xf32> -> vector<9x9xf32>
    %cst_146 = arith.constant 0.353553385 : f32
    %334 = vector.broadcast %cst_146 : f32 to vector<9x9xf32>
    %335 = arith.mulf %333, %334 : vector<9x9xf32>
    %336 = arith.addf %335, %19 : vector<9x9xf32>
    %cst_147 = arith.constant dense<0xFF800000> : vector<9xf32>
    %337 = vector.multi_reduction <maximumf>, %336, %cst_147 [1] : vector<9x9xf32> to vector<9xf32>
    %338 = vector.shape_cast %337 : vector<9xf32> to vector<9x1xf32>
    %339 = vector.broadcast %338 : vector<9x1xf32> to vector<9x9xf32>
    %340 = arith.subf %336, %339 : vector<9x9xf32>
    %341 = math.exp %340 : vector<9x9xf32>
    %cst_148 = arith.constant dense<0.000000e+00> : vector<9xf32>
    %342 = vector.multi_reduction <add>, %341, %cst_148 [1] : vector<9x9xf32> to vector<9xf32>
    %343 = vector.shape_cast %342 : vector<9xf32> to vector<9x1xf32>
    %344 = tpu.reciprocal %343 {approx = true} : vector<9x1xf32> -> vector<9x1xf32>
    %345 = vector.broadcast %344 : vector<9x1xf32> to vector<9x9xf32>
    %346 = arith.mulf %341, %345 : vector<9x9xf32>
    %347 = arith.truncf %346 : vector<9x9xf32> to vector<9x9xbf16>
    %348 = vector.extract_strided_slice %326 {offsets = [0, 0], sizes = [9, 8], strides = [1, 1]} : vector<9x32xbf16> to vector<9x8xbf16>
    %cst_149 = arith.constant dense<0.000000e+00> : vector<9x8xf32>
    %349 = tpu.matmul %347, %348, %cst_149 {dimension_numbers = #tpu.dot_dimension_numbers<[1], [0], [0], [1], [0, 0, 1, 1], [], []>} : vector<9x9xbf16>, vector<9x8xbf16>, vector<9x8xf32> -> vector<9x8xf32>
    %350 = vector.extract_strided_slice %324 {offsets = [0, 8], sizes = [9, 8], strides = [1, 1]} : vector<9x32xbf16> to vector<9x8xbf16>
    %351 = vector.extract_strided_slice %325 {offsets = [0, 8], sizes = [9, 8], strides = [1, 1]} : vector<9x32xbf16> to vector<9x8xbf16>
    %cst_150 = arith.constant dense<0.000000e+00> : vector<9x9xf32>
    %352 = tpu.matmul %350, %351, %cst_150 {dimension_numbers = #tpu.dot_dimension_numbers<[1], [1], [0], [0], [0, 0, 1, 0], [], []>} : vector<9x8xbf16>, vector<9x8xbf16>, vector<9x9xf32> -> vector<9x9xf32>
    %cst_151 = arith.constant 0.353553385 : f32
    %353 = vector.broadcast %cst_151 : f32 to vector<9x9xf32>
    %354 = arith.mulf %352, %353 : vector<9x9xf32>
    %355 = arith.addf %354, %19 : vector<9x9xf32>
    %cst_152 = arith.constant dense<0xFF800000> : vector<9xf32>
    %356 = vector.multi_reduction <maximumf>, %355, %cst_152 [1] : vector<9x9xf32> to vector<9xf32>
    %357 = vector.shape_cast %356 : vector<9xf32> to vector<9x1xf32>
    %358 = vector.broadcast %357 : vector<9x1xf32> to vector<9x9xf32>
    %359 = arith.subf %355, %358 : vector<9x9xf32>
    %360 = math.exp %359 : vector<9x9xf32>
    %cst_153 = arith.constant dense<0.000000e+00> : vector<9xf32>
    %361 = vector.multi_reduction <add>, %360, %cst_153 [1] : vector<9x9xf32> to vector<9xf32>
    %362 = vector.shape_cast %361 : vector<9xf32> to vector<9x1xf32>
    %363 = tpu.reciprocal %362 {approx = true} : vector<9x1xf32> -> vector<9x1xf32>
    %364 = vector.broadcast %363 : vector<9x1xf32> to vector<9x9xf32>
    %365 = arith.mulf %360, %364 : vector<9x9xf32>
    %366 = arith.truncf %365 : vector<9x9xf32> to vector<9x9xbf16>
    %367 = vector.extract_strided_slice %326 {offsets = [0, 8], sizes = [9, 8], strides = [1, 1]} : vector<9x32xbf16> to vector<9x8xbf16>
    %cst_154 = arith.constant dense<0.000000e+00> : vector<9x8xf32>
    %368 = tpu.matmul %366, %367, %cst_154 {dimension_numbers = #tpu.dot_dimension_numbers<[1], [0], [0], [1], [0, 0, 1, 1], [], []>} : vector<9x9xbf16>, vector<9x8xbf16>, vector<9x8xf32> -> vector<9x8xf32>
    %369 = vector.extract_strided_slice %324 {offsets = [0, 16], sizes = [9, 8], strides = [1, 1]} : vector<9x32xbf16> to vector<9x8xbf16>
    %370 = vector.extract_strided_slice %325 {offsets = [0, 16], sizes = [9, 8], strides = [1, 1]} : vector<9x32xbf16> to vector<9x8xbf16>
    %cst_155 = arith.constant dense<0.000000e+00> : vector<9x9xf32>
    %371 = tpu.matmul %369, %370, %cst_155 {dimension_numbers = #tpu.dot_dimension_numbers<[1], [1], [0], [0], [0, 0, 1, 0], [], []>} : vector<9x8xbf16>, vector<9x8xbf16>, vector<9x9xf32> -> vector<9x9xf32>
    %cst_156 = arith.constant 0.353553385 : f32
    %372 = vector.broadcast %cst_156 : f32 to vector<9x9xf32>
    %373 = arith.mulf %371, %372 : vector<9x9xf32>
    %374 = arith.addf %373, %19 : vector<9x9xf32>
    %cst_157 = arith.constant dense<0xFF800000> : vector<9xf32>
    %375 = vector.multi_reduction <maximumf>, %374, %cst_157 [1] : vector<9x9xf32> to vector<9xf32>
    %376 = vector.shape_cast %375 : vector<9xf32> to vector<9x1xf32>
    %377 = vector.broadcast %376 : vector<9x1xf32> to vector<9x9xf32>
    %378 = arith.subf %374, %377 : vector<9x9xf32>
    %379 = math.exp %378 : vector<9x9xf32>
    %cst_158 = arith.constant dense<0.000000e+00> : vector<9xf32>
    %380 = vector.multi_reduction <add>, %379, %cst_158 [1] : vector<9x9xf32> to vector<9xf32>
    %381 = vector.shape_cast %380 : vector<9xf32> to vector<9x1xf32>
    %382 = tpu.reciprocal %381 {approx = true} : vector<9x1xf32> -> vector<9x1xf32>
    %383 = vector.broadcast %382 : vector<9x1xf32> to vector<9x9xf32>
    %384 = arith.mulf %379, %383 : vector<9x9xf32>
    %385 = arith.truncf %384 : vector<9x9xf32> to vector<9x9xbf16>
    %386 = vector.extract_strided_slice %326 {offsets = [0, 16], sizes = [9, 8], strides = [1, 1]} : vector<9x32xbf16> to vector<9x8xbf16>
    %cst_159 = arith.constant dense<0.000000e+00> : vector<9x8xf32>
    %387 = tpu.matmul %385, %386, %cst_159 {dimension_numbers = #tpu.dot_dimension_numbers<[1], [0], [0], [1], [0, 0, 1, 1], [], []>} : vector<9x9xbf16>, vector<9x8xbf16>, vector<9x8xf32> -> vector<9x8xf32>
    %388 = vector.extract_strided_slice %324 {offsets = [0, 24], sizes = [9, 8], strides = [1, 1]} : vector<9x32xbf16> to vector<9x8xbf16>
    %389 = vector.extract_strided_slice %325 {offsets = [0, 24], sizes = [9, 8], strides = [1, 1]} : vector<9x32xbf16> to vector<9x8xbf16>
    %cst_160 = arith.constant dense<0.000000e+00> : vector<9x9xf32>
    %390 = tpu.matmul %388, %389, %cst_160 {dimension_numbers = #tpu.dot_dimension_numbers<[1], [1], [0], [0], [0, 0, 1, 0], [], []>} : vector<9x8xbf16>, vector<9x8xbf16>, vector<9x9xf32> -> vector<9x9xf32>
    %cst_161 = arith.constant 0.353553385 : f32
    %391 = vector.broadcast %cst_161 : f32 to vector<9x9xf32>
    %392 = arith.mulf %390, %391 : vector<9x9xf32>
    %393 = arith.addf %392, %19 : vector<9x9xf32>
    %cst_162 = arith.constant dense<0xFF800000> : vector<9xf32>
    %394 = vector.multi_reduction <maximumf>, %393, %cst_162 [1] : vector<9x9xf32> to vector<9xf32>
    %395 = vector.shape_cast %394 : vector<9xf32> to vector<9x1xf32>
    %396 = vector.broadcast %395 : vector<9x1xf32> to vector<9x9xf32>
    %397 = arith.subf %393, %396 : vector<9x9xf32>
    %398 = math.exp %397 : vector<9x9xf32>
    %cst_163 = arith.constant dense<0.000000e+00> : vector<9xf32>
    %399 = vector.multi_reduction <add>, %398, %cst_163 [1] : vector<9x9xf32> to vector<9xf32>
    %400 = vector.shape_cast %399 : vector<9xf32> to vector<9x1xf32>
    %401 = tpu.reciprocal %400 {approx = true} : vector<9x1xf32> -> vector<9x1xf32>
    %402 = vector.broadcast %401 : vector<9x1xf32> to vector<9x9xf32>
    %403 = arith.mulf %398, %402 : vector<9x9xf32>
    %404 = arith.truncf %403 : vector<9x9xf32> to vector<9x9xbf16>
    %405 = vector.extract_strided_slice %326 {offsets = [0, 24], sizes = [9, 8], strides = [1, 1]} : vector<9x32xbf16> to vector<9x8xbf16>
    %cst_164 = arith.constant dense<0.000000e+00> : vector<9x8xf32>
    %406 = tpu.matmul %404, %405, %cst_164 {dimension_numbers = #tpu.dot_dimension_numbers<[1], [0], [0], [1], [0, 0, 1, 1], [], []>} : vector<9x9xbf16>, vector<9x8xbf16>, vector<9x8xf32> -> vector<9x8xf32>
    %407 = tpu.concatenate %349, %368, %387, %406 in 1 : vector<9x8xf32>, vector<9x8xf32>, vector<9x8xf32>, vector<9x8xf32> -> vector<9x32xf32>
    %408 = arith.truncf %407 : vector<9x32xf32> to vector<9x32xbf16>
    %cst_165 = arith.constant dense<0.000000e+00> : vector<9x32xf32>
    %409 = tpu.matmul %408, %328, %cst_165 {dimension_numbers = #tpu.dot_dimension_numbers<[1], [0], [0], [1], [0, 0, 1, 1], [], []>} : vector<9x32xbf16>, vector<32x32xbf16>, vector<9x32xf32> -> vector<9x32xf32>
    %410 = vector.broadcast %330 : vector<1x32xf32> to vector<9x32xf32>
    %411 = arith.addf %409, %410 : vector<9x32xf32>
    %412 = arith.addf %312, %411 : vector<9x32xf32>
    %413 = vector.extract_strided_slice %314 {offsets = [0, 0], sizes = [1, 32], strides = [1, 1]} : vector<6x32xf32> to vector<1x32xf32>
    %414 = vector.extract_strided_slice %314 {offsets = [1, 0], sizes = [1, 32], strides = [1, 1]} : vector<6x32xf32> to vector<1x32xf32>
    %cst_166 = arith.constant dense<0.000000e+00> : vector<9xf32>
    %415 = vector.multi_reduction <add>, %412, %cst_166 [1] : vector<9x32xf32> to vector<9xf32>
    %416 = vector.shape_cast %415 : vector<9xf32> to vector<9x1xf32>
    %cst_167 = arith.constant 3.200000e+01 : f32
    %417 = vector.broadcast %cst_167 : f32 to vector<9x1xf32>
    %418 = arith.divf %416, %417 : vector<9x1xf32>
    %419 = arith.mulf %412, %412 : vector<9x32xf32>
    %cst_168 = arith.constant dense<0.000000e+00> : vector<9xf32>
    %420 = vector.multi_reduction <add>, %419, %cst_168 [1] : vector<9x32xf32> to vector<9xf32>
    %421 = vector.shape_cast %420 : vector<9xf32> to vector<9x1xf32>
    %cst_169 = arith.constant 3.200000e+01 : f32
    %422 = vector.broadcast %cst_169 : f32 to vector<9x1xf32>
    %423 = arith.divf %421, %422 : vector<9x1xf32>
    %424 = arith.mulf %418, %418 : vector<9x1xf32>
    %425 = arith.subf %423, %424 : vector<9x1xf32>
    %426 = vector.broadcast %418 : vector<9x1xf32> to vector<9x32xf32>
    %427 = arith.subf %412, %426 : vector<9x32xf32>
    %cst_170 = arith.constant 9.99999974E-6 : f32
    %428 = vector.broadcast %cst_170 : f32 to vector<9x1xf32>
    %429 = arith.addf %425, %428 : vector<9x1xf32>
    %430 = math.rsqrt %429 : vector<9x1xf32>
    %431 = vector.broadcast %430 : vector<9x1xf32> to vector<9x32xf32>
    %432 = arith.mulf %427, %431 : vector<9x32xf32>
    %433 = vector.broadcast %413 : vector<1x32xf32> to vector<9x32xf32>
    %434 = arith.mulf %432, %433 : vector<9x32xf32>
    %435 = vector.broadcast %414 : vector<1x32xf32> to vector<9x32xf32>
    %436 = arith.addf %434, %435 : vector<9x32xf32>
    %437 = arith.truncf %436 : vector<9x32xf32> to vector<9x32xbf16>
    %c1_171 = arith.constant 1 : index
    %c0_172 = arith.constant 0 : index
    %c0_173 = arith.constant 0 : index
    %438 = vector.load %arg9[%c1_171, %c0_172, %c0_173] : memref<2x32x32xbf16, #tpu.memory_space<vmem>>, vector<1x32x32xbf16>
    %439 = vector.shape_cast %438 : vector<1x32x32xbf16> to vector<32x32xbf16>
    %cst_174 = arith.constant dense<0.000000e+00> : vector<9x32xf32>
    %440 = tpu.matmul %437, %439, %cst_174 {dimension_numbers = #tpu.dot_dimension_numbers<[1], [0], [0], [1], [0, 0, 1, 1], [], []>} : vector<9x32xbf16>, vector<32x32xbf16>, vector<9x32xf32> -> vector<9x32xf32>
    %c1_175 = arith.constant 1 : index
    %c0_176 = arith.constant 0 : index
    %c0_177 = arith.constant 0 : index
    %441 = vector.load %arg10[%c1_175, %c0_176, %c0_177] : memref<2x1x32xf32, #tpu.memory_space<vmem>>, vector<1x1x32xf32>
    %442 = vector.shape_cast %441 : vector<1x1x32xf32> to vector<1x32xf32>
    %443 = vector.broadcast %442 : vector<1x32xf32> to vector<9x32xf32>
    %444 = arith.addf %440, %443 : vector<9x32xf32>
    %445 = arith.truncf %444 : vector<9x32xf32> to vector<9x32xbf16>
    %c1_178 = arith.constant 1 : index
    %c0_179 = arith.constant 0 : index
    %c0_180 = arith.constant 0 : index
    %446 = vector.load %arg11[%c1_178, %c0_179, %c0_180] : memref<2x32x64xbf16, #tpu.memory_space<vmem>>, vector<1x32x64xbf16>
    %447 = vector.shape_cast %446 : vector<1x32x64xbf16> to vector<32x64xbf16>
    %cst_181 = arith.constant dense<0.000000e+00> : vector<10x64xf32>
    %448 = tpu.matmul %20, %447, %cst_181 {dimension_numbers = #tpu.dot_dimension_numbers<[1], [0], [0], [1], [0, 0, 1, 1], [], []>} : vector<10x32xbf16>, vector<32x64xbf16>, vector<10x64xf32> -> vector<10x64xf32>
    %c1_182 = arith.constant 1 : index
    %c0_183 = arith.constant 0 : index
    %c0_184 = arith.constant 0 : index
    %449 = vector.load %arg12[%c1_182, %c0_183, %c0_184] : memref<2x1x64xf32, #tpu.memory_space<vmem>>, vector<1x1x64xf32>
    %450 = vector.shape_cast %449 : vector<1x1x64xf32> to vector<1x64xf32>
    %451 = vector.broadcast %450 : vector<1x64xf32> to vector<10x64xf32>
    %452 = arith.addf %448, %451 : vector<10x64xf32>
    %453 = arith.truncf %452 : vector<10x64xf32> to vector<10x64xbf16>
    %454 = vector.extract_strided_slice %453 {offsets = [0, 0], sizes = [10, 32], strides = [1, 1]} : vector<10x64xbf16> to vector<10x32xbf16>
    %455 = vector.extract_strided_slice %453 {offsets = [0, 32], sizes = [10, 32], strides = [1, 1]} : vector<10x64xbf16> to vector<10x32xbf16>
    %c1_185 = arith.constant 1 : index
    %c1_186 = arith.constant 1 : index
    %c0_187 = arith.constant 0 : index
    %c0_188 = arith.constant 0 : index
    %456 = vector.load %arg13[%c1_185, %c1_186, %c0_187, %c0_188] : memref<2x2x32x32xbf16, #tpu.memory_space<vmem>>, vector<1x1x32x32xbf16>
    %457 = vector.shape_cast %456 : vector<1x1x32x32xbf16> to vector<32x32xbf16>
    %c1_189 = arith.constant 1 : index
    %c1_190 = arith.constant 1 : index
    %c0_191 = arith.constant 0 : index
    %c0_192 = arith.constant 0 : index
    %458 = vector.load %arg14[%c1_189, %c1_190, %c0_191, %c0_192] : memref<2x2x1x32xf32, #tpu.memory_space<vmem>>, vector<1x1x1x32xf32>
    %459 = vector.shape_cast %458 : vector<1x1x1x32xf32> to vector<1x32xf32>
    %460 = vector.extract_strided_slice %445 {offsets = [0, 0], sizes = [9, 8], strides = [1, 1]} : vector<9x32xbf16> to vector<9x8xbf16>
    %461 = vector.extract_strided_slice %454 {offsets = [0, 0], sizes = [10, 8], strides = [1, 1]} : vector<10x32xbf16> to vector<10x8xbf16>
    %cst_193 = arith.constant dense<0.000000e+00> : vector<9x10xf32>
    %462 = tpu.matmul %460, %461, %cst_193 {dimension_numbers = #tpu.dot_dimension_numbers<[1], [1], [0], [0], [0, 0, 1, 0], [], []>} : vector<9x8xbf16>, vector<10x8xbf16>, vector<9x10xf32> -> vector<9x10xf32>
    %cst_194 = arith.constant 0.353553385 : f32
    %463 = vector.broadcast %cst_194 : f32 to vector<9x10xf32>
    %464 = arith.mulf %462, %463 : vector<9x10xf32>
    %cst_195 = arith.constant dense<0xFF800000> : vector<9xf32>
    %465 = vector.multi_reduction <maximumf>, %464, %cst_195 [1] : vector<9x10xf32> to vector<9xf32>
    %466 = vector.shape_cast %465 : vector<9xf32> to vector<9x1xf32>
    %467 = vector.broadcast %466 : vector<9x1xf32> to vector<9x10xf32>
    %468 = arith.subf %464, %467 : vector<9x10xf32>
    %469 = math.exp %468 : vector<9x10xf32>
    %cst_196 = arith.constant dense<0.000000e+00> : vector<9xf32>
    %470 = vector.multi_reduction <add>, %469, %cst_196 [1] : vector<9x10xf32> to vector<9xf32>
    %471 = vector.shape_cast %470 : vector<9xf32> to vector<9x1xf32>
    %472 = tpu.reciprocal %471 {approx = true} : vector<9x1xf32> -> vector<9x1xf32>
    %473 = vector.broadcast %472 : vector<9x1xf32> to vector<9x10xf32>
    %474 = arith.mulf %469, %473 : vector<9x10xf32>
    %475 = arith.truncf %474 : vector<9x10xf32> to vector<9x10xbf16>
    %476 = vector.extract_strided_slice %455 {offsets = [0, 0], sizes = [10, 8], strides = [1, 1]} : vector<10x32xbf16> to vector<10x8xbf16>
    %cst_197 = arith.constant dense<0.000000e+00> : vector<9x8xf32>
    %477 = tpu.matmul %475, %476, %cst_197 {dimension_numbers = #tpu.dot_dimension_numbers<[1], [0], [0], [1], [0, 0, 1, 1], [], []>} : vector<9x10xbf16>, vector<10x8xbf16>, vector<9x8xf32> -> vector<9x8xf32>
    %478 = vector.extract_strided_slice %445 {offsets = [0, 8], sizes = [9, 8], strides = [1, 1]} : vector<9x32xbf16> to vector<9x8xbf16>
    %479 = vector.extract_strided_slice %454 {offsets = [0, 8], sizes = [10, 8], strides = [1, 1]} : vector<10x32xbf16> to vector<10x8xbf16>
    %cst_198 = arith.constant dense<0.000000e+00> : vector<9x10xf32>
    %480 = tpu.matmul %478, %479, %cst_198 {dimension_numbers = #tpu.dot_dimension_numbers<[1], [1], [0], [0], [0, 0, 1, 0], [], []>} : vector<9x8xbf16>, vector<10x8xbf16>, vector<9x10xf32> -> vector<9x10xf32>
    %cst_199 = arith.constant 0.353553385 : f32
    %481 = vector.broadcast %cst_199 : f32 to vector<9x10xf32>
    %482 = arith.mulf %480, %481 : vector<9x10xf32>
    %cst_200 = arith.constant dense<0xFF800000> : vector<9xf32>
    %483 = vector.multi_reduction <maximumf>, %482, %cst_200 [1] : vector<9x10xf32> to vector<9xf32>
    %484 = vector.shape_cast %483 : vector<9xf32> to vector<9x1xf32>
    %485 = vector.broadcast %484 : vector<9x1xf32> to vector<9x10xf32>
    %486 = arith.subf %482, %485 : vector<9x10xf32>
    %487 = math.exp %486 : vector<9x10xf32>
    %cst_201 = arith.constant dense<0.000000e+00> : vector<9xf32>
    %488 = vector.multi_reduction <add>, %487, %cst_201 [1] : vector<9x10xf32> to vector<9xf32>
    %489 = vector.shape_cast %488 : vector<9xf32> to vector<9x1xf32>
    %490 = tpu.reciprocal %489 {approx = true} : vector<9x1xf32> -> vector<9x1xf32>
    %491 = vector.broadcast %490 : vector<9x1xf32> to vector<9x10xf32>
    %492 = arith.mulf %487, %491 : vector<9x10xf32>
    %493 = arith.truncf %492 : vector<9x10xf32> to vector<9x10xbf16>
    %494 = vector.extract_strided_slice %455 {offsets = [0, 8], sizes = [10, 8], strides = [1, 1]} : vector<10x32xbf16> to vector<10x8xbf16>
    %cst_202 = arith.constant dense<0.000000e+00> : vector<9x8xf32>
    %495 = tpu.matmul %493, %494, %cst_202 {dimension_numbers = #tpu.dot_dimension_numbers<[1], [0], [0], [1], [0, 0, 1, 1], [], []>} : vector<9x10xbf16>, vector<10x8xbf16>, vector<9x8xf32> -> vector<9x8xf32>
    %496 = vector.extract_strided_slice %445 {offsets = [0, 16], sizes = [9, 8], strides = [1, 1]} : vector<9x32xbf16> to vector<9x8xbf16>
    %497 = vector.extract_strided_slice %454 {offsets = [0, 16], sizes = [10, 8], strides = [1, 1]} : vector<10x32xbf16> to vector<10x8xbf16>
    %cst_203 = arith.constant dense<0.000000e+00> : vector<9x10xf32>
    %498 = tpu.matmul %496, %497, %cst_203 {dimension_numbers = #tpu.dot_dimension_numbers<[1], [1], [0], [0], [0, 0, 1, 0], [], []>} : vector<9x8xbf16>, vector<10x8xbf16>, vector<9x10xf32> -> vector<9x10xf32>
    %cst_204 = arith.constant 0.353553385 : f32
    %499 = vector.broadcast %cst_204 : f32 to vector<9x10xf32>
    %500 = arith.mulf %498, %499 : vector<9x10xf32>
    %cst_205 = arith.constant dense<0xFF800000> : vector<9xf32>
    %501 = vector.multi_reduction <maximumf>, %500, %cst_205 [1] : vector<9x10xf32> to vector<9xf32>
    %502 = vector.shape_cast %501 : vector<9xf32> to vector<9x1xf32>
    %503 = vector.broadcast %502 : vector<9x1xf32> to vector<9x10xf32>
    %504 = arith.subf %500, %503 : vector<9x10xf32>
    %505 = math.exp %504 : vector<9x10xf32>
    %cst_206 = arith.constant dense<0.000000e+00> : vector<9xf32>
    %506 = vector.multi_reduction <add>, %505, %cst_206 [1] : vector<9x10xf32> to vector<9xf32>
    %507 = vector.shape_cast %506 : vector<9xf32> to vector<9x1xf32>
    %508 = tpu.reciprocal %507 {approx = true} : vector<9x1xf32> -> vector<9x1xf32>
    %509 = vector.broadcast %508 : vector<9x1xf32> to vector<9x10xf32>
    %510 = arith.mulf %505, %509 : vector<9x10xf32>
    %511 = arith.truncf %510 : vector<9x10xf32> to vector<9x10xbf16>
    %512 = vector.extract_strided_slice %455 {offsets = [0, 16], sizes = [10, 8], strides = [1, 1]} : vector<10x32xbf16> to vector<10x8xbf16>
    %cst_207 = arith.constant dense<0.000000e+00> : vector<9x8xf32>
    %513 = tpu.matmul %511, %512, %cst_207 {dimension_numbers = #tpu.dot_dimension_numbers<[1], [0], [0], [1], [0, 0, 1, 1], [], []>} : vector<9x10xbf16>, vector<10x8xbf16>, vector<9x8xf32> -> vector<9x8xf32>
    %514 = vector.extract_strided_slice %445 {offsets = [0, 24], sizes = [9, 8], strides = [1, 1]} : vector<9x32xbf16> to vector<9x8xbf16>
    %515 = vector.extract_strided_slice %454 {offsets = [0, 24], sizes = [10, 8], strides = [1, 1]} : vector<10x32xbf16> to vector<10x8xbf16>
    %cst_208 = arith.constant dense<0.000000e+00> : vector<9x10xf32>
    %516 = tpu.matmul %514, %515, %cst_208 {dimension_numbers = #tpu.dot_dimension_numbers<[1], [1], [0], [0], [0, 0, 1, 0], [], []>} : vector<9x8xbf16>, vector<10x8xbf16>, vector<9x10xf32> -> vector<9x10xf32>
    %cst_209 = arith.constant 0.353553385 : f32
    %517 = vector.broadcast %cst_209 : f32 to vector<9x10xf32>
    %518 = arith.mulf %516, %517 : vector<9x10xf32>
    %cst_210 = arith.constant dense<0xFF800000> : vector<9xf32>
    %519 = vector.multi_reduction <maximumf>, %518, %cst_210 [1] : vector<9x10xf32> to vector<9xf32>
    %520 = vector.shape_cast %519 : vector<9xf32> to vector<9x1xf32>
    %521 = vector.broadcast %520 : vector<9x1xf32> to vector<9x10xf32>
    %522 = arith.subf %518, %521 : vector<9x10xf32>
    %523 = math.exp %522 : vector<9x10xf32>
    %cst_211 = arith.constant dense<0.000000e+00> : vector<9xf32>
    %524 = vector.multi_reduction <add>, %523, %cst_211 [1] : vector<9x10xf32> to vector<9xf32>
    %525 = vector.shape_cast %524 : vector<9xf32> to vector<9x1xf32>
    %526 = tpu.reciprocal %525 {approx = true} : vector<9x1xf32> -> vector<9x1xf32>
    %527 = vector.broadcast %526 : vector<9x1xf32> to vector<9x10xf32>
    %528 = arith.mulf %523, %527 : vector<9x10xf32>
    %529 = arith.truncf %528 : vector<9x10xf32> to vector<9x10xbf16>
    %530 = vector.extract_strided_slice %455 {offsets = [0, 24], sizes = [10, 8], strides = [1, 1]} : vector<10x32xbf16> to vector<10x8xbf16>
    %cst_212 = arith.constant dense<0.000000e+00> : vector<9x8xf32>
    %531 = tpu.matmul %529, %530, %cst_212 {dimension_numbers = #tpu.dot_dimension_numbers<[1], [0], [0], [1], [0, 0, 1, 1], [], []>} : vector<9x10xbf16>, vector<10x8xbf16>, vector<9x8xf32> -> vector<9x8xf32>
    %532 = tpu.concatenate %477, %495, %513, %531 in 1 : vector<9x8xf32>, vector<9x8xf32>, vector<9x8xf32>, vector<9x8xf32> -> vector<9x32xf32>
    %533 = arith.truncf %532 : vector<9x32xf32> to vector<9x32xbf16>
    %cst_213 = arith.constant dense<0.000000e+00> : vector<9x32xf32>
    %534 = tpu.matmul %533, %457, %cst_213 {dimension_numbers = #tpu.dot_dimension_numbers<[1], [0], [0], [1], [0, 0, 1, 1], [], []>} : vector<9x32xbf16>, vector<32x32xbf16>, vector<9x32xf32> -> vector<9x32xf32>
    %535 = vector.broadcast %459 : vector<1x32xf32> to vector<9x32xf32>
    %536 = arith.addf %534, %535 : vector<9x32xf32>
    %537 = arith.addf %436, %536 : vector<9x32xf32>
    %538 = vector.extract_strided_slice %314 {offsets = [2, 0], sizes = [1, 32], strides = [1, 1]} : vector<6x32xf32> to vector<1x32xf32>
    %539 = vector.extract_strided_slice %314 {offsets = [3, 0], sizes = [1, 32], strides = [1, 1]} : vector<6x32xf32> to vector<1x32xf32>
    %cst_214 = arith.constant dense<0.000000e+00> : vector<9xf32>
    %540 = vector.multi_reduction <add>, %537, %cst_214 [1] : vector<9x32xf32> to vector<9xf32>
    %541 = vector.shape_cast %540 : vector<9xf32> to vector<9x1xf32>
    %cst_215 = arith.constant 3.200000e+01 : f32
    %542 = vector.broadcast %cst_215 : f32 to vector<9x1xf32>
    %543 = arith.divf %541, %542 : vector<9x1xf32>
    %544 = arith.mulf %537, %537 : vector<9x32xf32>
    %cst_216 = arith.constant dense<0.000000e+00> : vector<9xf32>
    %545 = vector.multi_reduction <add>, %544, %cst_216 [1] : vector<9x32xf32> to vector<9xf32>
    %546 = vector.shape_cast %545 : vector<9xf32> to vector<9x1xf32>
    %cst_217 = arith.constant 3.200000e+01 : f32
    %547 = vector.broadcast %cst_217 : f32 to vector<9x1xf32>
    %548 = arith.divf %546, %547 : vector<9x1xf32>
    %549 = arith.mulf %543, %543 : vector<9x1xf32>
    %550 = arith.subf %548, %549 : vector<9x1xf32>
    %551 = vector.broadcast %543 : vector<9x1xf32> to vector<9x32xf32>
    %552 = arith.subf %537, %551 : vector<9x32xf32>
    %cst_218 = arith.constant 9.99999974E-6 : f32
    %553 = vector.broadcast %cst_218 : f32 to vector<9x1xf32>
    %554 = arith.addf %550, %553 : vector<9x1xf32>
    %555 = math.rsqrt %554 : vector<9x1xf32>
    %556 = vector.broadcast %555 : vector<9x1xf32> to vector<9x32xf32>
    %557 = arith.mulf %552, %556 : vector<9x32xf32>
    %558 = vector.broadcast %538 : vector<1x32xf32> to vector<9x32xf32>
    %559 = arith.mulf %557, %558 : vector<9x32xf32>
    %560 = vector.broadcast %539 : vector<1x32xf32> to vector<9x32xf32>
    %561 = arith.addf %559, %560 : vector<9x32xf32>
    %562 = arith.truncf %561 : vector<9x32xf32> to vector<9x32xbf16>
    %c1_219 = arith.constant 1 : index
    %c0_220 = arith.constant 0 : index
    %c0_221 = arith.constant 0 : index
    %563 = vector.load %arg16[%c1_219, %c0_220, %c0_221] : memref<2x32x64xbf16, #tpu.memory_space<vmem>>, vector<1x32x64xbf16>
    %564 = vector.shape_cast %563 : vector<1x32x64xbf16> to vector<32x64xbf16>
    %cst_222 = arith.constant dense<0.000000e+00> : vector<9x64xf32>
    %565 = tpu.matmul %562, %564, %cst_222 {dimension_numbers = #tpu.dot_dimension_numbers<[1], [0], [0], [1], [0, 0, 1, 1], [], []>} : vector<9x32xbf16>, vector<32x64xbf16>, vector<9x64xf32> -> vector<9x64xf32>
    %c1_223 = arith.constant 1 : index
    %c0_224 = arith.constant 0 : index
    %c0_225 = arith.constant 0 : index
    %566 = vector.load %arg17[%c1_223, %c0_224, %c0_225] : memref<2x1x64xf32, #tpu.memory_space<vmem>>, vector<1x1x64xf32>
    %567 = vector.shape_cast %566 : vector<1x1x64xf32> to vector<1x64xf32>
    %568 = vector.broadcast %567 : vector<1x64xf32> to vector<9x64xf32>
    %569 = arith.addf %565, %568 : vector<9x64xf32>
    %cst_226 = arith.constant 0.000000e+00 : f32
    %570 = vector.broadcast %cst_226 : f32 to vector<9x64xf32>
    %571 = arith.maximumf %569, %570 : vector<9x64xf32>
    %572 = arith.truncf %571 : vector<9x64xf32> to vector<9x64xbf16>
    %c1_227 = arith.constant 1 : index
    %c0_228 = arith.constant 0 : index
    %c0_229 = arith.constant 0 : index
    %573 = vector.load %arg18[%c1_227, %c0_228, %c0_229] : memref<2x64x32xbf16, #tpu.memory_space<vmem>>, vector<1x64x32xbf16>
    %574 = vector.shape_cast %573 : vector<1x64x32xbf16> to vector<64x32xbf16>
    %cst_230 = arith.constant dense<0.000000e+00> : vector<9x32xf32>
    %575 = tpu.matmul %572, %574, %cst_230 {dimension_numbers = #tpu.dot_dimension_numbers<[1], [0], [0], [1], [0, 0, 1, 1], [], []>} : vector<9x64xbf16>, vector<64x32xbf16>, vector<9x32xf32> -> vector<9x32xf32>
    %c1_231 = arith.constant 1 : index
    %c0_232 = arith.constant 0 : index
    %c0_233 = arith.constant 0 : index
    %576 = vector.load %arg19[%c1_231, %c0_232, %c0_233] : memref<2x1x32xf32, #tpu.memory_space<vmem>>, vector<1x1x32xf32>
    %577 = vector.shape_cast %576 : vector<1x1x32xf32> to vector<1x32xf32>
    %578 = vector.broadcast %577 : vector<1x32xf32> to vector<9x32xf32>
    %579 = arith.addf %575, %578 : vector<9x32xf32>
    %580 = arith.addf %561, %579 : vector<9x32xf32>
    %581 = vector.extract_strided_slice %314 {offsets = [4, 0], sizes = [1, 32], strides = [1, 1]} : vector<6x32xf32> to vector<1x32xf32>
    %582 = vector.extract_strided_slice %314 {offsets = [5, 0], sizes = [1, 32], strides = [1, 1]} : vector<6x32xf32> to vector<1x32xf32>
    %cst_234 = arith.constant dense<0.000000e+00> : vector<9xf32>
    %583 = vector.multi_reduction <add>, %580, %cst_234 [1] : vector<9x32xf32> to vector<9xf32>
    %584 = vector.shape_cast %583 : vector<9xf32> to vector<9x1xf32>
    %cst_235 = arith.constant 3.200000e+01 : f32
    %585 = vector.broadcast %cst_235 : f32 to vector<9x1xf32>
    %586 = arith.divf %584, %585 : vector<9x1xf32>
    %587 = arith.mulf %580, %580 : vector<9x32xf32>
    %cst_236 = arith.constant dense<0.000000e+00> : vector<9xf32>
    %588 = vector.multi_reduction <add>, %587, %cst_236 [1] : vector<9x32xf32> to vector<9xf32>
    %589 = vector.shape_cast %588 : vector<9xf32> to vector<9x1xf32>
    %cst_237 = arith.constant 3.200000e+01 : f32
    %590 = vector.broadcast %cst_237 : f32 to vector<9x1xf32>
    %591 = arith.divf %589, %590 : vector<9x1xf32>
    %592 = arith.mulf %586, %586 : vector<9x1xf32>
    %593 = arith.subf %591, %592 : vector<9x1xf32>
    %594 = vector.broadcast %586 : vector<9x1xf32> to vector<9x32xf32>
    %595 = arith.subf %580, %594 : vector<9x32xf32>
    %cst_238 = arith.constant 9.99999974E-6 : f32
    %596 = vector.broadcast %cst_238 : f32 to vector<9x1xf32>
    %597 = arith.addf %593, %596 : vector<9x1xf32>
    %598 = math.rsqrt %597 : vector<9x1xf32>
    %599 = vector.broadcast %598 : vector<9x1xf32> to vector<9x32xf32>
    %600 = arith.mulf %595, %599 : vector<9x32xf32>
    %601 = vector.broadcast %581 : vector<1x32xf32> to vector<9x32xf32>
    %602 = arith.mulf %600, %601 : vector<9x32xf32>
    %603 = vector.broadcast %582 : vector<1x32xf32> to vector<9x32xf32>
    %604 = arith.addf %602, %603 : vector<9x32xf32>
    %605 = arith.truncf %604 : vector<9x32xf32> to vector<9x32xbf16>
    %c0_239 = arith.constant 0 : index
    %c0_240 = arith.constant 0 : index
    %606 = vector.load %arg20[%c0_239, %c0_240] : memref<32x128xbf16, #tpu.memory_space<vmem>>, vector<32x128xbf16>
    %cst_241 = arith.constant dense<0.000000e+00> : vector<9x128xf32>
    %607 = tpu.matmul %605, %606, %cst_241 {dimension_numbers = #tpu.dot_dimension_numbers<[1], [0], [0], [1], [0, 0, 1, 1], [], []>} : vector<9x32xbf16>, vector<32x128xbf16>, vector<9x128xf32> -> vector<9x128xf32>
    %c0_242 = arith.constant 0 : index
    %c0_243 = arith.constant 0 : index
    %608 = vector.load %arg21[%c0_242, %c0_243] : memref<1x128xf32, #tpu.memory_space<vmem>>, vector<1x128xf32>
    %609 = vector.broadcast %608 : vector<1x128xf32> to vector<9x128xf32>
    %610 = arith.addf %607, %609 : vector<9x128xf32>
    %611 = tpu.iota {dimensions = array<i32: 1>} : vector<9x128xi32>
    %cst_244 = arith.constant 0.000000e+00 : f32
    %612 = vector.broadcast %cst_244 : f32 to vector<9x128xf32>
    %613 = arith.subf %612, %610 : vector<9x128xf32>
    %614 = math.exp %613 : vector<9x128xf32>
    %cst_245 = arith.constant 1.000000e+00 : f32
    %615 = vector.broadcast %cst_245 : f32 to vector<9x128xf32>
    %616 = arith.addf %615, %614 : vector<9x128xf32>
    %cst_246 = arith.constant 1.000000e+00 : f32
    %617 = vector.broadcast %cst_246 : f32 to vector<9x128xf32>
    %618 = arith.divf %617, %616 : vector<9x128xf32>
    %c52_i32 = arith.constant 52 : i32
    %619 = vector.broadcast %c52_i32 : i32 to vector<9x128xi32>
    %620 = arith.cmpi slt, %611, %619 : vector<9x128xi32>
    %621 = math.tanh %610 : vector<9x128xf32>
    %622 = arith.select %620, %618, %621 : vector<9x128xi1>, vector<9x128xf32>
    %c0_247 = arith.constant 0 : index
    %c0_248 = arith.constant 0 : index
    %c0_249 = arith.constant 0 : index
    %623 = vector.load %arg22[%c0_247, %c0_248, %c0_249] : memref<1x9x128xf32, #tpu.memory_space<vmem>>, vector<1x9x128xf32>
    %624 = vector.shape_cast %623 : vector<1x9x128xf32> to vector<9x128xf32>
    %625 = vector.shape_cast %622 : vector<9x128xf32> to vector<1x9x128xf32>
    tpu.vector_store %arg22[%c0_247, %c0_248, %c0_249], %625 {strides = array<i32>} : memref<1x9x128xf32, #tpu.memory_space<vmem>>, vector<1x9x128xf32>,
    return
  }
  func.func @transform_0(%arg0: i32) -> (i32, i32, i32) {
    %c0_i32 = arith.constant 0 : i32
    %c0_i32_0 = arith.constant 0 : i32
    %c0_i32_1 = arith.constant 0 : i32
    return %arg0, %c0_i32, %c0_i32_0 : i32, i32, i32
  }
  func.func @transform_1(%arg0: i32) -> (i32, i32, i32) {
    %c0_i32 = arith.constant 0 : i32
    %c0_i32_0 = arith.constant 0 : i32
    %c0_i32_1 = arith.constant 0 : i32
    return %arg0, %c0_i32, %c0_i32_0 : i32, i32, i32
  }
  func.func @transform_2(%arg0: i32) -> (i32, i32) {
    %c0_i32 = arith.constant 0 : i32
    %c0_i32_0 = arith.constant 0 : i32
    %c0_i32_1 = arith.constant 0 : i32
    return %c0_i32, %c0_i32_0 : i32, i32
  }
  func.func @transform_3(%arg0: i32) -> (i32, i32) {
    %c0_i32 = arith.constant 0 : i32
    %c0_i32_0 = arith.constant 0 : i32
    %c0_i32_1 = arith.constant 0 : i32
    return %c0_i32, %c0_i32_0 : i32, i32
  }
  func.func @transform_4(%arg0: i32) -> (i32, i32) {
    %c0_i32 = arith.constant 0 : i32
    %c0_i32_0 = arith.constant 0 : i32
    %c0_i32_1 = arith.constant 0 : i32
    return %c0_i32, %c0_i32_0 : i32, i32
  }
  func.func @transform_5(%arg0: i32) -> (i32, i32) {
    %c0_i32 = arith.constant 0 : i32
    %c0_i32_0 = arith.constant 0 : i32
    %c0_i32_1 = arith.constant 0 : i32
    return %c0_i32, %c0_i32_0 : i32, i32
  }
  func.func @transform_6(%arg0: i32) -> (i32, i32, i32) {
    %c0_i32 = arith.constant 0 : i32
    %c0_i32_0 = arith.constant 0 : i32
    %c0_i32_1 = arith.constant 0 : i32
    %c0_i32_2 = arith.constant 0 : i32
    return %c0_i32, %c0_i32_0, %c0_i32_1 : i32, i32, i32
  }
  func.func @transform_7(%arg0: i32) -> (i32, i32, i32) {
    %c0_i32 = arith.constant 0 : i32
    %c0_i32_0 = arith.constant 0 : i32
    %c0_i32_1 = arith.constant 0 : i32
    %c0_i32_2 = arith.constant 0 : i32
    return %c0_i32, %c0_i32_0, %c0_i32_1 : i32, i32, i32
  }
  func.func @transform_8(%arg0: i32) -> (i32, i32, i32) {
    %c0_i32 = arith.constant 0 : i32
    %c0_i32_0 = arith.constant 0 : i32
    %c0_i32_1 = arith.constant 0 : i32
    %c0_i32_2 = arith.constant 0 : i32
    return %c0_i32, %c0_i32_0, %c0_i32_1 : i32, i32, i32
  }
  func.func @transform_9(%arg0: i32) -> (i32, i32, i32) {
    %c0_i32 = arith.constant 0 : i32
    %c0_i32_0 = arith.constant 0 : i32
    %c0_i32_1 = arith.constant 0 : i32
    %c0_i32_2 = arith.constant 0 : i32
    return %c0_i32, %c0_i32_0, %c0_i32_1 : i32, i32, i32
  }
  func.func @transform_10(%arg0: i32) -> (i32, i32, i32) {
    %c0_i32 = arith.constant 0 : i32
    %c0_i32_0 = arith.constant 0 : i32
    %c0_i32_1 = arith.constant 0 : i32
    %c0_i32_2 = arith.constant 0 : i32
    return %c0_i32, %c0_i32_0, %c0_i32_1 : i32, i32, i32
  }
  func.func @transform_11(%arg0: i32) -> (i32, i32, i32) {
    %c0_i32 = arith.constant 0 : i32
    %c0_i32_0 = arith.constant 0 : i32
    %c0_i32_1 = arith.constant 0 : i32
    %c0_i32_2 = arith.constant 0 : i32
    return %c0_i32, %c0_i32_0, %c0_i32_1 : i32, i32, i32
  }
  func.func @transform_12(%arg0: i32) -> (i32, i32, i32, i32) {
    %c0_i32 = arith.constant 0 : i32
    %c0_i32_0 = arith.constant 0 : i32
    %c0_i32_1 = arith.constant 0 : i32
    %c0_i32_2 = arith.constant 0 : i32
    %c0_i32_3 = arith.constant 0 : i32
    return %c0_i32, %c0_i32_0, %c0_i32_1, %c0_i32_2 : i32, i32, i32, i32
  }
  func.func @transform_13(%arg0: i32) -> (i32, i32, i32, i32) {
    %c0_i32 = arith.constant 0 : i32
    %c0_i32_0 = arith.constant 0 : i32
    %c0_i32_1 = arith.constant 0 : i32
    %c0_i32_2 = arith.constant 0 : i32
    %c0_i32_3 = arith.constant 0 : i32
    return %c0_i32, %c0_i32_0, %c0_i32_1, %c0_i32_2 : i32, i32, i32, i32
  }
  func.func @transform_14(%arg0: i32) -> (i32, i32, i32) {
    %c0_i32 = arith.constant 0 : i32
    %c0_i32_0 = arith.constant 0 : i32
    %c0_i32_1 = arith.constant 0 : i32
    %c0_i32_2 = arith.constant 0 : i32
    return %c0_i32, %c0_i32_0, %c0_i32_1 : i32, i32, i32
  }
  func.func @transform_15(%arg0: i32) -> (i32, i32, i32) {
    %c0_i32 = arith.constant 0 : i32
    %c0_i32_0 = arith.constant 0 : i32
    %c0_i32_1 = arith.constant 0 : i32
    %c0_i32_2 = arith.constant 0 : i32
    return %c0_i32, %c0_i32_0, %c0_i32_1 : i32, i32, i32
  }
  func.func @transform_16(%arg0: i32) -> (i32, i32, i32) {
    %c0_i32 = arith.constant 0 : i32
    %c0_i32_0 = arith.constant 0 : i32
    %c0_i32_1 = arith.constant 0 : i32
    %c0_i32_2 = arith.constant 0 : i32
    return %c0_i32, %c0_i32_0, %c0_i32_1 : i32, i32, i32
  }
  func.func @transform_17(%arg0: i32) -> (i32, i32, i32) {
    %c0_i32 = arith.constant 0 : i32
    %c0_i32_0 = arith.constant 0 : i32
    %c0_i32_1 = arith.constant 0 : i32
    %c0_i32_2 = arith.constant 0 : i32
    return %c0_i32, %c0_i32_0, %c0_i32_1 : i32, i32, i32
  }
  func.func @transform_18(%arg0: i32) -> (i32, i32, i32) {
    %c0_i32 = arith.constant 0 : i32
    %c0_i32_0 = arith.constant 0 : i32
    %c0_i32_1 = arith.constant 0 : i32
    %c0_i32_2 = arith.constant 0 : i32
    return %c0_i32, %c0_i32_0, %c0_i32_1 : i32, i32, i32
  }
  func.func @transform_19(%arg0: i32) -> (i32, i32) {
    %c0_i32 = arith.constant 0 : i32
    %c0_i32_0 = arith.constant 0 : i32
    %c0_i32_1 = arith.constant 0 : i32
    return %c0_i32, %c0_i32_0 : i32, i32
  }
  func.func @transform_20(%arg0: i32) -> (i32, i32) {
    %c0_i32 = arith.constant 0 : i32
    %c0_i32_0 = arith.constant 0 : i32
    %c0_i32_1 = arith.constant 0 : i32
    return %c0_i32, %c0_i32_0 : i32, i32
  }
  func.func @transform_21(%arg0: i32) -> (i32, i32, i32) {
    %c0_i32 = arith.constant 0 : i32
    %c0_i32_0 = arith.constant 0 : i32
    %c0_i32_1 = arith.constant 0 : i32
    return %arg0, %c0_i32, %c0_i32_0 : i32, i32, i32
  }
}

</mosaic_0001>

<bundles_post_ra>
// kernel: simple_decoder_forward.1
= control target key start
LH: loop header
LB: loop body
LE: loop exit
PB: predicated region body
PF: predicated region fallthrough
CT: control target
= control target key end

     0   :  { %s6315_s0 = inlined_call_operand.vmem [shape: f32[2,10,48], index: 0, kind: input, shape index: {}]   ;;  %s6316_s1 = inlined_call_operand.vmem [shape: f32[2,9,55], index: 1, kind: input, shape index: {}]   ;;  %s6317_s2 = inlined_call_operand.vmem [shape: bf16[48,32], index: 2, kind: input, shape index: {}]   ;;  %s6318_s3 = inlined_call_operand.vmem [shape: bf16[55,32], index: 3, kind: input, shape index: {}]   ;;  %s6319_s4 = inlined_call_operand.vmem [shape: f32[10,32], index: 4, kind: input, shape index: {}]   ;;  %s6320_s5 = inlined_call_operand.vmem [shape: f32[9,32], index: 5, kind: input, shape index: {}]   ;;  %s6321_s6 = inlined_call_operand.vmem [shape: bf16[2,32,96], index: 6, kind: input, shape index: {}]   ;;  %s6322_s7 = inlined_call_operand.vmem [shape: f32[2,1,96], index: 7, kind: input, shape index: {}]   ;;  %s6323_s8 = inlined_call_operand.vmem [shape: bf16[2,32,32], index: 8, kind: input, shape index: {}]   ;;  %s6324_s9 = inlined_call_operand.vmem [shape: f32[2,1,32], index: 9, kind: input, shape index: {}]   ;;  %s6325_s10 = inlined_call_operand.vmem [shape: bf16[2,32,64], index: 10, kind: input, shape index: {}]   ;;  %s6326_s11 = inlined_call_operand.vmem [shape: f32[2,1,64], index: 11, kind: input, shape index: {}]   ;;  %s6327_s12 = inlined_call_operand.vmem [shape: bf16[2,2,32,32], index: 12, kind: input, shape index: {}]   ;;  %s6328_s13 = inlined_call_operand.vmem [shape: f32[2,2,1,32], index: 13, kind: input, shape index: {}]   ;;  %s6329_s14 = inlined_call_operand.vmem [shape: f32[2,6,32], index: 14, kind: input, shape index: {}]   ;;  %s6330_s15 = inlined_call_operand.vmem [shape: bf16[2,32,64], index: 15, kind: input, shape index: {}]   ;;  %s6331_s16 = inlined_call_operand.vmem [shape: f32[2,1,64], index: 16, kind: input, shape index: {}]   ;;  %s6332_s17 = inlined_call_operand.vmem [shape: bf16[2,64,32], index: 17, kind: input, shape index: {}]   ;;  %s6333_s18 = inlined_call_operand.vmem [shape: f32[2,1,32], index: 18, kind: input, shape index: {}]   ;;  %s6334_s19 = inlined_call_operand.vmem [shape: bf16[32,128], index: 19, kind: input, shape index: {}]   ;;  %s6335_s20 = inlined_call_operand.vmem [shape: f32[1,128], index: 20, kind: input, shape index: {}]   ;;  %s6336_s21 = inlined_call_operand.vmem [shape: f32[2,9,128], index: 21, kind: output, shape index: {}]  }
   0x1   :  { %6369 = sst [smem:[#allocation3_spill]] %s6315_s0 }
   0x2   :  { %6370 = sst [smem:[#allocation4_spill]] %s6316_s1 }
   0x3   :  { %6371 = sst [smem:[#allocation5_spill]] %s6317_s2  ;;  %s5472_s2 = smov 0  }
   0x4   :  { %6372 = sst [smem:[#allocation6_spill]] %s6318_s3 }
   0x5   :  { %6373 = sst [smem:[#allocation7_spill]] %s6319_s4 }
   0x6   :  { %6374 = sst [smem:[#allocation8_spill]] %s6320_s5 }
   0x7   :  { %6375 = sst [smem:[#allocation9_spill]] %s6321_s6 }
   0x8   :  { %6376 = sst [smem:[#allocation10_spill]] %s6322_s7 }
   0x9   :  { %6377 = sst [smem:[#allocation11_spill]] %s6325_s10 }
   0xa LB: > { %6378 = sst [smem:[#allocation2_spill]] %s5343_s2  ;;  %s4417_s25 = sadd.s32 4294967295, %s5343_s2   ;;  %s5343_s2 = sphi %s5472_s2, %s31_s2  }
   0xb   : > { %p4421_p0 = scmp.ge.s32.totalorder %s5343_s2, 1  ;;  %p597_p1 = scmp.lt.s32.totalorder %s5343_s2, 3 }
   0xd   : > { %p598_p2 = pnand %p4421_p0, %p597_p1 }
   0xe   : > { %s6379_s3 = sld [smem:[#allocation6_spill]] (!%p598_p2)  ;;  %p662_p3 = scmp.lt.s32.totalorder (!%p598_p2), %s4417_s25, 1 }
   0xf   : > { %601 = sbr.rel (%p598_p2) target bundleno = 7905 (0x1ee1), region = 104  ;;  %s6380_s0 = sld [smem:[#allocation5_spill]] (!%p598_p2) }
  0x10   : > { %s6381_s26 = sld [smem:[#allocation4_spill]] (!%p598_p2)  ;;  %s6362_s29 = smov (!%p598_p2), 120  }
  0x11   : > { %s6382_s22 = sld [smem:[#allocation3_spill]] (!%p598_p2)  ;;  %s6364_s4 = smov (!%p598_p2), 96  }
  0x12   : > { %s6383_s6 = sld [smem:[#allocation9_spill]] (!%p598_p2)  ;;  %s6346_s5 = smov (!%p598_p2), 88  }
  0x13   : > { %s6384_s30 = sld [smem:[#allocation7_spill]] (!%p598_p2)  ;;  %s6360_s1 = smov (!%p598_p2), 112  }
  0x14   : > { %v5132_v0 = vld [vmem:[%s6379_s3 + $0x18] ss:$0 sps:$4 sm:$0xff]   ;;  %vm789_vm0 = vcmask 1042432   ;;  %v5345_v1 = vmov 0.0   ;;  %vm790_vm1 = vcmask 1043456   ;;  %v5346_v2 = vmov 65535  }
  0x15   : > { %4715 = vmatprep.subr.bf16.mxu1 %v5345_v1  ;;  %4705 = vmatprep.subr.bf16.mxu0 %v5345_v1  ;;  %v791_v3 = vsel %vm789_vm0, 4294967295, %v5346_v2  ;;  %v5485_v4 = vsel %vm790_vm1, 4294967295, %v5346_v2  ;;  %vm5347_vm2 = vmmov 0   ;;  %v5136_v7 = vld [vmem:[%s6380_s0 + $0x10] sm:$0xff]   ;;  %s6404_s25 = smov (!%p662_p3, %s4417_s25), 1  ;;  %v5137_v9 = vld [vmem:[%s6380_s0 + $0x8] sm:$0xff]   ;;  %v837_v58 = vlaneseq }
  0x16   : > { %v792_v5 = vsel %vm790_vm1, %v791_v3, 0  ;;  %4723 = vmatprep.mubr.msk.bf16.mxu1 %vm5347_vm2, %v5345_v1  ;;  %4711 = vmatprep.mubr.msk.bf16.mxu0 %vm5347_vm2, %v5345_v1  ;;  %v5133_v8 = vld [vmem:[%s6379_s3 + $0x10] sm:$0xff]   ;;  %s5501_s23 = sshll.u32 %s6404_s25, 4  ;;  %v5134_v10 = vld [vmem:[%s6379_s3 + $0x8] sm:$0xff]   ;;  %vm785_vm3 = vcmask 449536   ;;  %v5138_v11 = vld [vmem:[%s6380_s0] sm:$0xff]  }
  0x17   : > { %v794_v6 = vand.u32 %v5132_v0, %v792_v5  ;;  %4706 = vmatpush3.bf16.msra.mxu0 %v5136_v7  ;;  %s671_s27 = scalar_lea.vmem %s6381_s26, %s5501_s23  ;;  %s666_s2 = scalar_lea.vmem %s6382_s22, %s5501_s23  ;;  %vm707_vm4 = vcmask 392192   ;;  %v5135_v14 = vld [vmem:[%s6379_s3] sm:$0xff]   ;;  %vm872_vm5 = vcmask 261120   ;;  %vm926_vm6 = vcmask 64512  }
  0x18   : > { %4707 = vmatprep.subr.bf16.mxu0 %v5345_v1  ;;  %v678_v12 = vld [vmem:[%s666_s2] sm:$0xff]  ;;  %v679_v13 = vld [vmem:[%s666_s2 + $0x8] sm:$0x3]  ;;  %s6385_s24 = sld [smem:[#allocation8_spill]]  ;;  %s6356_s25 = smov 80   ;;  %v5602_v59 = vshrl.u32 %v837_v58, 7 }
  0x19   : > { %4716 = vmatpush3.bf16.msra.mxu1 %v794_v6  ;;  %v752_v15 = vld [vmem:[%s671_s27] sm:$0xff]  ;;  %v753_v16 = vld [vmem:[%s671_s27 + $0x8] sm:$0x1]  ;;  %v680_v17 = vpack.c.bf16 %v679_v13, %v678_v12  ;;  %s6386_s7 = sld [smem:[#allocation10_spill]]  ;;  %s6348_s22 = smov 72   ;;  %v5604_v60 = vand.u32 127, %v837_v58 }
  0x1a   : > { %4717 = vmatprep.subr.bf16.mxu1 %v5345_v1  ;;  %v754_v18 = vpack.c.bf16 %v753_v16, %v752_v15  ;;  %v5139_v19 = vld [vmem:[%s6383_s6 + $0x8] sm:$0xff]   ;;  %v5140_v20 = vld [vmem:[%s6383_s6] sm:$0xff]   ;;  %s6358_s2 = smov 104   ;;  %v839_v61 = vadd.s32 8, %v5602_v59  ;;  %vm978_vm9 = vcmask 72704   ;;  %vm982_vm10 = vcmask 65536  }
  0x1b   : > { %4708 = vmatpush3.bf16.msra.mxu0 %v5137_v9  ;;  %v687_v21 = vld [vmem:[%s6384_s30] sm:$0xff]  ;;  %v688_v24 = vld [vmem:[%s6384_s30 + $0x8] sm:$0x3]  ;;  %vm842_vm7 = vcmp.gt.s32.totalorder %v5604_v60, %v5602_v59  ;;  %s6342_s26 = smov 56   ;;  %s6345_s27 = smov 64   ;;  %vm1008_vm11 = vcmask 1044480  }
  0x1c   : > { %4709 = vmatprep.subr.bf16.mxu0 %v5345_v1  ;;  %v5610_v63 = vsel %vm842_vm7, -1e+09, %v5345_v1  ;;  %vm843_vm8 = vcmp.gt.s32.totalorder %v5604_v60, %v839_v61  ;;  %s6344_s28 = smov 48   ;;  %vm1462_vm12 = vcmask 130048   ;;  %vm1465_vm13 = vcmask 195584   ;;  %s6387_s10 = sld [smem:[#allocation11_spill]] }
  0x1d   : > { %4718 = vmatpush3.bf16.msra.mxu1 %v5133_v8  ;;  %v5615_v6 = vsel %vm843_vm8, -1e+09, %v5345_v1  ;;  %vm1536_vm14 = vcmask 253952   ;;  %vm1770_vm15 = vcmask 80896   ;;  %vm1774_vm0 = vcmask 73728   ;;  %s6399_s3 = smov 48  }
  0x1e   : > { %4719 = vmatprep.subr.bf16.mxu1 %v5345_v1  ;;  %v762_v28 = vld [vmem:[%s6385_s24] sm:$0xff]  ;;  %v763_v30 = vld [vmem:[%s6385_s24 + $0x8] sm:$0x1]  ;;  %vm2468_vm1 = vcmask 523264   ;;  %s6395_s24 = smov 120   ;;  %s6400_s0 = smov 40  }
  0x1f   : > { %4710 = vmatpush3.bf16.msra.mxu0 %v5138_v11  ;;  %v4437_v40 = vld [vmem:[%s6386_s7] ss:$0 sm:$0xff] }
  0x20   : > { %4727 = vmatprep.subr.bf16.mxu0 %v5345_v1 }
  0x21   : > { %4720 = vmatpush3.bf16.msra.mxu1 %v5134_v10 }
  0x22   : > { %4721 = vmatprep.subr.bf16.mxu1 %v5345_v1  ;;  %4712 = vmatmul.mubr.msk.bf16.vlgmr.msra.gmra.mxu0 %vm707_vm4, %v680_v17 }
  0x23   : > { %4731 = vmatprep.mubr.msk.bf16.mxu0 %vm5347_vm2, %v5345_v1  ;;  %4728 = vmatpush3.bf16.msra.mxu0 %v5139_v19 }
  0x24   : > { %4729 = vmatprep.subr.bf16.mxu0 %v5345_v1 }
  0x25   : > { %4722 = vmatpush3.bf16.msra.mxu1 %v5135_v14 }
  0x26   : > { %4735 = vmatprep.subr.bf16.mxu1 %v5345_v1 }
  0x27   : > { %4730 = vmatpush3.bf16.msra.mxu0 %v5140_v20 }
  0x28   : > { %4724 = vmatmul.mubr.msk.bf16.vlgmr.msra.gmra.mxu1 %vm785_vm3, %v754_v18  ;;  %4741 = vmatprep.subr.bf16.mxu0 %v5345_v1 }
  0x29   : > { %4737 = vmatprep.mubr.msk.bf16.mxu1 %vm5347_vm2, %v5345_v1 }
  0xe2   : > { %v745_v22 = vpop.f32.mrf.mxu0 }
  0xe3   : > { %v746_v26 = vadd.f32 %v745_v22, %v687_v21 }
  0xe4   : > { %v4713_v23 = vpop.f32.mrf.mxu0 }
  0xe6   : > { %v748_v27 = vpop.f32.mrf.mxu0 }
  0xe7   : > { %v749_v31 = vadd.f32 %v748_v27, %v688_v24 }
  0xe8   : > { %v830_v25 = vpop.f32.mrf.mxu1  ;;  %v4714_v32 = vpop.f32.mrf.mxu0 }
  0xe9   : > { %v5551_v34 = vpack.c.bf16 %v749_v31, %v746_v26  ;;  %v5553_v35 = vadd.f32 %v830_v25, %v762_v28 }
  0xea   : > { %v4725_v29 = vpop.f32.mrf.mxu1 }
  0xec   : > { %v833_v33 = vpop.f32.mrf.mxu1 }
  0xed   : > { %v5555_v36 = vadd.f32 %v833_v33, %v763_v30 }
  0xee   : > { %v4726_v37 = vpop.f32.mrf.mxu1 }
  0xef   : > { %v848_v38 = vpack.c.bf16 %v5555_v36, %v5553_v35 }
  0xf1   : > { %4732 = vmatmul.mubr.msk.bf16.vlgmr.msra.gmra.mxu0 %vm872_vm5, %v848_v38 }
  0xf2   : > { %4743 = vmatprep.mubr.msk.bf16.mxu0 %vm5347_vm2, %v5345_v1 }
 0x1b1   : > { %v910_v39 = vpop.f32.mrf.mxu0 }
 0x1b2   : > { %v911_v43 = vadd.f32 %v4437_v40, %v910_v39 }
 0x1b3   : > { %v4733_v41 = vpop.f32.mrf.mxu0 }
 0x1b5   : > { %v913_v42 = vpop.f32.mrf.mxu0 }
 0x1b6   : > { %v914_v44 = vadd.f32 %v4437_v40, %v913_v42 }
 0x1b7   : > { %v4734_v45 = vpop.f32.mrf.mxu0 }
 0x1b8   : > { %v5565_v46 = vpack.c.bf16 %v914_v44, %v911_v43 }
 0x1ba   : > { %1055 = vrot.lane.b32.xlu1 %v5565_v46, %s6362_s29  ;;  %924 = vrot.lane.b32.xlu0 %v5565_v46, %s6364_s4 }
 0x1be   : > { %1184 = vrot.lane.b32.xlu1 %v5565_v46, %s6356_s25  ;;  %1057 = vrot.lane.b32.xlu0 %v5565_v46, %s6346_s5  ;;  %s6388_s5 = smov 80   ;;  %s6390_s25 = smov 88  }
 0x1c2   : > { %1311 = vrot.lane.b32.xlu1 %v5565_v46, %s6348_s22  ;;  %1182 = vrot.lane.b32.xlu0 %v5565_v46, %s6360_s1  ;;  %s6389_s22 = smov 72  }
 0x1c6   : > { %1309 = vrot.lane.b32.xlu0 %v5565_v46, %s6358_s2 }
 0x22c   : > { %v925_v47 = vpop.permute.xlu0 %924  ;;  %v1056_v50 = vpop.permute.xlu1 %1055 }
 0x22d   : > { %v931_v48 = vsel %vm926_vm6, %v925_v47, 0 }
 0x22e   : > { %4736 = vmatpush3.bf16.xpose.msra.mxu1 %v931_v48 }
 0x22f   : > { %4747 = vmatprep.subr.bf16.mxu1 %v5345_v1 }
 0x230   : > { %v1058_v49 = vpop.permute.xlu0 %1057  ;;  %v1185_v52 = vpop.permute.xlu1 %1184 }
 0x231   : > { %v1063_v51 = vsel %vm926_vm6, %v1058_v49, 0  ;;  %v1190_v53 = vsel %vm926_vm6, %v1185_v52, 0 }
 0x234   : > { %v1312_v54 = vpop.permute.xlu1 %1311  ;;  %v1183_v55 = vpop.permute.xlu0 %1182 }
 0x235   : > { %4738 = vmatmul.mubr.msk.bf16.vlgmr.msra.gmra.mxu1 %vm926_vm6, %v5565_v46  ;;  %v1317_v56 = vsel %vm926_vm6, %v1312_v54, 0 }
 0x236   : > { %4748 = vmatpush3.bf16.xpose.msra.mxu1 %v1063_v51  ;;  %4749 = vmatprep.mubr.msk.bf16.mxu1 %vm5347_vm2, %v5345_v1 }
 0x237   : > { %4759 = vmatprep.subr.bf16.mxu1 %v5345_v1 }
 0x238   : > { %v1310_v57 = vpop.permute.xlu0 %1309 }
 0x23d   : > { %4750 = vmatmul.mubr.msk.bf16.vlgmr.msra.gmra.mxu1 %vm926_vm6, %v1056_v50 }
 0x23e   : > { %4760 = vmatpush3.bf16.xpose.msra.mxu1 %v1190_v53  ;;  %4761 = vmatprep.mubr.msk.bf16.mxu1 %vm5347_vm2, %v5345_v1 }
 0x23f   : > { %4771 = vmatprep.subr.bf16.mxu1 %v5345_v1 }
 0x245   : > { %4762 = vmatmul.mubr.msk.bf16.vlgmr.msra.gmra.mxu1 %vm926_vm6, %v1183_v55 }
 0x246   : > { %4772 = vmatpush3.bf16.xpose.msra.mxu1 %v1317_v56  ;;  %4773 = vmatprep.mubr.msk.bf16.mxu1 %vm5347_vm2, %v5345_v1 }
 0x247   : > { %4783 = vmatprep.subr.bf16.mxu1 %v5345_v1 }
 0x24d   : > { %4774 = vmatmul.mubr.msk.bf16.vlgmr.msra.gmra.mxu1 %vm926_vm6, %v1310_v57 }
 0x24e   : > { %4787 = vmatprep.mubr.msk.bf16.mxu1 %vm5347_vm2, %v5345_v1 }
 0x2f5   : > { %v967_v62 = vpop.f32.mrf.mxu1 }
 0x2f6   : > { %v974_v0 = vmul.f32 0.35355338, %v967_v62 }
 0x2f7   : > { %v4739_v2 = vpop.f32.mrf.mxu1 }
 0x2f8   : > { %v976_v3 = vadd.f32 %v974_v0, %v5610_v63 }
 0x2f9   : > { %v970_v5 = vpop.f32.mrf.mxu1 }
 0x2fa   : > { %v975_v7 = vmul.f32 0.35355338, %v970_v5  ;;  %v979_v8 = vsel %vm978_vm9, %v976_v3, -inf }
 0x2fb   : > { %980 = vmax.xlane.f32.xlu1 %v979_v8  ;;  %v4740_v9 = vpop.f32.mrf.mxu1 }
 0x2fc   : > { %v977_v10 = vadd.f32 %v975_v7, %v5615_v6 }
 0x2fd   : > { %v1099_v11 = vpop.f32.mrf.mxu1 }
 0x2fe   : > { %v1106_v12 = vmul.f32 0.35355338, %v1099_v11  ;;  %v983_v13 = vsel %vm982_vm10, %v977_v10, -inf }
 0x2ff   : > { %984 = vmax.xlane.f32.xlu0 %v983_v13  ;;  %v4751_v14 = vpop.f32.mrf.mxu1 }
 0x300   : > { %v1108_v15 = vadd.f32 %v1106_v12, %v5610_v63 }
 0x301   : > { %v1102_v16 = vpop.f32.mrf.mxu1 }
 0x302   : > { %v1107_v17 = vmul.f32 0.35355338, %v1102_v16  ;;  %v1110_v18 = vsel %vm978_vm9, %v1108_v15, -inf }
 0x303   : > { %1111 = vmax.xlane.f32.xlu0 %v1110_v18  ;;  %v4752_v19 = vpop.f32.mrf.mxu1 }
 0x304   : > { %v1109_v20 = vadd.f32 %v1107_v17, %v5615_v6 }
 0x305   : > { %v1226_v21 = vpop.f32.mrf.mxu1 }
 0x306   : > { %v1233_v22 = vmul.f32 0.35355338, %v1226_v21  ;;  %v1113_v23 = vsel %vm982_vm10, %v1109_v20, -inf }
 0x307   : > { %1114 = vmax.xlane.f32.xlu1 %v1113_v23  ;;  %v4763_v24 = vpop.f32.mrf.mxu1 }
 0x308   : > { %v1235_v25 = vadd.f32 %v1233_v22, %v5610_v63 }
 0x309   : > { %v1229_v26 = vpop.f32.mrf.mxu1 }
 0x30a   : > { %v1234_v27 = vmul.f32 0.35355338, %v1229_v26  ;;  %v1237_v28 = vsel %vm978_vm9, %v1235_v25, -inf }
 0x30b   : > { %1238 = vmax.xlane.f32.xlu0 %v1237_v28  ;;  %v4764_v29 = vpop.f32.mrf.mxu1 }
 0x30c   : > { %v1236_v30 = vadd.f32 %v1234_v27, %v5615_v6 }
 0x30d   : > { %v1353_v31 = vpop.f32.mrf.mxu1 }
 0x30e   : > { %v1360_v32 = vmul.f32 0.35355338, %v1353_v31  ;;  %v1240_v33 = vsel %vm982_vm10, %v1236_v30, -inf  ;;  %v5671_v31 = vsel %vm1008_vm11, %v5485_v4, 0 }
 0x30f   : > { %1241 = vmax.xlane.f32.xlu1 %v1240_v33  ;;  %v4775_v37 = vpop.f32.mrf.mxu1 }
 0x310   : > { %v1362_v38 = vadd.f32 %v1360_v32, %v5610_v63 }
 0x311   : > { %v1356_v39 = vpop.f32.mrf.mxu1 }
 0x312   : > { %v1361_v40 = vmul.f32 0.35355338, %v1356_v39  ;;  %v1364_v41 = vsel %vm978_vm9, %v1362_v38, -inf }
 0x313   : > { %1365 = vmax.xlane.f32.xlu0 %v1364_v41  ;;  %v4776_v42 = vpop.f32.mrf.mxu1 }
 0x314   : > { %v1363_v43 = vadd.f32 %v1361_v40, %v5615_v6 }
 0x316   : > { %v1367_v44 = vsel %vm982_vm10, %v1363_v43, -inf }
 0x317   : > { %1368 = vmax.xlane.f32.xlu1 %v1367_v44 }
 0x384   : > { %v981_v45 = vpop.xlane.xlu1 %980 }
 0x385   : > { %v986_v47 = vsub.f32 %v976_v3, %v981_v45 }
 0x387   : > { %v988_v48 = vmul.f32 1.442695, %v986_v47 }
 0x388   : > { %v985_v49 = vpop.xlane.xlu0 %984 }
 0x389   : > { %5173 = vpow2.f32 %v988_v48  ;;  %v987_v50 = vsub.f32 %v977_v10, %v985_v49 }
 0x38b   : > { %v990_v51 = vmul.f32 1.442695, %v987_v50 }
 0x38c   : > { %v1112_v52 = vpop.xlane.xlu0 %1111 }
 0x38d   : > { %5175 = vpow2.f32 %v990_v51  ;;  %v1116_v53 = vsub.f32 %v1108_v15, %v1112_v52 }
 0x38f   : > { %v1118_v54 = vmul.f32 1.442695, %v1116_v53 }
 0x390   : > { %v1115_v0 = vpop.xlane.xlu1 %1114 }
 0x391   : > { %5177 = vpow2.f32 %v1118_v54  ;;  %v1117_v2 = vsub.f32 %v1109_v20, %v1115_v0 }
 0x393   : > { %v1120_v8 = vmul.f32 1.442695, %v1117_v2 }
 0x394   : > { %v1239_v3 = vpop.xlane.xlu0 %1238 }
 0x395   : > { %v1243_v7 = vsub.f32 %v1235_v25, %v1239_v3  ;;  %5179 = vpow2.f32 %v1120_v8 }
 0x396   : > { %v5632_v55 = vpop.eup %5173 }
 0x397   : > { %v992_v56 = vsel %vm978_vm9, %v5632_v55, 0.0  ;;  %v1245_v12 = vmul.f32 1.442695, %v1243_v7 }
 0x398   : > { %993 = vadd.xlane.f32.xlu0 %v992_v56  ;;  %v1242_v5 = vpop.xlane.xlu1 %1241 }
 0x399   : > { %v1244_v9 = vsub.f32 %v1236_v30, %v1242_v5  ;;  %5181 = vpow2.f32 %v1245_v12 }
 0x39a   : > { %v5636_v57 = vpop.eup %5175 }
 0x39b   : > { %v995_v58 = vsel %vm982_vm10, %v5636_v57, 0.0  ;;  %v1247_v14 = vmul.f32 1.442695, %v1244_v9 }
 0x39c   : > { %996 = vadd.xlane.f32.xlu1 %v995_v58  ;;  %v1366_v10 = vpop.xlane.xlu0 %1365 }
 0x39d   : > { %v1370_v13 = vsub.f32 %v1362_v38, %v1366_v10  ;;  %5183 = vpow2.f32 %v1247_v14 }
 0x39e   : > { %v5640_v61 = vpop.eup %5177 }
 0x39f   : > { %v1122_v62 = vsel %vm978_vm9, %v5640_v61, 0.0  ;;  %v1372_v16 = vmul.f32 1.442695, %v1370_v13 }
 0x3a0   : > { %1123 = vadd.xlane.f32.xlu0 %v1122_v62  ;;  %v1369_v11 = vpop.xlane.xlu1 %1368 }
 0x3a1   : > { %v1371_v15 = vsub.f32 %v1363_v43, %v1369_v11  ;;  %5185 = vpow2.f32 %v1372_v16  ;;  %v5141_v16 = vld [vmem:[%s6327_s12 + $0x8] sm:$0xff]  }
 0x3a2   : > { %v5180_v18 = vpop.eup %5179  ;;  %4784 = vmatpush3.bf16.msra.mxu1 %v5141_v16 }
 0x3a3   : > { %v1374_v17 = vmul.f32 1.442695, %v1371_v15  ;;  %v1125_v20 = vsel %vm982_vm10, %v5180_v18, 0.0  ;;  %4785 = vmatprep.subr.bf16.mxu1 %v5345_v1 }
 0x3a5   : > { %5187 = vpow2.f32 %v1374_v17 }
 0x3a6   : > { %v5648_v19 = vpop.eup %5181 }
 0x3a7   : > { %v1249_v24 = vsel %vm978_vm9, %v5648_v19, 0.0 }
 0x3aa   : > { %v5651_v21 = vpop.eup %5183 }
 0x3ab   : > { %v1252_v23 = vsel %vm982_vm10, %v5651_v21, 0.0 }
 0x3ad   : > { %1133 = vrot.lane.b32.xlu1 %v5565_v46, %s6342_s26  ;;  %s6343_s26 = smov 40  }
 0x3ae   : > { %v5653_v22 = vpop.eup %5185 }
 0x3af   : > { %v1376_v27 = vsel %vm978_vm9, %v5653_v22, 0.0 }
 0x3b2   : > { %v5659_v25 = vpop.eup %5187 }
 0x3b3   : > { %v1379_v26 = vsel %vm982_vm10, %v5659_v25, 0.0 }
 0x3b6   : > { %1003 = vrot.lane.b32.xlu0 %v5565_v46, %s6345_s27  ;;  %s6354_s27 = smov 8  }
 0x3d1   : > { %1126 = vadd.xlane.f32.xlu1 %v1125_v20 }
 0x3d5   : > { %1253 = vadd.xlane.f32.xlu1 %v1252_v23  ;;  %1250 = vadd.xlane.f32.xlu0 %v1249_v24 }
 0x3d9   : > { %1380 = vadd.xlane.f32.xlu1 %v1379_v26  ;;  %1377 = vadd.xlane.f32.xlu0 %v1376_v27 }
 0x3ea   : > { %1260 = vrot.lane.b32.xlu1 %v5565_v46, %s6344_s28  ;;  %s6350_s28 = smov 24  }
 0x3ef   : > { %1387 = vrot.lane.b32.xlu0 %v5565_v46, %s6343_s26  ;;  %s6352_s26 = smov 16  }
 0x421   : > { %v994_v28 = vpop.xlane.xlu0 %993 }
 0x422   : > { %5189 = vrcp.f32 %v994_v28 }
 0x425   : > { %v997_v29 = vpop.xlane.xlu1 %996 }
 0x426   : > { %5191 = vrcp.f32 %v997_v29 }
 0x429   : > { %v1124_v30 = vpop.xlane.xlu0 %1123  ;;  %v1134_v39 = vpop.permute.xlu1 %1133 }
 0x42a   : > { %v1139_v42 = vand.u32 %v1134_v39, %v5671_v31  ;;  %5193 = vrcp.f32 %v1124_v30 }
 0x42d   : > { %v1004_v32 = vpop.permute.xlu0 %1003 }
 0x42e   : > { %v1012_v33 = vand.u32 %v5671_v31, %v1004_v32 }
 0x42f   : > { %v5190_v37 = vpop.eup %5189 }
 0x430   : > { %4742 = vmatpush3.bf16.msra.mxu0 %v1012_v33  ;;  %v1000_v46 = vmul.f32 %v5190_v37, %v5632_v55 }
 0x431   : > { %4753 = vmatprep.subr.bf16.mxu0 %v5345_v1 }
 0x433   : > { %v5192_v38 = vpop.eup %5191 }
 0x434   : > { %v1001_v40 = vmul.f32 %v5192_v38, %v5636_v57 }
 0x436   : > { %v1002_v41 = vpack.c.bf16 %v1001_v40, %v1000_v46 }
 0x437   : > { %v5194_v48 = vpop.eup %5193 }
 0x438   : > { %4744 = vmatmul.mubr.msk.bf16.vlgmr.msra.gmra.mxu0 %vm978_vm9, %v1002_v41  ;;  %v1130_v51 = vmul.f32 %v5194_v48, %v5640_v61  ;;  %v5143_v48 = vld [vmem:[%s6387_s10 + $0x8] sm:$0xff]  }
 0x439   : > { %4754 = vmatpush3.bf16.msra.mxu0 %v1139_v42  ;;  %4755 = vmatprep.mubr.msk.bf16.mxu0 %vm5347_vm2, %v5345_v1 }
 0x43a   : > { %4765 = vmatprep.subr.bf16.mxu0 %v5345_v1 }
 0x45a   : > { %v1127_v4 = vpop.xlane.xlu1 %1126 }
 0x45b   : > { %5195 = vrcp.f32 %v1127_v4 }
 0x45e   : > { %v1254_v43 = vpop.xlane.xlu1 %1253  ;;  %v1251_v44 = vpop.xlane.xlu0 %1250 }
 0x45f   : > { %5197 = vrcp.f32 %v1254_v43 }
 0x460   : > { %5199 = vrcp.f32 %v1251_v44 }
 0x462   : > { %v1381_v45 = vpop.xlane.xlu1 %1380  ;;  %v1378_v47 = vpop.xlane.xlu0 %1377 }
 0x463   : > { %5201 = vrcp.f32 %v1381_v45 }
 0x464   : > { %5203 = vrcp.f32 %v1378_v47 }
 0x466   : > { %v1261_v50 = vpop.permute.xlu1 %1260  ;;  %v1388_v62 = vpop.permute.xlu0 %1387 }
 0x467   : > { %v1266_v55 = vand.u32 %v1261_v50, %v5671_v31  ;;  %v1393_v3 = vand.u32 %v1388_v62, %v5671_v31  ;;  %v5144_v50 = vld [vmem:[%s6387_s10] sm:$0xff]  }
 0x468   : > { %v5196_v49 = vpop.eup %5195 }
 0x469   : > { %v1131_v52 = vmul.f32 %v5196_v49, %v5180_v18 }
 0x46b   : > { %v1132_v53 = vpack.c.bf16 %v1131_v52, %v1130_v51  ;;  %v4449_v51 = vld [vmem:[%s6328_s13] ss:$0 sm:$0xff] }
 0x46c   : > { %v5198_v54 = vpop.eup %5197 }
 0x46d   : > { %v5200_v56 = vpop.eup %5199  ;;  %4756 = vmatmul.mubr.msk.bf16.vlgmr.msra.gmra.mxu0 %vm978_vm9, %v1132_v53  ;;  %v1258_v58 = vmul.f32 %v5198_v54, %v5651_v21  ;;  %v5142_v21 = vld [vmem:[%s6327_s12] sm:$0xff]  }
 0x46e   : > { %4766 = vmatpush3.bf16.msra.mxu0 %v1266_v55  ;;  %4767 = vmatprep.mubr.msk.bf16.mxu0 %vm5347_vm2, %v5345_v1  ;;  %v1257_v57 = vmul.f32 %v5200_v56, %v5648_v19 }
 0x46f   : > { %4777 = vmatprep.subr.bf16.mxu0 %v5345_v1  ;;  %4786 = vmatpush3.bf16.msra.mxu1 %v5142_v21 }
 0x470   : > { %v5202_v61 = vpop.eup %5201  ;;  %v1259_v0 = vpack.c.bf16 %v1258_v58, %v1257_v57  ;;  %4799 = vmatprep.subr.bf16.mxu1 %v5345_v1 }
 0x471   : > { %v5204_v2 = vpop.eup %5203  ;;  %v1385_v7 = vmul.f32 %v5202_v61, %v5659_v25 }
 0x472   : > { %v1384_v5 = vmul.f32 %v5204_v2, %v5653_v22 }
 0x474   : > { %v1386_v8 = vpack.c.bf16 %v1385_v7, %v1384_v5 }
 0x475   : > { %4768 = vmatmul.mubr.msk.bf16.vlgmr.msra.gmra.mxu0 %vm978_vm9, %v1259_v0 }
 0x476   : > { %4778 = vmatpush3.bf16.msra.mxu0 %v1393_v3  ;;  %4779 = vmatprep.mubr.msk.bf16.mxu0 %vm5347_vm2, %v5345_v1 }
 0x477   : > { %4791 = vmatprep.subr.bf16.mxu0 %v5345_v1 }
 0x47d   : > { %4780 = vmatmul.mubr.msk.bf16.vlgmr.msra.gmra.mxu0 %vm978_vm9, %v1386_v8 }
 0x47e   : > { %4795 = vmatprep.mubr.msk.bf16.mxu0 %vm5347_vm2, %v5345_v1 }
 0x4f8   : > { %v1048_v9 = vpop.f32.mrf.mxu0 }
 0x4fa   : > { %v4745_v10 = vpop.f32.mrf.mxu0 }
 0x4fc   : > { %v1051_v11 = vpop.f32.mrf.mxu0 }
 0x4fe   : > { %v4746_v12 = vpop.f32.mrf.mxu0 }
 0x52d   : > { %v1175_v13 = vpop.f32.mrf.mxu0 }
 0x52f   : > { %v4757_v14 = vpop.f32.mrf.mxu0 }
 0x530   : > { %v5145_v14 = vld [vmem:[%s6323_s8 + $0x8] sm:$0xff]  }
 0x531   : > { %v1178_v15 = vpop.f32.mrf.mxu0  ;;  %4792 = vmatpush3.bf16.msra.mxu0 %v5145_v14 }
 0x532   : > { %v5072_v17 = vpack.i.bf16 %v1178_v15, %v1175_v13  ;;  %v5146_v15 = vld [vmem:[%s6323_s8] sm:$0xff]   ;;  %4793 = vmatprep.subr.bf16.mxu0 %v5345_v1 }
 0x533   : > { %v4758_v18 = vpop.f32.mrf.mxu0 }
 0x534   : > { %5073 = vrot.lane.b32.xlu1 %v5072_v17, %s6354_s27  ;;  %s6393_s27 = smov 24  }
 0x535   : > { %v1302_v19 = vpop.f32.mrf.mxu0  ;;  %4794 = vmatpush3.bf16.msra.mxu0 %v5146_v15 }
 0x536   : > { %4807 = vmatprep.subr.bf16.mxu0 %v5345_v1 }
 0x537   : > { %v4769_v20 = vpop.f32.mrf.mxu0 }
 0x539   : > { %v1305_v22 = vpop.f32.mrf.mxu0 }
 0x53a   : > { %v5077_v23 = vpack.i.bf16 %v1305_v22, %v1302_v19 }
 0x53b   : > { %v4770_v24 = vpop.f32.mrf.mxu0 }
 0x53c   : > { %5078 = vrot.lane.b32.xlu0 %v5077_v23, %s6352_s26  ;;  %s6396_s26 = smov 112  }
 0x53d   : > { %v1429_v25 = vpop.f32.mrf.mxu0 }
 0x53f   : > { %v4781_v26 = vpop.f32.mrf.mxu0 }
 0x541   : > { %v1432_v27 = vpop.f32.mrf.mxu0 }
 0x542   : > { %v5082_v28 = vpack.i.bf16 %v1432_v27, %v1429_v25 }
 0x543   : > { %v4782_v29 = vpop.f32.mrf.mxu0 }
 0x544   : > { %5083 = vrot.lane.b32.xlu1 %v5082_v28, %s6350_s28  ;;  %s6391_s28 = smov 8  }
 0x5a6   : > { %v5074_v30 = vpop.permute.xlu1 %5073 }
 0x5a7   : > { %v5076_v33 = vunpack.i.h.bf16 %v5074_v30  ;;  %v5075_v37 = vunpack.i.l.bf16 %v5074_v30  ;;  %v1567_v30 = vsub.s32 0, %v5602_v59 }
 0x5a9   : > { %v1461_v40 = vsel %vm926_vm6, %v1051_v11, %v5076_v33  ;;  %v1460_v41 = vsel %vm926_vm6, %v1048_v9, %v5075_v37  ;;  %v4457_v11 = vld [vmem:[%s6326_s11] ss:$0 sm:$0xff] }
 0x5ae   : > { %v5079_v32 = vpop.permute.xlu0 %5078 }
 0x5af   : > { %v5081_v38 = vunpack.i.h.bf16 %v5079_v32  ;;  %v5080_v39 = vunpack.i.l.bf16 %v5079_v32  ;;  %v5762_v32 = vld [vmem:[%s6329_s14] sm:$0x3f] }
 0x5b1   : > { %v1464_v43 = vsel %vm1462_vm12, %v1461_v40, %v5081_v38  ;;  %v1463_v44 = vsel %vm1462_vm12, %v1460_v41, %v5080_v39  ;;  %v1568_v39 = vrot.slane %v5762_v32, %v1567_v30 }
 0x5b6   : > { %v5084_v46 = vpop.permute.xlu1 %5083 }
 0x5b7   : > { %v5086_v42 = vunpack.i.h.bf16 %v5084_v46  ;;  %v5085_v4 = vunpack.i.l.bf16 %v5084_v46  ;;  %v1573_v46 = vsub.s32 1, %v5602_v59 }
 0x5b9   : > { %v1467_v45 = vsel %vm1465_vm13, %v1464_v43, %v5086_v42  ;;  %v1466_v47 = vsel %vm1465_vm13, %v1463_v44, %v5085_v4  ;;  %v1574_v43 = vrot.slane %v5762_v32, %v1573_v46 }
 0x5ba   : > { %v1468_v49 = vpack.c.bf16 %v1467_v45, %v1466_v47 }
 0x5bc   : > { %4788 = vmatmul.mubr.msk.bf16.vlgmr.msra.gmra.mxu1 %vm872_vm5, %v1468_v49 }
 0x5bd   : > { %4800 = vmatpush3.bf16.msra.mxu1 %v5143_v48  ;;  %4803 = vmatprep.mubr.msk.bf16.mxu1 %vm5347_vm2, %v5345_v1 }
 0x5be   : > { %4801 = vmatprep.subr.bf16.mxu1 %v5345_v1 }
 0x5c1   : > { %4802 = vmatpush3.bf16.msra.mxu1 %v5144_v50 }
 0x5c2   : > { %4813 = vmatprep.subr.bf16.mxu1 %v5345_v1 }
 0x5c4   : > { %4804 = vmatmul.mubr.msk.bf16.vlgmr.msra.gmra.mxu1 %vm872_vm5, %v5551_v34 }
 0x5c5   : > { %4815 = vmatprep.mubr.msk.bf16.mxu1 %vm5347_vm2, %v5345_v1 }
 0x67c   : > { %v1524_v52 = vpop.f32.mrf.mxu1 }
 0x67d   : > { %v1525_v53 = vadd.f32 %v4449_v51, %v1524_v52 }
 0x67e   : > { %v4789_v54 = vpop.f32.mrf.mxu1 }
 0x67f   : > { %v1531_v55 = vadd.f32 %v1525_v53, %v5553_v35 }
 0x680   : > { %v1527_v56 = vpop.f32.mrf.mxu1 }
 0x681   : > { %v1528_v57 = vadd.f32 %v4449_v51, %v1527_v56  ;;  %v1533_v58 = vsel %vm872_vm5, %v1531_v55, 0.0  ;;  %v1543_v62 = vmul.f32 %v1531_v55, %v1531_v55  ;;  %v4453_v51 = vld [vmem:[%s6324_s9] ss:$0 sm:$0xff] }
 0x682   : > { %1534 = vadd.xlane.f32.xlu0 %v1533_v58  ;;  %v4790_v61 = vpop.f32.mrf.mxu1 }
 0x683   : > { %v1532_v0 = vadd.f32 %v1528_v57, %v5555_v36  ;;  %v1545_v3 = vsel %vm872_vm5, %v1543_v62, 0.0 }
 0x684   : > { %v1706_v2 = vpop.f32.mrf.mxu1 }
 0x685   : > { %v1537_v5 = vsel %vm1536_vm14, %v1532_v0, 0.0  ;;  %v1544_v7 = vmul.f32 %v1532_v0, %v1532_v0  ;;  %v1707_v36 = vadd.f32 %v4457_v11, %v1706_v2 }
 0x686   : > { %1546 = vadd.xlane.f32.xlu0 %v1545_v3  ;;  %1538 = vadd.xlane.f32.xlu1 %v1537_v5  ;;  %v4805_v8 = vpop.f32.mrf.mxu1 }
 0x687   : > { %v1548_v9 = vsel %vm1536_vm14, %v1544_v7, 0.0 }
 0x688   : > { %v1709_v35 = vpop.f32.mrf.mxu1 }
 0x689   : > { %v1710_v12 = vadd.f32 %v4457_v11, %v1709_v35 }
 0x68a   : > { %1549 = vadd.xlane.f32.xlu0 %v1548_v9  ;;  %v4806_v10 = vpop.f32.mrf.mxu1 }
 0x68b   : > { %v5744_v13 = vpack.c.bf16 %v1710_v12, %v1707_v36 }
 0x68d   : > { %v1725_v49 = vsel %vm926_vm6, %v5744_v13, 0 }
 0x697   : > { %1848 = vrot.lane.b32.xlu1 %v5744_v13, %s6362_s29 }
 0x69b   : > { %1973 = vrot.lane.b32.xlu1 %v5744_v13, %s6360_s1 }
 0x70b   : > { %v1535_v16 = vpop.xlane.xlu0 %1534 }
 0x70c   : > { %v1541_v17 = vmul.f32 0.03125, %v1535_v16 }
 0x70e   : > { %v1553_v20 = vmul.f32 %v1541_v17, %v1541_v17  ;;  %v1557_v33 = vsub.f32 %v1531_v55, %v1541_v17 }
 0x70f   : > { %v1547_v18 = vpop.xlane.xlu0 %1546  ;;  %v1539_v19 = vpop.xlane.xlu1 %1538 }
 0x710   : > { %v1551_v21 = vmul.f32 0.03125, %v1547_v18  ;;  %v1542_v22 = vmul.f32 0.03125, %v1539_v19 }
 0x712   : > { %v1555_v23 = vsub.f32 %v1551_v21, %v1553_v20  ;;  %v1554_v26 = vmul.f32 %v1542_v22, %v1542_v22  ;;  %v1558_v40 = vsub.f32 %v1532_v0, %v1542_v22 }
 0x713   : > { %v1550_v24 = vpop.xlane.xlu0 %1549  ;;  %v1849_v57 = vpop.permute.xlu1 %1848 }
 0x714   : > { %v1559_v25 = vadd.f32 1e-05, %v1555_v23  ;;  %v1552_v27 = vmul.f32 0.03125, %v1550_v24  ;;  %v1854_v62 = vsel %vm926_vm6, %v1849_v57, 0 }
 0x716   : > { %5205 = vrsqrt.f32 %v1559_v25  ;;  %v1556_v28 = vsub.f32 %v1552_v27, %v1554_v26 }
 0x717   : > { %v1974_v61 = vpop.permute.xlu1 %1973 }
 0x718   : > { %v1560_v29 = vadd.f32 1e-05, %v1556_v28  ;;  %v1979_v2 = vsel %vm926_vm6, %v1974_v61, 0 }
 0x71a   : > { %5207 = vrsqrt.f32 %v1560_v29 }
 0x723   : > { %v5206_v37 = vpop.eup %5205 }
 0x724   : > { %v1563_v38 = vmul.f32 %v5206_v37, %v1557_v33 }
 0x726   : > { %v1569_v4 = vmul.f32 %v1568_v39, %v1563_v38 }
 0x727   : > { %v5208_v41 = vpop.eup %5207 }
 0x728   : > { %v1564_v42 = vmul.f32 %v5208_v41, %v1558_v40  ;;  %v5771_v45 = vadd.f32 %v1574_v43, %v1569_v4 }
 0x72a   : > { %v1570_v44 = vmul.f32 %v1568_v39, %v1564_v42 }
 0x72c   : > { %v5773_v47 = vadd.f32 %v1574_v43, %v1570_v44 }
 0x72e   : > { %v1577_v48 = vpack.c.bf16 %v5773_v47, %v5771_v45 }
 0x730   : > { %4796 = vmatmul.mubr.msk.bf16.vlgmr.msra.gmra.mxu0 %vm872_vm5, %v1577_v48 }
 0x731   : > { %4808 = vmatpush3.bf16.xpose.msra.mxu0 %v1725_v49  ;;  %4809 = vmatprep.mubr.msk.bf16.mxu0 %vm5347_vm2, %v5345_v1 }
 0x732   : > { %4819 = vmatprep.subr.bf16.mxu0 %v5345_v1 }
 0x7f0   : > { %v1638_v50 = vpop.f32.mrf.mxu0 }
 0x7f1   : > { %v1639_v54 = vadd.f32 %v4453_v51, %v1638_v50 }
 0x7f2   : > { %v4797_v52 = vpop.f32.mrf.mxu0 }
 0x7f4   : > { %v1641_v53 = vpop.f32.mrf.mxu0 }
 0x7f5   : > { %v1642_v55 = vadd.f32 %v4453_v51, %v1641_v53 }
 0x7f6   : > { %v4798_v56 = vpop.f32.mrf.mxu0 }
 0x7f7   : > { %v1645_v58 = vpack.c.bf16 %v1642_v55, %v1639_v54 }
 0x7f9   : > { %1971 = vrot.lane.b32.xlu1 %v1645_v58, %s6360_s1  ;;  %1846 = vrot.lane.b32.xlu0 %v1645_v58, %s6362_s29  ;;  %s6392_s29 = smov 16   ;;  %s6397_s1 = smov 104  }
 0x7fa   : > { %4810 = vmatmul.mubr.msk.bf16.vlgmr.msra.gmra.mxu0 %vm926_vm6, %v1645_v58 }
 0x7fb   : > { %4820 = vmatpush3.bf16.xpose.msra.mxu0 %v1854_v62  ;;  %4821 = vmatprep.mubr.msk.bf16.mxu0 %vm5347_vm2, %v5345_v1 }
 0x7fc   : > { %4831 = vmatprep.subr.bf16.mxu0 %v5345_v1 }
 0x7fd   : > { %2096 = vrot.lane.b32.xlu1 %v1645_v58, %s6358_s2  ;;  %2098 = vrot.lane.b32.xlu0 %v5744_v13, %s6358_s2  ;;  %s6398_s2 = smov 64  }
 0x86b   : > { %v1847_v0 = vpop.permute.xlu0 %1846  ;;  %v1972_v5 = vpop.permute.xlu1 %1971 }
 0x86c   : > { %4822 = vmatmul.mubr.msk.bf16.vlgmr.msra.gmra.mxu0 %vm926_vm6, %v1847_v0 }
 0x86d   : > { %4832 = vmatpush3.bf16.xpose.msra.mxu0 %v1979_v2  ;;  %4833 = vmatprep.mubr.msk.bf16.mxu0 %vm5347_vm2, %v5345_v1 }
 0x86e   : > { %4843 = vmatprep.subr.bf16.mxu0 %v5345_v1 }
 0x86f   : > { %v2099_v3 = vpop.permute.xlu0 %2098  ;;  %v2097_v8 = vpop.permute.xlu1 %2096 }
 0x870   : > { %v2104_v7 = vsel %vm926_vm6, %v2099_v3, 0 }
 0x874   : > { %4834 = vmatmul.mubr.msk.bf16.vlgmr.msra.gmra.mxu0 %vm926_vm6, %v1972_v5 }
 0x875   : > { %4844 = vmatpush3.bf16.xpose.msra.mxu0 %v2104_v7  ;;  %4845 = vmatprep.mubr.msk.bf16.mxu0 %vm5347_vm2, %v5345_v1 }
 0x876   : > { %4855 = vmatprep.subr.bf16.mxu0 %v5345_v1 }
 0x87c   : > { %4846 = vmatmul.mubr.msk.bf16.vlgmr.msra.gmra.mxu0 %vm926_vm6, %v2097_v8 }
 0x87d   : > { %4859 = vmatprep.mubr.msk.bf16.mxu0 %vm5347_vm2, %v5345_v1 }
 0x8ba   : > { %v1761_v35 = vpop.f32.mrf.mxu0 }
 0x8bb   : > { %v1768_v9 = vmul.f32 0.35355338, %v1761_v35 }
 0x8bc   : > { %v4811_v10 = vpop.f32.mrf.mxu0 }
 0x8bd   : > { %v1771_v11 = vsel %vm1770_vm15, %v1768_v9, -inf }
 0x8be   : > { %1772 = vmax.xlane.f32.xlu0 %v1771_v11  ;;  %v1764_v12 = vpop.f32.mrf.mxu0 }
 0x8bf   : > { %v1769_v36 = vmul.f32 0.35355338, %v1764_v12 }
 0x8c0   : > { %v4812_v14 = vpop.f32.mrf.mxu0 }
 0x8c1   : > { %v1775_v15 = vsel %vm1774_vm0, %v1769_v36, -inf }
 0x8c2   : > { %1776 = vmax.xlane.f32.xlu1 %v1775_v15 }
 0x92c   : > { %v1890_v16 = vpop.f32.mrf.mxu0 }
 0x92d   : > { %v1897_v17 = vmul.f32 0.35355338, %v1890_v16 }
 0x92e   : > { %v4823_v18 = vpop.f32.mrf.mxu0 }
 0x92f   : > { %v1899_v19 = vsel %vm1770_vm15, %v1897_v17, -inf }
 0x930   : > { %1900 = vmax.xlane.f32.xlu0 %v1899_v19  ;;  %v1893_v20 = vpop.f32.mrf.mxu0 }
 0x931   : > { %v1898_v21 = vmul.f32 0.35355338, %v1893_v20 }
 0x932   : > { %v4824_v22 = vpop.f32.mrf.mxu0 }
 0x933   : > { %v1902_v23 = vsel %vm1774_vm0, %v1898_v21, -inf }
 0x934   : > { %1903 = vmax.xlane.f32.xlu0 %v1902_v23  ;;  %v2015_v24 = vpop.f32.mrf.mxu0 }
 0x935   : > { %v2022_v25 = vmul.f32 0.35355338, %v2015_v24 }
 0x936   : > { %v4835_v26 = vpop.f32.mrf.mxu0 }
 0x937   : > { %v2024_v27 = vsel %vm1770_vm15, %v2022_v25, -inf }
 0x938   : > { %2025 = vmax.xlane.f32.xlu1 %v2024_v27  ;;  %v2018_v28 = vpop.f32.mrf.mxu0 }
 0x939   : > { %v2023_v29 = vmul.f32 0.35355338, %v2018_v28 }
 0x93a   : > { %v4836_v33 = vpop.f32.mrf.mxu0 }
 0x93b   : > { %v2027_v37 = vsel %vm1774_vm0, %v2023_v29, -inf }
 0x93c   : > { %2028 = vmax.xlane.f32.xlu0 %v2027_v37  ;;  %v2140_v38 = vpop.f32.mrf.mxu0 }
 0x93d   : > { %v2147_v39 = vmul.f32 0.35355338, %v2140_v38 }
 0x93e   : > { %v4847_v40 = vpop.f32.mrf.mxu0 }
 0x93f   : > { %v2149_v41 = vsel %vm1770_vm15, %v2147_v39, -inf }
 0x940   : > { %2150 = vmax.xlane.f32.xlu1 %v2149_v41  ;;  %v2143_v42 = vpop.f32.mrf.mxu0 }
 0x941   : > { %v2148_v4 = vmul.f32 0.35355338, %v2143_v42 }
 0x942   : > { %v4848_v43 = vpop.f32.mrf.mxu0 }
 0x943   : > { %v2152_v44 = vsel %vm1774_vm0, %v2148_v4, -inf }
 0x944   : > { %2153 = vmax.xlane.f32.xlu0 %v2152_v44 }
 0x947   : > { %v1773_v51 = vpop.xlane.xlu0 %1772 }
 0x948   : > { %v1778_v52 = vsub.f32 %v1768_v9, %v1773_v51 }
 0x94a   : > { %v1780_v55 = vmul.f32 1.442695, %v1778_v52 }
 0x94b   : > { %v1777_v48 = vpop.xlane.xlu1 %1776 }
 0x94c   : > { %v1779_v49 = vsub.f32 %v1769_v36, %v1777_v48 }
 0x94e   : > { %v1782_v50 = vmul.f32 1.442695, %v1779_v49 }
 0x950   : > { %5209 = vpow2.f32 %v1782_v50 }
 0x951   : > { %1796 = vrot.lane.b32.xlu1 %v5744_v13, %s6364_s4  ;;  %5211 = vpow2.f32 %v1780_v55  ;;  %s6394_s4 = smov 96  }
 0x95d   : > { %v5819_v53 = vpop.eup %5209 }
 0x95e   : > { %v1787_v54 = vsel %vm1774_vm0, %v5819_v53, 0.0  ;;  %v5212_v56 = vpop.eup %5211 }
 0x95f   : > { %1788 = vadd.xlane.f32.xlu0 %v1787_v54  ;;  %v1784_v57 = vsel %vm1770_vm15, %v5212_v56, 0.0 }
 0x975   : > { %1785 = vadd.xlane.f32.xlu1 %v1784_v57 }
 0x9b9   : > { %v1901_v58 = vpop.xlane.xlu0 %1900 }
 0x9ba   : > { %v1905_v62 = vsub.f32 %v1897_v17, %v1901_v58 }
 0x9bc   : > { %v1907_v61 = vmul.f32 1.442695, %v1905_v62 }
 0x9bd   : > { %v1904_v0 = vpop.xlane.xlu0 %1903 }
 0x9be   : > { %5213 = vpow2.f32 %v1907_v61  ;;  %v1906_v2 = vsub.f32 %v1898_v21, %v1904_v0 }
 0x9c0   : > { %v1909_v3 = vmul.f32 1.442695, %v1906_v2 }
 0x9c1   : > { %v2026_v5 = vpop.xlane.xlu1 %2025 }
 0x9c2   : > { %5215 = vpow2.f32 %v1909_v3  ;;  %v2030_v7 = vsub.f32 %v2022_v25, %v2026_v5 }
 0x9c4   : > { %v2032_v8 = vmul.f32 1.442695, %v2030_v7 }
 0x9c5   : > { %v2029_v35 = vpop.xlane.xlu0 %2028 }
 0x9c6   : > { %5217 = vpow2.f32 %v2032_v8  ;;  %v2031_v9 = vsub.f32 %v2023_v29, %v2029_v35 }
 0x9c8   : > { %v2034_v10 = vmul.f32 1.442695, %v2031_v9 }
 0x9c9   : > { %v2151_v11 = vpop.xlane.xlu1 %2150 }
 0x9ca   : > { %5219 = vpow2.f32 %v2034_v10  ;;  %v2155_v12 = vsub.f32 %v2147_v39, %v2151_v11 }
 0x9cb   : > { %v5214_v36 = vpop.eup %5213 }
 0x9cc   : > { %v2157_v14 = vmul.f32 1.442695, %v2155_v12  ;;  %v1911_v15 = vsel %vm1770_vm15, %v5214_v36, 0.0 }
 0x9cd   : > { %1912 = vadd.xlane.f32.xlu1 %v1911_v15  ;;  %v1797_v16 = vpop.permute.xlu1 %1796  ;;  %v2154_v17 = vpop.xlane.xlu0 %2153 }
 0x9ce   : > { %5221 = vpow2.f32 %v2157_v14  ;;  %v1802_v18 = vsel %vm1008_vm11, %v1797_v16, 0  ;;  %v2156_v19 = vsub.f32 %v2148_v4, %v2154_v17 }
 0x9cf   : > { %v5216_v20 = vpop.eup %5215  ;;  %4814 = vmatpush3.bf16.msra.mxu1 %v1802_v18 }
 0x9d0   : > { %v2159_v21 = vmul.f32 1.442695, %v2156_v19  ;;  %v1914_v22 = vsel %vm1774_vm0, %v5216_v20, 0.0  ;;  %4825 = vmatprep.subr.bf16.mxu1 %v5345_v1 }
 0x9d1   : > { %1915 = vadd.xlane.f32.xlu0 %v1914_v22 }
 0x9d2   : > { %5223 = vpow2.f32 %v2159_v21 }
 0x9d3   : > { %v5218_v23 = vpop.eup %5217 }
 0x9d4   : > { %v2036_v24 = vsel %vm1770_vm15, %v5218_v23, 0.0 }
 0x9d5   : > { %2037 = vadd.xlane.f32.xlu1 %v2036_v24 }
 0x9d7   : > { %v5220_v25 = vpop.eup %5219 }
 0x9d8   : > { %v2039_v26 = vsel %vm1774_vm0, %v5220_v25, 0.0 }
 0x9d9   : > { %2040 = vadd.xlane.f32.xlu0 %v2039_v26  ;;  %v5148_v26 = vld [vmem:[%s6327_s12 + $0x10] sm:$0xff]  }
 0x9db   : > { %v5222_v27 = vpop.eup %5221 }
 0x9dc   : > { %v2161_v28 = vsel %vm1770_vm15, %v5222_v27, 0.0 }
 0x9dd   : > { %2162 = vadd.xlane.f32.xlu1 %v2161_v28 }
 0x9df   : > { %v5224_v29 = vpop.eup %5223 }
 0x9e0   : > { %v2164_v33 = vsel %vm1774_vm0, %v5224_v29, 0.0 }
 0x9e1   : > { %2165 = vadd.xlane.f32.xlu0 %v2164_v33 }
 0x9e8   : > { %v1789_v37 = vpop.xlane.xlu0 %1788 }
 0x9e9   : > { %5225 = vrcp.f32 %v1789_v37 }
 0x9ee   : > { %2047 = vrot.lane.b32.xlu1 %v5744_v13, %s6388_s5 }
 0x9f2   : > { %2172 = vrot.lane.b32.xlu1 %v5744_v13, %s6389_s22 }
 0x9f6   : > { %v5226_v39 = vpop.eup %5225 }
 0x9f7   : > { %1922 = vrot.lane.b32.xlu0 %v5744_v13, %s6390_s25  ;;  %v1793_v42 = vmul.f32 %v5226_v39, %v5819_v53 }
 0x9fe   : > { %v1786_v38 = vpop.xlane.xlu1 %1785 }
 0x9ff   : > { %5227 = vrcp.f32 %v1786_v38 }
 0xa0c   : > { %v5228_v40 = vpop.eup %5227 }
 0xa0d   : > { %v1792_v41 = vmul.f32 %v5228_v40, %v5212_v56 }
 0xa0f   : > { %v1794_v4 = vpack.c.bf16 %v1793_v42, %v1792_v41 }
 0xa11   : > { %4816 = vmatmul.mubr.msk.bf16.vlgmr.msra.gmra.mxu1 %vm1770_vm15, %v1794_v4 }
 0xa12   : > { %4827 = vmatprep.mubr.msk.bf16.mxu1 %vm5347_vm2, %v5345_v1 }
 0xa56   : > { %v1913_v44 = vpop.xlane.xlu1 %1912 }
 0xa5a   : > { %v1916_v43 = vpop.xlane.xlu0 %1915 }
 0xa5b   : > { %5229 = vrcp.f32 %v1916_v43 }
 0xa5c   : > { %5231 = vrcp.f32 %v1913_v44 }
 0xa5e   : > { %v2038_v48 = vpop.xlane.xlu1 %2037 }
 0xa62   : > { %v2041_v13 = vpop.xlane.xlu0 %2040 }
 0xa63   : > { %5233 = vrcp.f32 %v2041_v13 }
 0xa64   : > { %5235 = vrcp.f32 %v2038_v48 }
 0xa66   : > { %v2163_v50 = vpop.xlane.xlu1 %2162 }
 0xa68   : > { %v5230_v49 = vpop.eup %5229 }
 0xa69   : > { %v5232_v52 = vpop.eup %5231  ;;  %v1920_v53 = vmul.f32 %v5230_v49, %v5216_v20  ;;  %v5147_v20 = vld [vmem:[%s6327_s12 + $0x18] sm:$0xff]  }
 0xa6a   : > { %v2166_v51 = vpop.xlane.xlu0 %2165  ;;  %v1919_v56 = vmul.f32 %v5232_v52, %v5214_v36  ;;  %v2048_v57 = vpop.permute.xlu1 %2047  ;;  %4856 = vmatpush3.bf16.msra.mxu0 %v5147_v20 }
 0xa6b   : > { %5237 = vrcp.f32 %v2166_v51  ;;  %v2053_v61 = vsel %vm1008_vm11, %v2048_v57, 0  ;;  %4857 = vmatprep.subr.bf16.mxu0 %v5345_v1  ;;  %v4474_v57 = vld [vmem:[%s6328_s13 + $0x1] ss:$0 sm:$0xff] }
 0xa6c   : > { %5239 = vrcp.f32 %v2163_v50  ;;  %v1921_v58 = vpack.c.bf16 %v1920_v53, %v1919_v56 }
 0xa6e   : > { %v1923_v54 = vpop.permute.xlu0 %1922  ;;  %v2173_v5 = vpop.permute.xlu1 %2172  ;;  %4858 = vmatpush3.bf16.msra.mxu0 %v5148_v26 }
 0xa6f   : > { %v1928_v55 = vsel %vm1008_vm11, %v1923_v54, 0  ;;  %v2178_v35 = vsel %vm1008_vm11, %v2173_v5, 0  ;;  %4871 = vmatprep.subr.bf16.mxu0 %v5345_v1 }
 0xa70   : > { %4826 = vmatpush3.bf16.msra.mxu1 %v1928_v55  ;;  %v5234_v62 = vpop.eup %5233 }
 0xa71   : > { %4837 = vmatprep.subr.bf16.mxu1 %v5345_v1  ;;  %v5236_v0 = vpop.eup %5235  ;;  %v2045_v2 = vmul.f32 %v5234_v62, %v5220_v25 }
 0xa72   : > { %v2044_v3 = vmul.f32 %v5236_v0, %v5218_v23 }
 0xa73   : > { %4828 = vmatmul.mubr.msk.bf16.vlgmr.msra.gmra.mxu1 %vm1770_vm15, %v1921_v58 }
 0xa74   : > { %4838 = vmatpush3.bf16.msra.mxu1 %v2053_v61  ;;  %4839 = vmatprep.mubr.msk.bf16.mxu1 %vm5347_vm2, %v5345_v1  ;;  %v2046_v7 = vpack.c.bf16 %v2045_v2, %v2044_v3 }
 0xa75   : > { %4849 = vmatprep.subr.bf16.mxu1 %v5345_v1 }
 0xa78   : > { %v5238_v8 = vpop.eup %5237 }
 0xa79   : > { %v5240_v9 = vpop.eup %5239  ;;  %v2170_v10 = vmul.f32 %v5238_v8, %v5224_v29 }
 0xa7a   : > { %v2169_v11 = vmul.f32 %v5240_v9, %v5222_v27 }
 0xa7b   : > { %4840 = vmatmul.mubr.msk.bf16.vlgmr.msra.gmra.mxu1 %vm1770_vm15, %v2046_v7 }
 0xa7c   : > { %4850 = vmatpush3.bf16.msra.mxu1 %v2178_v35  ;;  %4851 = vmatprep.mubr.msk.bf16.mxu1 %vm5347_vm2, %v5345_v1  ;;  %v2171_v12 = vpack.c.bf16 %v2170_v10, %v2169_v11 }
 0xa7d   : > { %4863 = vmatprep.subr.bf16.mxu1 %v5345_v1 }
 0xa83   : > { %4852 = vmatmul.mubr.msk.bf16.vlgmr.msra.gmra.mxu1 %vm1770_vm15, %v2171_v12 }
 0xa84   : > { %4867 = vmatprep.mubr.msk.bf16.mxu1 %vm5347_vm2, %v5345_v1 }
 0xad1   : > { %v1838_v36 = vpop.f32.mrf.mxu1 }
 0xad3   : > { %v4817_v14 = vpop.f32.mrf.mxu1 }
 0xad5   : > { %v1841_v15 = vpop.f32.mrf.mxu1 }
 0xad7   : > { %v4818_v16 = vpop.f32.mrf.mxu1 }
 0xb33   : > { %v1964_v17 = vpop.f32.mrf.mxu1 }
 0xb35   : > { %v4829_v18 = vpop.f32.mrf.mxu1 }
 0xb37   : > { %v1967_v19 = vpop.f32.mrf.mxu1 }
 0xb38   : > { %v5087_v21 = vpack.i.bf16 %v1967_v19, %v1964_v17 }
 0xb39   : > { %v4830_v22 = vpop.f32.mrf.mxu1 }
 0xb3a   : > { %5088 = vrot.lane.b32.xlu0 %v5087_v21, %s6391_s28 }
 0xb3b   : > { %v2089_v23 = vpop.f32.mrf.mxu1 }
 0xb3d   : > { %v4841_v24 = vpop.f32.mrf.mxu1 }
 0xb3f   : > { %v2092_v25 = vpop.f32.mrf.mxu1 }
 0xb40   : > { %v5092_v27 = vpack.i.bf16 %v2092_v25, %v2089_v23 }
 0xb41   : > { %v4842_v28 = vpop.f32.mrf.mxu1 }
 0xb42   : > { %5093 = vrot.lane.b32.xlu1 %v5092_v27, %s6392_s29  ;;  %v2348_v28 = vsub.s32 2, %v5602_v59 }
 0xb43   : > { %v2214_v29 = vpop.f32.mrf.mxu1 }
 0xb45   : > { %v4853_v33 = vpop.f32.mrf.mxu1 }
 0xb46   : > { %v2349_v33 = vrot.slane %v5762_v32, %v2348_v28 }
 0xb47   : > { %v2217_v37 = vpop.f32.mrf.mxu1 }
 0xb48   : > { %v5097_v38 = vpack.i.bf16 %v2217_v37, %v2214_v29  ;;  %v2354_v37 = vsub.s32 3, %v5602_v59 }
 0xb49   : > { %v4854_v39 = vpop.f32.mrf.mxu1 }
 0xb4a   : > { %5098 = vrot.lane.b32.xlu0 %v5097_v38, %s6393_s27 }
 0xbac   : > { %v5089_v40 = vpop.permute.xlu0 %5088 }
 0xbad   : > { %v5091_v42 = vunpack.i.h.bf16 %v5089_v40  ;;  %v5090_v4 = vunpack.i.l.bf16 %v5089_v40 }
 0xbaf   : > { %v2246_v48 = vsel %vm926_vm6, %v1841_v15, %v5091_v42  ;;  %v2245_v49 = vsel %vm926_vm6, %v1838_v36, %v5090_v4  ;;  %v5151_v36 = vld [vmem:[%s6332_s17 + $0x18] sm:$0xff]  }
 0xbb4   : > { %v5094_v41 = vpop.permute.xlu1 %5093 }
 0xbb5   : > { %v5096_v43 = vunpack.i.h.bf16 %v5094_v41  ;;  %v5095_v44 = vunpack.i.l.bf16 %v5094_v41 }
 0xbb7   : > { %v2248_v52 = vsel %vm1462_vm12, %v2246_v48, %v5096_v43  ;;  %v2247_v53 = vsel %vm1462_vm12, %v2245_v49, %v5095_v44  ;;  %v2355_v43 = vrot.slane %v5762_v32, %v2354_v37 }
 0xbbc   : > { %v5099_v13 = vpop.permute.xlu0 %5098 }
 0xbbd   : > { %v5101_v50 = vunpack.i.h.bf16 %v5099_v13  ;;  %v5100_v51 = vunpack.i.l.bf16 %v5099_v13 }
 0xbbf   : > { %v2250_v54 = vsel %vm1465_vm13, %v2248_v52, %v5101_v50  ;;  %v2249_v55 = vsel %vm1465_vm13, %v2247_v53, %v5100_v51  ;;  %v5152_v50 = vld [vmem:[%s6332_s17 + $0x10] sm:$0xff]   ;;  %v5153_v51 = vld [vmem:[%s6332_s17 + $0x8] sm:$0xff]   ;;  %v5154_v52 = vld [vmem:[%s6332_s17] sm:$0xff]  }
 0xbc0   : > { %v2251_v56 = vpack.c.bf16 %v2250_v54, %v2249_v55  ;;  %v4478_v53 = vld [vmem:[%s6331_s16] ss:$0 sm:$0xff] }
 0xbc2   : > { %4860 = vmatmul.mubr.msk.bf16.vlgmr.msra.gmra.mxu0 %vm872_vm5, %v2251_v56 }
 0xbc3   : > { %4879 = vmatprep.mubr.msk.bf16.mxu0 %vm5347_vm2, %v5345_v1  ;;  %4872 = vmatpush3.bf16.msra.mxu0 %v5151_v36 }
 0xbc4   : > { %4873 = vmatprep.subr.bf16.mxu0 %v5345_v1 }
 0xbc7   : > { %4874 = vmatpush3.bf16.msra.mxu0 %v5152_v50 }
 0xbc8   : > { %4875 = vmatprep.subr.bf16.mxu0 %v5345_v1 }
 0xbcb   : > { %4876 = vmatpush3.bf16.msra.mxu0 %v5153_v51 }
 0xbcc   : > { %4877 = vmatprep.subr.bf16.mxu0 %v5345_v1 }
 0xbcf   : > { %4878 = vmatpush3.bf16.msra.mxu0 %v5154_v52 }
 0xbd0   : > { %4897 = vmatprep.subr.bf16.mxu0 %v5345_v1 }
 0xc82   : > { %v2307_v58 = vpop.f32.mrf.mxu0 }
 0xc83   : > { %v2308_v62 = vadd.f32 %v4474_v57, %v2307_v58 }
 0xc84   : > { %v4861_v61 = vpop.f32.mrf.mxu0 }
 0xc85   : > { %v2314_v0 = vadd.f32 %v2308_v62, %v5771_v45  ;;  %v5149_v45 = vld [vmem:[%s6330_s15 + $0x8] sm:$0xff]  }
 0xc86   : > { %v2310_v2 = vpop.f32.mrf.mxu0  ;;  %4864 = vmatpush3.bf16.msra.mxu1 %v5149_v45 }
 0xc87   : > { %v2311_v3 = vadd.f32 %v4474_v57, %v2310_v2  ;;  %v2316_v5 = vsel %vm872_vm5, %v2314_v0, 0.0  ;;  %v2324_v10 = vmul.f32 %v2314_v0, %v2314_v0  ;;  %4865 = vmatprep.subr.bf16.mxu1 %v5345_v1 }
 0xc88   : > { %2317 = vadd.xlane.f32.xlu1 %v2316_v5  ;;  %v4862_v7 = vpop.f32.mrf.mxu0 }
 0xc89   : > { %v2315_v8 = vadd.f32 %v2311_v3, %v5773_v47  ;;  %v2326_v12 = vsel %vm872_vm5, %v2324_v10, 0.0  ;;  %v5150_v47 = vld [vmem:[%s6330_s15] sm:$0xff]  }
 0xc8a   : > { %4866 = vmatpush3.bf16.msra.mxu1 %v5150_v47  ;;  %v4482_v3 = vld [vmem:[%s6333_s18] ss:$0 sm:$0xff] }
 0xc8b   : > { %v2319_v35 = vsel %vm1536_vm14, %v2315_v8, 0.0  ;;  %v2325_v9 = vmul.f32 %v2315_v8, %v2315_v8  ;;  %4883 = vmatprep.subr.bf16.mxu1 %v5345_v1 }
 0xc8c   : > { %2320 = vadd.xlane.f32.xlu0 %v2319_v35 }
 0xc8d   : > { %v2329_v11 = vsel %vm1536_vm14, %v2325_v9, 0.0 }
 0xc8e   : > { %2330 = vadd.xlane.f32.xlu1 %v2329_v11 }
 0xc90   : > { %2327 = vadd.xlane.f32.xlu0 %v2326_v12 }
 0xd11   : > { %v2318_v14 = vpop.xlane.xlu1 %2317 }
 0xd12   : > { %v2322_v16 = vmul.f32 0.03125, %v2318_v14 }
 0xd14   : > { %v2334_v22 = vmul.f32 %v2322_v16, %v2322_v16  ;;  %v2338_v39 = vsub.f32 %v2314_v0, %v2322_v16 }
 0xd15   : > { %v2321_v15 = vpop.xlane.xlu0 %2320 }
 0xd16   : > { %v2323_v17 = vmul.f32 0.03125, %v2321_v15 }
 0xd17   : > { %v2331_v18 = vpop.xlane.xlu1 %2330 }
 0xd18   : > { %v2335_v19 = vmul.f32 %v2323_v17, %v2323_v17  ;;  %v2333_v20 = vmul.f32 0.03125, %v2331_v18  ;;  %v2339_v29 = vsub.f32 %v2315_v8, %v2323_v17  ;;  %v5155_v17 = vld [vmem:[%s6383_s6 + $0x18] sm:$0xff]   ;;  %v5156_v18 = vld [vmem:[%s6383_s6 + $0x10] sm:$0xff]  }
 0xd19   : > { %v2328_v21 = vpop.xlane.xlu0 %2327 }
 0xd1a   : > { %v2337_v23 = vsub.f32 %v2333_v20, %v2335_v19  ;;  %v2332_v24 = vmul.f32 0.03125, %v2328_v21 }
 0xd1c   : > { %v2341_v25 = vadd.f32 1e-05, %v2337_v23  ;;  %v2336_v26 = vsub.f32 %v2332_v24, %v2334_v22 }
 0xd1e   : > { %5241 = vrsqrt.f32 %v2341_v25  ;;  %v2340_v27 = vadd.f32 1e-05, %v2336_v26 }
 0xd20   : > { %5243 = vrsqrt.f32 %v2340_v27 }
 0xd2b   : > { %v5242_v38 = vpop.eup %5241 }
 0xd2c   : > { %v2345_v40 = vmul.f32 %v5242_v38, %v2339_v29 }
 0xd2d   : > { %v5244_v41 = vpop.eup %5243 }
 0xd2e   : > { %v2344_v42 = vmul.f32 %v5244_v41, %v2338_v39  ;;  %v2351_v4 = vmul.f32 %v2349_v33, %v2345_v40  ;;  %v2547_v41 = vsub.s32 4, %v5602_v59 }
 0xd30   : > { %v2350_v44 = vmul.f32 %v2349_v33, %v2344_v42  ;;  %v2357_v48 = vadd.f32 %v2355_v43, %v2351_v4 }
 0xd32   : > { %v2356_v13 = vadd.f32 %v2355_v43, %v2350_v44  ;;  %v2548_v44 = vrot.slane %v5762_v32, %v2547_v41 }
 0xd34   : > { %v2358_v49 = vpack.c.bf16 %v2357_v48, %v2356_v13 }
 0xd36   : > { %4868 = vmatmul.mubr.msk.bf16.vlgmr.msra.gmra.mxu1 %vm872_vm5, %v2358_v49 }
 0xd37   : > { %4887 = vmatprep.mubr.msk.bf16.mxu1 %vm5347_vm2, %v5345_v1  ;;  %4884 = vmatpush3.bf16.msra.mxu1 %v5155_v17 }
 0xd38   : > { %4885 = vmatprep.subr.bf16.mxu1 %v5345_v1 }
 0xd3b   : > { %4886 = vmatpush3.bf16.msra.mxu1 %v5156_v18 }
 0xd3c   : > { %4891 = vmatprep.subr.bf16.mxu1 %v5345_v1 }
 0xdf6   : > { %v2419_v54 = vpop.f32.mrf.mxu1 }
 0xdf7   : > { %v2420_v56 = vadd.f32 %v4478_v53, %v2419_v54 }
 0xdf8   : > { %v4869_v55 = vpop.f32.mrf.mxu1 }
 0xdf9   : > { %v2426_v61 = vmax.f32 %v2420_v56, 0.0 }
 0xdfa   : > { %v2422_v57 = vpop.f32.mrf.mxu1 }
 0xdfb   : > { %v2423_v58 = vadd.f32 %v4478_v53, %v2422_v57 }
 0xdfc   : > { %v4870_v62 = vpop.f32.mrf.mxu1 }
 0xdfd   : > { %v2427_v0 = vmax.f32 %v2423_v58, 0.0  ;;  %v4494_v58 = vld [vmem:[%s6386_s7 + $0x1] ss:$0 sm:$0xff] }
 0xdff   : > { %v2428_v2 = vpack.c.bf16 %v2427_v0, %v2426_v61 }
 0xe01   : > { %4880 = vmatmul.mubr.msk.bf16.vlgmr.msra.gmra.mxu0 %vm2468_vm1, %v2428_v2 }
 0xe02   : > { %4899 = vmatprep.mubr.msk.bf16.mxu0 %vm5347_vm2, %v5345_v1 }
 0xec1   : > { %v2506_v5 = vpop.f32.mrf.mxu0 }
 0xec2   : > { %v2507_v7 = vadd.f32 %v4482_v3, %v2506_v5 }
 0xec3   : > { %v4881_v8 = vpop.f32.mrf.mxu0 }
 0xec4   : > { %v2513_v35 = vadd.f32 %v2507_v7, %v2356_v13  ;;  %v2553_v13 = vsub.s32 5, %v5602_v59 }
 0xec5   : > { %v2509_v9 = vpop.f32.mrf.mxu0 }
 0xec6   : > { %v2510_v10 = vadd.f32 %v4482_v3, %v2509_v9  ;;  %v2515_v11 = vsel %vm872_vm5, %v2513_v35, 0.0  ;;  %v2523_v12 = vmul.f32 %v2513_v35, %v2513_v35  ;;  %v2554_v52 = vrot.slane %v5762_v32, %v2553_v13 }
 0xec7   : > { %2516 = vadd.xlane.f32.xlu0 %v2515_v11  ;;  %v4882_v45 = vpop.f32.mrf.mxu0 }
 0xec8   : > { %v2514_v47 = vadd.f32 %v2510_v10, %v2357_v48  ;;  %v2525_v36 = vsel %vm872_vm5, %v2523_v12, 0.0 }
 0xeca   : > { %v2518_v14 = vsel %vm1536_vm14, %v2514_v47, 0.0  ;;  %v2524_v15 = vmul.f32 %v2514_v47, %v2514_v47 }
 0xecb   : > { %2526 = vadd.xlane.f32.xlu0 %v2525_v36  ;;  %2519 = vadd.xlane.f32.xlu1 %v2518_v14 }
 0xecc   : > { %v2528_v16 = vsel %vm1536_vm14, %v2524_v15, 0.0 }
 0xecf   : > { %2529 = vadd.xlane.f32.xlu1 %v2528_v16 }
 0xf50   : > { %v2517_v19 = vpop.xlane.xlu0 %2516 }
 0xf51   : > { %v2521_v20 = vmul.f32 0.03125, %v2517_v19 }
 0xf53   : > { %v2533_v23 = vmul.f32 %v2521_v20, %v2521_v20  ;;  %v2537_v42 = vsub.f32 %v2513_v35, %v2521_v20 }
 0xf54   : > { %v2527_v21 = vpop.xlane.xlu0 %2526  ;;  %v2520_v22 = vpop.xlane.xlu1 %2519 }
 0xf55   : > { %v2531_v24 = vmul.f32 0.03125, %v2527_v21  ;;  %v2522_v25 = vmul.f32 0.03125, %v2520_v22 }
 0xf57   : > { %v2535_v26 = vsub.f32 %v2531_v24, %v2533_v23  ;;  %v2534_v33 = vmul.f32 %v2522_v25, %v2522_v25  ;;  %v2538_v48 = vsub.f32 %v2514_v47, %v2522_v25 }
 0xf58   : > { %v2530_v27 = vpop.xlane.xlu1 %2529 }
 0xf59   : > { %v2539_v29 = vadd.f32 1e-05, %v2535_v26  ;;  %v2532_v38 = vmul.f32 0.03125, %v2530_v27 }
 0xf5b   : > { %5245 = vrsqrt.f32 %v2539_v29  ;;  %v2536_v39 = vsub.f32 %v2532_v38, %v2534_v33 }
 0xf5d   : > { %v2540_v40 = vadd.f32 1e-05, %v2536_v39 }
 0xf5f   : > { %5247 = vrsqrt.f32 %v2540_v40 }
 0xf68   : > { %v5246_v4 = vpop.eup %5245 }
 0xf69   : > { %v2543_v43 = vmul.f32 %v5246_v4, %v2537_v42 }
 0xf6b   : > { %v2549_v51 = vmul.f32 %v2548_v44, %v2543_v43 }
 0xf6c   : > { %v5248_v49 = vpop.eup %5247 }
 0xf6d   : > { %v2544_v50 = vmul.f32 %v5248_v49, %v2538_v48  ;;  %v5950_v54 = vadd.f32 %v2554_v52, %v2549_v51 }
 0xf6f   : > { %v2550_v53 = vmul.f32 %v2548_v44, %v2544_v50 }
 0xf71   : > { %v5952_v55 = vadd.f32 %v2554_v52, %v2550_v53 }
 0xf73   : > { %v2559_v56 = vpack.c.bf16 %v5952_v55, %v5950_v54 }
 0xf75   : > { %4888 = vmatmul.mubr.msk.bf16.vlgmr.msra.gmra.mxu1 %vm872_vm5, %v2559_v56 }
 0xf76   : > { %4893 = vmatprep.mubr.msk.bf16.mxu1 %vm5347_vm2, %v5345_v1 }
0x1035   : > { %v2622_v57 = vpop.f32.mrf.mxu1 }
0x1036   : > { %v2623_v61 = vadd.f32 %v4494_v58, %v2622_v57 }
0x1037   : > { %v4889_v62 = vpop.f32.mrf.mxu1 }
0x1039   : > { %v2625_v32 = vpop.f32.mrf.mxu1 }
0x103a   : > { %v2626_v0 = vadd.f32 %v4494_v58, %v2625_v32 }
0x103b   : > { %v4890_v2 = vpop.f32.mrf.mxu1 }
0x103c   : > { %v5962_v3 = vpack.c.bf16 %v2626_v0, %v2623_v61 }
0x103e   : > { %2765 = vrot.lane.b32.xlu1 %v5962_v3, %s6390_s25  ;;  %2638 = vrot.lane.b32.xlu0 %v5962_v3, %s6394_s4 }
0x1042   : > { %2763 = vrot.lane.b32.xlu1 %v5962_v3, %s6395_s24  ;;  %2892 = vrot.lane.b32.xlu0 %v5962_v3, %s6388_s5 }
0x1046   : > { %2890 = vrot.lane.b32.xlu1 %v5962_v3, %s6396_s26  ;;  %3019 = vrot.lane.b32.xlu0 %v5962_v3, %s6389_s22 }
0x104a   : > { %3017 = vrot.lane.b32.xlu1 %v5962_v3, %s6397_s1 }
0x10b0   : > { %v2639_v5 = vpop.permute.xlu0 %2638  ;;  %v2766_v8 = vpop.permute.xlu1 %2765 }
0x10b1   : > { %v2644_v7 = vsel %vm926_vm6, %v2639_v5, 0  ;;  %v2771_v35 = vsel %vm926_vm6, %v2766_v8, 0 }
0x10b2   : > { %4892 = vmatpush3.bf16.xpose.msra.mxu1 %v2644_v7 }
0x10b3   : > { %4903 = vmatprep.subr.bf16.mxu1 %v5345_v1 }
0x10b4   : > { %v2893_v9 = vpop.permute.xlu0 %2892  ;;  %v2764_v10 = vpop.permute.xlu1 %2763 }
0x10b5   : > { %v2898_v11 = vsel %vm926_vm6, %v2893_v9, 0 }
0x10b8   : > { %v3020_v12 = vpop.permute.xlu0 %3019  ;;  %v2891_v45 = vpop.permute.xlu1 %2890 }
0x10b9   : > { %4894 = vmatmul.mubr.msk.bf16.vlgmr.msra.gmra.mxu1 %vm926_vm6, %v5962_v3  ;;  %v3025_v47 = vsel %vm926_vm6, %v3020_v12, 0 }
0x10ba   : > { %4904 = vmatpush3.bf16.xpose.msra.mxu1 %v2771_v35  ;;  %4905 = vmatprep.mubr.msk.bf16.mxu1 %vm5347_vm2, %v5345_v1 }
0x10bb   : > { %4915 = vmatprep.subr.bf16.mxu1 %v5345_v1 }
0x10bc   : > { %v3018_v36 = vpop.permute.xlu1 %3017 }
0x10c1   : > { %4906 = vmatmul.mubr.msk.bf16.vlgmr.msra.gmra.mxu1 %vm926_vm6, %v2764_v10 }
0x10c2   : > { %4916 = vmatpush3.bf16.xpose.msra.mxu1 %v2898_v11  ;;  %4917 = vmatprep.mubr.msk.bf16.mxu1 %vm5347_vm2, %v5345_v1 }
0x10c3   : > { %4927 = vmatprep.subr.bf16.mxu1 %v5345_v1 }
0x10c9   : > { %4918 = vmatmul.mubr.msk.bf16.vlgmr.msra.gmra.mxu1 %vm926_vm6, %v2891_v45 }
0x10ca   : > { %4928 = vmatpush3.bf16.xpose.msra.mxu1 %v3025_v47  ;;  %4929 = vmatprep.mubr.msk.bf16.mxu1 %vm5347_vm2, %v5345_v1 }
0x10cb   : > { %4939 = vmatprep.subr.bf16.mxu1 %v5345_v1 }
0x10d1   : > { %4930 = vmatmul.mubr.msk.bf16.vlgmr.msra.gmra.mxu1 %vm926_vm6, %v3018_v36 }
0x10d2   : > { %4943 = vmatprep.mubr.msk.bf16.mxu1 %vm5347_vm2, %v5345_v1 }
0x1179   : > { %v2680_v14 = vpop.f32.mrf.mxu1 }
0x117a   : > { %v2687_v15 = vmul.f32 0.35355338, %v2680_v14 }
0x117b   : > { %v4895_v16 = vpop.f32.mrf.mxu1 }
0x117c   : > { %v2689_v17 = vadd.f32 %v2687_v15, %v5610_v63 }
0x117d   : > { %v2683_v18 = vpop.f32.mrf.mxu1 }
0x117e   : > { %v2688_v19 = vmul.f32 0.35355338, %v2683_v18  ;;  %v2691_v20 = vsel %vm978_vm9, %v2689_v17, -inf }
0x117f   : > { %2692 = vmax.xlane.f32.xlu0 %v2691_v20  ;;  %v4896_v21 = vpop.f32.mrf.mxu1 }
0x1180   : > { %v2690_v22 = vadd.f32 %v2688_v19, %v5615_v6 }
0x1181   : > { %v2807_v23 = vpop.f32.mrf.mxu1 }
0x1182   : > { %v2814_v24 = vmul.f32 0.35355338, %v2807_v23  ;;  %v2694_v25 = vsel %vm982_vm10, %v2690_v22, -inf }
0x1183   : > { %2695 = vmax.xlane.f32.xlu1 %v2694_v25  ;;  %v4907_v26 = vpop.f32.mrf.mxu1 }
0x1184   : > { %v2816_v27 = vadd.f32 %v2814_v24, %v5610_v63 }
0x1185   : > { %v2810_v29 = vpop.f32.mrf.mxu1 }
0x1186   : > { %v2815_v33 = vmul.f32 0.35355338, %v2810_v29  ;;  %v2818_v38 = vsel %vm978_vm9, %v2816_v27, -inf }
0x1187   : > { %2819 = vmax.xlane.f32.xlu0 %v2818_v38  ;;  %v4908_v39 = vpop.f32.mrf.mxu1 }
0x1188   : > { %v2817_v40 = vadd.f32 %v2815_v33, %v5615_v6 }
0x1189   : > { %v2934_v42 = vpop.f32.mrf.mxu1 }
0x118a   : > { %v2941_v4 = vmul.f32 0.35355338, %v2934_v42  ;;  %v2821_v43 = vsel %vm982_vm10, %v2817_v40, -inf }
0x118b   : > { %2822 = vmax.xlane.f32.xlu0 %v2821_v43  ;;  %v4919_v44 = vpop.f32.mrf.mxu1 }
0x118c   : > { %v2943_v48 = vadd.f32 %v2941_v4, %v5610_v63 }
0x118d   : > { %v2937_v49 = vpop.f32.mrf.mxu1 }
0x118e   : > { %v2942_v50 = vmul.f32 0.35355338, %v2937_v49  ;;  %v2945_v51 = vsel %vm978_vm9, %v2943_v48, -inf }
0x118f   : > { %2946 = vmax.xlane.f32.xlu1 %v2945_v51  ;;  %v4920_v52 = vpop.f32.mrf.mxu1 }
0x1190   : > { %v2944_v53 = vadd.f32 %v2942_v50, %v5615_v6 }
0x1191   : > { %v3061_v56 = vpop.f32.mrf.mxu1 }
0x1192   : > { %v3068_v57 = vmul.f32 0.35355338, %v3061_v56  ;;  %v2948_v58 = vsel %vm982_vm10, %v2944_v53, -inf }
0x1193   : > { %2949 = vmax.xlane.f32.xlu0 %v2948_v58  ;;  %v4931_v62 = vpop.f32.mrf.mxu1 }
0x1194   : > { %v3070_v32 = vadd.f32 %v3068_v57, %v5610_v63 }
0x1195   : > { %v3064_v61 = vpop.f32.mrf.mxu1 }
0x1196   : > { %v3069_v0 = vmul.f32 0.35355338, %v3064_v61  ;;  %v3072_v2 = vsel %vm978_vm9, %v3070_v32, -inf }
0x1197   : > { %3073 = vmax.xlane.f32.xlu1 %v3072_v2  ;;  %v4932_v5 = vpop.f32.mrf.mxu1 }
0x1198   : > { %v3071_v7 = vadd.f32 %v3069_v0, %v5615_v6 }
0x119a   : > { %v3075_v8 = vsel %vm982_vm10, %v3071_v7, -inf }
0x119b   : > { %3076 = vmax.xlane.f32.xlu0 %v3075_v8 }
0x11a8   : > { %2714 = vrot.lane.b32.xlu1 %v5962_v3, %s6398_s2  ;;  %s6401_s2 = smov 56  }
0x1208   : > { %v2693_v35 = vpop.xlane.xlu0 %2692 }
0x1209   : > { %v2697_v9 = vsub.f32 %v2689_v17, %v2693_v35 }
0x120b   : > { %v2699_v10 = vmul.f32 1.442695, %v2697_v9 }
0x120c   : > { %v2696_v11 = vpop.xlane.xlu1 %2695 }
0x120d   : > { %5249 = vpow2.f32 %v2699_v10  ;;  %v2698_v63 = vsub.f32 %v2690_v22, %v2696_v11 }
0x120f   : > { %v2701_v12 = vmul.f32 1.442695, %v2698_v63 }
0x1210   : > { %v2820_v45 = vpop.xlane.xlu0 %2819 }
0x1211   : > { %5251 = vpow2.f32 %v2701_v12  ;;  %v2824_v47 = vsub.f32 %v2816_v27, %v2820_v45 }
0x1213   : > { %v2826_v36 = vmul.f32 1.442695, %v2824_v47 }
0x1214   : > { %v2823_v14 = vpop.xlane.xlu0 %2822 }
0x1215   : > { %5253 = vpow2.f32 %v2826_v36  ;;  %v2825_v6 = vsub.f32 %v2817_v40, %v2823_v14 }
0x1217   : > { %v2828_v15 = vmul.f32 1.442695, %v2825_v6 }
0x1218   : > { %v2947_v16 = vpop.xlane.xlu1 %2946 }
0x1219   : > { %5255 = vpow2.f32 %v2828_v15  ;;  %v2951_v18 = vsub.f32 %v2943_v48, %v2947_v16 }
0x121a   : > { %v5250_v19 = vpop.eup %5249 }
0x121b   : > { %v2953_v20 = vmul.f32 1.442695, %v2951_v18  ;;  %v2703_v17 = vsel %vm978_vm9, %v5250_v19, 0.0 }
0x121c   : > { %v2950_v21 = vpop.xlane.xlu0 %2949  ;;  %2704 = vadd.xlane.f32.xlu1 %v2703_v17 }
0x121d   : > { %5257 = vpow2.f32 %v2953_v20  ;;  %v2952_v22 = vsub.f32 %v2944_v53, %v2950_v21 }
0x121e   : > { %v5252_v23 = vpop.eup %5251 }
0x121f   : > { %v2955_v24 = vmul.f32 1.442695, %v2952_v22  ;;  %v2706_v25 = vsel %vm982_vm10, %v5252_v23, 0.0 }
0x1220   : > { %v3074_v26 = vpop.xlane.xlu1 %3073  ;;  %2707 = vadd.xlane.f32.xlu0 %v2706_v25 }
0x1221   : > { %5259 = vpow2.f32 %v2955_v24  ;;  %v3078_v27 = vsub.f32 %v3070_v32, %v3074_v26 }
0x1222   : > { %v5254_v29 = vpop.eup %5253 }
0x1223   : > { %v3080_v33 = vmul.f32 1.442695, %v3078_v27  ;;  %v2830_v38 = vsel %vm978_vm9, %v5254_v29, 0.0 }
0x1224   : > { %2831 = vadd.xlane.f32.xlu1 %v2830_v38  ;;  %v2715_v39 = vpop.permute.xlu1 %2714  ;;  %v3077_v40 = vpop.xlane.xlu0 %3076 }
0x1225   : > { %5261 = vpow2.f32 %v3080_v33  ;;  %v2720_v42 = vand.u32 %v2715_v39, %v5671_v31  ;;  %v3079_v4 = vsub.f32 %v3071_v7, %v3077_v40 }
0x1226   : > { %v5256_v43 = vpop.eup %5255 }
0x1227   : > { %v3082_v44 = vmul.f32 1.442695, %v3079_v4  ;;  %4898 = vmatpush3.bf16.msra.mxu0 %v2720_v42  ;;  %v2833_v48 = vsel %vm982_vm10, %v5256_v43, 0.0 }
0x1228   : > { %2834 = vadd.xlane.f32.xlu0 %v2833_v48  ;;  %4909 = vmatprep.subr.bf16.mxu0 %v5345_v1 }
0x1229   : > { %5263 = vpow2.f32 %v3082_v44 }
0x122a   : > { %v5258_v49 = vpop.eup %5257 }
0x122b   : > { %v2957_v50 = vsel %vm978_vm9, %v5258_v49, 0.0 }
0x122c   : > { %2958 = vadd.xlane.f32.xlu1 %v2957_v50 }
0x122e   : > { %v5260_v51 = vpop.eup %5259 }
0x122f   : > { %v2960_v52 = vsel %vm982_vm10, %v5260_v51, 0.0 }
0x1230   : > { %2961 = vadd.xlane.f32.xlu0 %v2960_v52  ;;  %v5158_v52 = vld [vmem:[%s6327_s12 + $0x20] sm:$0xff]  }
0x1232   : > { %v5262_v53 = vpop.eup %5261 }
0x1233   : > { %v3084_v56 = vsel %vm978_vm9, %v5262_v53, 0.0 }
0x1234   : > { %3085 = vadd.xlane.f32.xlu1 %v3084_v56 }
0x1236   : > { %v5264_v57 = vpop.eup %5263 }
0x1237   : > { %v3087_v58 = vsel %vm982_vm10, %v5264_v57, 0.0 }
0x1238   : > { %3088 = vadd.xlane.f32.xlu0 %v3087_v58 }
0x1245   : > { %2968 = vrot.lane.b32.xlu1 %v5962_v3, %s6399_s3 }
0x1249   : > { %3095 = vrot.lane.b32.xlu1 %v5962_v3, %s6400_s0  ;;  %s676_s0 = scalar_lea.vmem %s6336_s21, %s5501_s23 }
0x124e   : > { %2841 = vrot.lane.b32.xlu0 %v5962_v3, %s6401_s2 }
0x12a5   : > { %v2705_v62 = vpop.xlane.xlu1 %2704 }
0x12a6   : > { %5265 = vrcp.f32 %v2705_v62 }
0x12a9   : > { %v2708_v32 = vpop.xlane.xlu0 %2707 }
0x12aa   : > { %5267 = vrcp.f32 %v2708_v32 }
0x12ad   : > { %v2832_v0 = vpop.xlane.xlu1 %2831 }
0x12b1   : > { %v2835_v61 = vpop.xlane.xlu0 %2834 }
0x12b2   : > { %5269 = vrcp.f32 %v2835_v61 }
0x12b3   : > { %v5266_v2 = vpop.eup %5265  ;;  %5271 = vrcp.f32 %v2832_v0 }
0x12b4   : > { %v2711_v7 = vmul.f32 %v5266_v2, %v5250_v19 }
0x12b5   : > { %v2959_v10 = vpop.xlane.xlu1 %2958 }
0x12b7   : > { %v5268_v5 = vpop.eup %5267 }
0x12b8   : > { %v2712_v8 = vmul.f32 %v5268_v5, %v5252_v23 }
0x12b9   : > { %v2962_v35 = vpop.xlane.xlu0 %2961 }
0x12ba   : > { %v2713_v9 = vpack.c.bf16 %v2712_v8, %v2711_v7  ;;  %5273 = vrcp.f32 %v2962_v35 }
0x12bb   : > { %5275 = vrcp.f32 %v2959_v10 }
0x12bc   : > { %4900 = vmatmul.mubr.msk.bf16.vlgmr.msra.gmra.mxu0 %vm978_vm9, %v2713_v9 }
0x12bd   : > { %4911 = vmatprep.mubr.msk.bf16.mxu0 %vm5347_vm2, %v5345_v1  ;;  %v3086_v3 = vpop.xlane.xlu1 %3085 }
0x12bf   : > { %v5270_v63 = vpop.eup %5269 }
0x12c0   : > { %v5272_v12 = vpop.eup %5271  ;;  %v2839_v47 = vmul.f32 %v5270_v63, %v5256_v43  ;;  %v5157_v43 = vld [vmem:[%s6327_s12 + $0x28] sm:$0xff]  }
0x12c1   : > { %v3089_v11 = vpop.xlane.xlu0 %3088  ;;  %v2969_v14 = vpop.permute.xlu1 %2968  ;;  %v2838_v6 = vmul.f32 %v5272_v12, %v5254_v29  ;;  %4940 = vmatpush3.bf16.msra.mxu1 %v5157_v43  ;;  %v5161_v43 = vld [vmem:[%s6323_s8 + $0x18] sm:$0xff]  }
0x12c2   : > { %5277 = vrcp.f32 %v3089_v11  ;;  %v2974_v18 = vand.u32 %v2969_v14, %v5671_v31  ;;  %4941 = vmatprep.subr.bf16.mxu1 %v5345_v1  ;;  %v5159_v14 = vld [vmem:[%s6387_s10 + $0x18] sm:$0xff]  }
0x12c3   : > { %5279 = vrcp.f32 %v3086_v3  ;;  %v2840_v15 = vpack.c.bf16 %v2839_v47, %v2838_v6 }
0x12c5   : > { %v2842_v45 = vpop.permute.xlu0 %2841  ;;  %v3096_v17 = vpop.permute.xlu1 %3095  ;;  %4942 = vmatpush3.bf16.msra.mxu1 %v5158_v52 }
0x12c6   : > { %v2847_v36 = vand.u32 %v2842_v45, %v5671_v31  ;;  %v3101_v24 = vand.u32 %v3096_v17, %v5671_v31  ;;  %4955 = vmatprep.subr.bf16.mxu1 %v5345_v1 }
0x12c7   : > { %v5274_v16 = vpop.eup %5273 }
0x12c8   : > { %4910 = vmatpush3.bf16.msra.mxu0 %v2847_v36  ;;  %v5276_v19 = vpop.eup %5275  ;;  %v2966_v20 = vmul.f32 %v5274_v16, %v5260_v51  ;;  %v4511_v16 = vld [vmem:[%s6328_s13 + $0x2] ss:$0 sm:$0xff] }
0x12c9   : > { %4921 = vmatprep.subr.bf16.mxu0 %v5345_v1  ;;  %v2965_v21 = vmul.f32 %v5276_v19, %v5258_v49 }
0x12cb   : > { %4912 = vmatmul.mubr.msk.bf16.vlgmr.msra.gmra.mxu0 %vm978_vm9, %v2840_v15  ;;  %v2967_v22 = vpack.c.bf16 %v2966_v20, %v2965_v21  ;;  %v5160_v15 = vld [vmem:[%s6387_s10 + $0x10] sm:$0xff]  }
0x12cc   : > { %4922 = vmatpush3.bf16.msra.mxu0 %v2974_v18  ;;  %4923 = vmatprep.mubr.msk.bf16.mxu0 %vm5347_vm2, %v5345_v1 }
0x12cd   : > { %4933 = vmatprep.subr.bf16.mxu0 %v5345_v1 }
0x12cf   : > { %v5278_v23 = vpop.eup %5277 }
0x12d0   : > { %v5280_v25 = vpop.eup %5279  ;;  %v3093_v26 = vmul.f32 %v5278_v23, %v5264_v57 }
0x12d1   : > { %v3092_v27 = vmul.f32 %v5280_v25, %v5262_v53 }
0x12d3   : > { %4924 = vmatmul.mubr.msk.bf16.vlgmr.msra.gmra.mxu0 %vm978_vm9, %v2967_v22  ;;  %v3094_v29 = vpack.c.bf16 %v3093_v26, %v3092_v27 }
0x12d4   : > { %4934 = vmatpush3.bf16.msra.mxu0 %v3101_v24  ;;  %4935 = vmatprep.mubr.msk.bf16.mxu0 %vm5347_vm2, %v5345_v1 }
0x12d5   : > { %4947 = vmatprep.subr.bf16.mxu0 %v5345_v1 }
0x12db   : > { %4936 = vmatmul.mubr.msk.bf16.vlgmr.msra.gmra.mxu0 %vm978_vm9, %v3094_v29 }
0x12dc   : > { %4951 = vmatprep.mubr.msk.bf16.mxu0 %vm5347_vm2, %v5345_v1  ;;  %4948 = vmatpush3.bf16.msra.mxu0 %v5161_v43 }
0x12dd   : > { %4949 = vmatprep.subr.bf16.mxu0 %v5345_v1 }
0x137c   : > { %v2756_v33 = vpop.f32.mrf.mxu0 }
0x137e   : > { %v4901_v38 = vpop.f32.mrf.mxu0 }
0x1380   : > { %v2759_v31 = vpop.f32.mrf.mxu0 }
0x1382   : > { %v4902_v39 = vpop.f32.mrf.mxu0 }
0x138b   : > { %v2883_v40 = vpop.f32.mrf.mxu0 }
0x138d   : > { %v4913_v42 = vpop.f32.mrf.mxu0 }
0x138f   : > { %v2886_v4 = vpop.f32.mrf.mxu0 }
0x1390   : > { %v5102_v44 = vpack.i.bf16 %v2886_v4, %v2883_v40  ;;  %v4529_v40 = vld [vmem:[%s6326_s11 + $0x1] ss:$0 sm:$0xff] }
0x1391   : > { %v4914_v48 = vpop.f32.mrf.mxu0 }
0x1392   : > { %5103 = vrot.lane.b32.xlu0 %v5102_v44, %s6391_s28  ;;  %v5162_v44 = vld [vmem:[%s6323_s8 + $0x10] sm:$0xff]  }
0x1393   : > { %v3010_v49 = vpop.f32.mrf.mxu0  ;;  %4950 = vmatpush3.bf16.msra.mxu0 %v5162_v44 }
0x1394   : > { %4963 = vmatprep.subr.bf16.mxu0 %v5345_v1 }
0x1395   : > { %v4925_v50 = vpop.f32.mrf.mxu0 }
0x1397   : > { %v3013_v51 = vpop.f32.mrf.mxu0 }
0x1398   : > { %v5107_v53 = vpack.i.bf16 %v3013_v51, %v3010_v49 }
0x1399   : > { %v4926_v56 = vpop.f32.mrf.mxu0 }
0x139a   : > { %5108 = vrot.lane.b32.xlu1 %v5107_v53, %s6392_s29 }
0x139b   : > { %v3137_v57 = vpop.f32.mrf.mxu0 }
0x139d   : > { %v4937_v58 = vpop.f32.mrf.mxu0 }
0x139f   : > { %v3140_v62 = vpop.f32.mrf.mxu0 }
0x13a0   : > { %v5112_v32 = vpack.i.bf16 %v3140_v62, %v3137_v57 }
0x13a1   : > { %v4938_v61 = vpop.f32.mrf.mxu0 }
0x13a2   : > { %5113 = vrot.lane.b32.xlu0 %v5112_v32, %s6393_s27 }
0x1404   : > { %v5104_v0 = vpop.permute.xlu0 %5103 }
0x1405   : > { %v5106_v5 = vunpack.i.h.bf16 %v5104_v0  ;;  %v5105_v7 = vunpack.i.l.bf16 %v5104_v0 }
0x1407   : > { %v3169_v10 = vsel %vm926_vm6, %v2759_v31, %v5106_v5  ;;  %v3168_v3 = vsel %vm926_vm6, %v2756_v33, %v5105_v7  ;;  %v6110_v5 = vld [vmem:[%s6329_s14 + $0x8] sm:$0x3f] }
0x140c   : > { %v5109_v2 = vpop.permute.xlu1 %5108 }
0x140d   : > { %v5111_v8 = vunpack.i.h.bf16 %v5109_v2  ;;  %v5110_v35 = vunpack.i.l.bf16 %v5109_v2 }
0x140f   : > { %v3171_v12 = vsel %vm1462_vm12, %v3169_v10, %v5111_v8  ;;  %v3170_v45 = vsel %vm1462_vm12, %v3168_v3, %v5110_v35  ;;  %v3272_v8 = vrot.slane %v6110_v5, %v1567_v30 }
0x1414   : > { %v5114_v9 = vpop.permute.xlu0 %5113 }
0x1415   : > { %v5116_v11 = vunpack.i.h.bf16 %v5114_v9  ;;  %v5115_v63 = vunpack.i.l.bf16 %v5114_v9 }
0x1417   : > { %v3173_v47 = vsel %vm1465_vm13, %v3171_v12, %v5116_v11  ;;  %v3172_v36 = vsel %vm1465_vm13, %v3170_v45, %v5115_v63  ;;  %v3278_v12 = vrot.slane %v6110_v5, %v1573_v46 }
0x1418   : > { %v3174_v6 = vpack.c.bf16 %v3173_v47, %v3172_v36 }
0x141a   : > { %4944 = vmatmul.mubr.msk.bf16.vlgmr.msra.gmra.mxu1 %vm872_vm5, %v3174_v6  ;;  %v4520_v6 = vld [vmem:[%s6324_s9 + $0x1] ss:$0 sm:$0xff] }
0x141b   : > { %4956 = vmatpush3.bf16.msra.mxu1 %v5159_v14  ;;  %4959 = vmatprep.mubr.msk.bf16.mxu1 %vm5347_vm2, %v5345_v1 }
0x141c   : > { %4957 = vmatprep.subr.bf16.mxu1 %v5345_v1 }
0x141f   : > { %4958 = vmatpush3.bf16.msra.mxu1 %v5160_v15 }
0x1420   : > { %4969 = vmatprep.subr.bf16.mxu1 %v5345_v1 }
0x1422   : > { %4960 = vmatmul.mubr.msk.bf16.vlgmr.msra.gmra.mxu1 %vm872_vm5, %v5551_v34 }
0x1423   : > { %4971 = vmatprep.mubr.msk.bf16.mxu1 %vm5347_vm2, %v5345_v1 }
0x14da   : > { %v3230_v18 = vpop.f32.mrf.mxu1 }
0x14db   : > { %v3231_v19 = vadd.f32 %v4511_v16, %v3230_v18 }
0x14dc   : > { %v4945_v20 = vpop.f32.mrf.mxu1 }
0x14dd   : > { %v3237_v17 = vadd.f32 %v3231_v19, %v5950_v54 }
0x14de   : > { %v3233_v21 = vpop.f32.mrf.mxu1 }
0x14df   : > { %v3234_v22 = vadd.f32 %v4511_v16, %v3233_v21  ;;  %v3239_v23 = vsel %vm872_vm5, %v3237_v17, 0.0  ;;  %v3247_v29 = vmul.f32 %v3237_v17, %v3237_v17 }
0x14e0   : > { %3240 = vadd.xlane.f32.xlu1 %v3239_v23  ;;  %v4946_v24 = vpop.f32.mrf.mxu1 }
0x14e1   : > { %v3238_v34 = vadd.f32 %v3234_v22, %v5952_v55  ;;  %v3249_v54 = vsel %vm872_vm5, %v3247_v29, 0.0 }
0x14e2   : > { %v3411_v25 = vpop.f32.mrf.mxu1 }
0x14e3   : > { %v3242_v26 = vsel %vm1536_vm14, %v3238_v34, 0.0  ;;  %v3248_v27 = vmul.f32 %v3238_v34, %v3238_v34  ;;  %v3412_v42 = vadd.f32 %v4529_v40, %v3411_v25 }
0x14e4   : > { %3243 = vadd.xlane.f32.xlu0 %v3242_v26  ;;  %v4961_v33 = vpop.f32.mrf.mxu1 }
0x14e5   : > { %v3252_v38 = vsel %vm1536_vm14, %v3248_v27, 0.0 }
0x14e6   : > { %3253 = vadd.xlane.f32.xlu1 %v3252_v38  ;;  %v3414_v31 = vpop.f32.mrf.mxu1 }
0x14e7   : > { %v3415_v55 = vadd.f32 %v4529_v40, %v3414_v31 }
0x14e8   : > { %3250 = vadd.xlane.f32.xlu0 %v3249_v54  ;;  %v4962_v39 = vpop.f32.mrf.mxu1 }
0x14e9   : > { %v6095_v4 = vpack.c.bf16 %v3415_v55, %v3412_v42 }
0x14eb   : > { %v3430_v30 = vsel %vm926_vm6, %v6095_v4, 0 }
0x14fe   : > { %3551 = vrot.lane.b32.xlu0 %v6095_v4, %s6395_s24 }
0x1569   : > { %v3241_v48 = vpop.xlane.xlu1 %3240 }
0x156a   : > { %v3245_v50 = vmul.f32 0.03125, %v3241_v48 }
0x156c   : > { %v3257_v58 = vmul.f32 %v3245_v50, %v3245_v50  ;;  %v3261_v9 = vsub.f32 %v3237_v17, %v3245_v50 }
0x156d   : > { %v3244_v49 = vpop.xlane.xlu0 %3243 }
0x156e   : > { %v3246_v51 = vmul.f32 0.03125, %v3244_v49 }
0x156f   : > { %v3254_v52 = vpop.xlane.xlu1 %3253 }
0x1570   : > { %v3258_v53 = vmul.f32 %v3246_v51, %v3246_v51  ;;  %v3256_v56 = vmul.f32 0.03125, %v3254_v52  ;;  %v3262_v7 = vsub.f32 %v3238_v34, %v3246_v51 }
0x1571   : > { %v3251_v57 = vpop.xlane.xlu0 %3250 }
0x1572   : > { %v3260_v62 = vsub.f32 %v3256_v56, %v3258_v53  ;;  %v3255_v32 = vmul.f32 0.03125, %v3251_v57 }
0x1574   : > { %v3264_v61 = vadd.f32 1e-05, %v3260_v62  ;;  %v3259_v0 = vsub.f32 %v3255_v32, %v3257_v58 }
0x1575   : > { %v3552_v17 = vpop.permute.xlu0 %3551 }
0x1576   : > { %5281 = vrsqrt.f32 %v3264_v61  ;;  %v3263_v2 = vadd.f32 1e-05, %v3259_v0  ;;  %v3557_v22 = vsel %vm926_vm6, %v3552_v17, 0 }
0x1578   : > { %5283 = vrsqrt.f32 %v3263_v2 }
0x1583   : > { %v5282_v35 = vpop.eup %5281 }
0x1584   : > { %v3268_v10 = vmul.f32 %v5282_v35, %v3262_v7 }
0x1585   : > { %v5284_v3 = vpop.eup %5283 }
0x1586   : > { %v3267_v11 = vmul.f32 %v5284_v3, %v3261_v9  ;;  %v3274_v63 = vmul.f32 %v3272_v8, %v3268_v10 }
0x1588   : > { %v3273_v45 = vmul.f32 %v3272_v8, %v3267_v11  ;;  %v6120_v36 = vadd.f32 %v3278_v12, %v3274_v63 }
0x158a   : > { %v6118_v47 = vadd.f32 %v3278_v12, %v3273_v45 }
0x158c   : > { %v3281_v14 = vpack.c.bf16 %v6120_v36, %v6118_v47 }
0x158e   : > { %4952 = vmatmul.mubr.msk.bf16.vlgmr.msra.gmra.mxu0 %vm872_vm5, %v3281_v14 }
0x158f   : > { %4964 = vmatpush3.bf16.xpose.msra.mxu0 %v3430_v30  ;;  %4965 = vmatprep.mubr.msk.bf16.mxu0 %vm5347_vm2, %v5345_v1 }
0x1590   : > { %4975 = vmatprep.subr.bf16.mxu0 %v5345_v1 }
0x164e   : > { %v3344_v46 = vpop.f32.mrf.mxu0 }
0x164f   : > { %v3345_v18 = vadd.f32 %v4520_v6, %v3344_v46 }
0x1650   : > { %v4953_v15 = vpop.f32.mrf.mxu0 }
0x1652   : > { %v3347_v16 = vpop.f32.mrf.mxu0 }
0x1653   : > { %v3348_v19 = vadd.f32 %v4520_v6, %v3347_v16 }
0x1654   : > { %v4954_v20 = vpop.f32.mrf.mxu0 }
0x1655   : > { %v3351_v21 = vpack.c.bf16 %v3348_v19, %v3345_v18 }
0x1657   : > { %3674 = vrot.lane.b32.xlu0 %v3351_v21, %s6396_s26  ;;  %3549 = vrot.lane.b32.xlu1 %v3351_v21, %s6395_s24 }
0x1658   : > { %4966 = vmatmul.mubr.msk.bf16.vlgmr.msra.gmra.mxu0 %vm926_vm6, %v3351_v21 }
0x1659   : > { %4976 = vmatpush3.bf16.xpose.msra.mxu0 %v3557_v22  ;;  %4977 = vmatprep.mubr.msk.bf16.mxu0 %vm5347_vm2, %v5345_v1 }
0x165a   : > { %4987 = vmatprep.subr.bf16.mxu0 %v5345_v1 }
0x165b   : > { %3799 = vrot.lane.b32.xlu0 %v3351_v21, %s6397_s1  ;;  %3676 = vrot.lane.b32.xlu1 %v6095_v4, %s6396_s26 }
0x165f   : > { %3801 = vrot.lane.b32.xlu1 %v6095_v4, %s6397_s1 }
0x16c9   : > { %v3550_v23 = vpop.permute.xlu1 %3549  ;;  %v3675_v26 = vpop.permute.xlu0 %3674 }
0x16ca   : > { %4978 = vmatmul.mubr.msk.bf16.vlgmr.msra.gmra.mxu0 %vm926_vm6, %v3550_v23 }
0x16cb   : > { %4989 = vmatprep.mubr.msk.bf16.mxu0 %vm5347_vm2, %v5345_v1 }
0x16cd   : > { %v3677_v24 = vpop.permute.xlu1 %3676  ;;  %v3800_v29 = vpop.permute.xlu0 %3799 }
0x16ce   : > { %v3682_v34 = vsel %vm926_vm6, %v3677_v24, 0 }
0x16cf   : > { %4988 = vmatpush3.bf16.xpose.msra.mxu0 %v3682_v34 }
0x16d0   : > { %4999 = vmatprep.subr.bf16.mxu0 %v5345_v1 }
0x16d1   : > { %v3802_v25 = vpop.permute.xlu1 %3801 }
0x16d2   : > { %v3807_v27 = vsel %vm926_vm6, %v3802_v25, 0 }
0x16d6   : > { %4990 = vmatmul.mubr.msk.bf16.vlgmr.msra.gmra.mxu0 %vm926_vm6, %v3675_v26 }
0x16d7   : > { %5000 = vmatpush3.bf16.xpose.msra.mxu0 %v3807_v27  ;;  %5001 = vmatprep.mubr.msk.bf16.mxu0 %vm5347_vm2, %v5345_v1 }
0x16d8   : > { %5011 = vmatprep.subr.bf16.mxu0 %v5345_v1 }
0x16de   : > { %5002 = vmatmul.mubr.msk.bf16.vlgmr.msra.gmra.mxu0 %vm926_vm6, %v3800_v29 }
0x16df   : > { %5015 = vmatprep.mubr.msk.bf16.mxu0 %vm5347_vm2, %v5345_v1 }
0x1718   : > { %v3466_v33 = vpop.f32.mrf.mxu0 }
0x1719   : > { %v3473_v38 = vmul.f32 0.35355338, %v3466_v33 }
0x171a   : > { %v4967_v31 = vpop.f32.mrf.mxu0 }
0x171b   : > { %v3475_v54 = vsel %vm1770_vm15, %v3473_v38, -inf }
0x171c   : > { %3476 = vmax.xlane.f32.xlu1 %v3475_v54  ;;  %v3469_v39 = vpop.f32.mrf.mxu0 }
0x171d   : > { %v3474_v40 = vmul.f32 0.35355338, %v3469_v39 }
0x171e   : > { %v4968_v55 = vpop.f32.mrf.mxu0 }
0x171f   : > { %v3478_v42 = vsel %vm1774_vm0, %v3474_v40, -inf }
0x1720   : > { %3479 = vmax.xlane.f32.xlu0 %v3478_v42 }
0x178a   : > { %v3593_v43 = vpop.f32.mrf.mxu0 }
0x178b   : > { %v3600_v44 = vmul.f32 0.35355338, %v3593_v43 }
0x178c   : > { %v4979_v48 = vpop.f32.mrf.mxu0 }
0x178d   : > { %v3602_v49 = vsel %vm1770_vm15, %v3600_v44, -inf }
0x178e   : > { %3603 = vmax.xlane.f32.xlu0 %v3602_v49  ;;  %v3596_v50 = vpop.f32.mrf.mxu0 }
0x178f   : > { %v3601_v51 = vmul.f32 0.35355338, %v3596_v50 }
0x1790   : > { %v4980_v52 = vpop.f32.mrf.mxu0 }
0x1791   : > { %v3605_v53 = vsel %vm1774_vm0, %v3601_v51, -inf }
0x1792   : > { %3606 = vmax.xlane.f32.xlu1 %v3605_v53 }
0x1796   : > { %v3718_v56 = vpop.f32.mrf.mxu0 }
0x1797   : > { %v6162_v57 = vmul.f32 0.35355338, %v3718_v56 }
0x1798   : > { %v4991_v58 = vpop.f32.mrf.mxu0 }
0x1799   : > { %v3727_v62 = vsel %vm1770_vm15, %v6162_v57, -inf }
0x179a   : > { %3728 = vmax.xlane.f32.xlu0 %v3727_v62  ;;  %v3721_v32 = vpop.f32.mrf.mxu0 }
0x179b   : > { %v3726_v61 = vmul.f32 0.35355338, %v3721_v32 }
0x179c   : > { %v4992_v0 = vpop.f32.mrf.mxu0 }
0x179d   : > { %v3730_v2 = vsel %vm1774_vm0, %v3726_v61, -inf }
0x179e   : > { %3731 = vmax.xlane.f32.xlu1 %v3730_v2  ;;  %v3843_v7 = vpop.f32.mrf.mxu0 }
0x179f   : > { %v3850_v8 = vmul.f32 0.35355338, %v3843_v7 }
0x17a0   : > { %v5003_v35 = vpop.f32.mrf.mxu0 }
0x17a1   : > { %v3852_v9 = vsel %vm1770_vm15, %v3850_v8, -inf }
0x17a2   : > { %3853 = vmax.xlane.f32.xlu0 %v3852_v9  ;;  %v3846_v10 = vpop.f32.mrf.mxu0 }
0x17a3   : > { %v3851_v3 = vmul.f32 0.35355338, %v3846_v10 }
0x17a4   : > { %v5004_v11 = vpop.f32.mrf.mxu0 }
0x17a5   : > { %v3477_v63 = vpop.xlane.xlu1 %3476  ;;  %v3855_v12 = vsel %vm1774_vm0, %v3851_v3, -inf }
0x17a6   : > { %v3481_v45 = vsub.f32 %v3473_v38, %v3477_v63  ;;  %3856 = vmax.xlane.f32.xlu1 %v3855_v12 }
0x17a8   : > { %v3483_v14 = vmul.f32 1.442695, %v3481_v45 }
0x17a9   : > { %v3480_v30 = vpop.xlane.xlu0 %3479 }
0x17aa   : > { %5285 = vpow2.f32 %v3483_v14  ;;  %v3482_v46 = vsub.f32 %v3474_v40, %v3480_v30 }
0x17ac   : > { %v3485_v6 = vmul.f32 1.442695, %v3482_v46 }
0x17ae   : > { %5287 = vpow2.f32 %v3485_v6 }
0x17b7   : > { %v6169_v15 = vpop.eup %5285 }
0x17b8   : > { %v3487_v16 = vsel %vm1770_vm15, %v6169_v15, 0.0 }
0x17b9   : > { %3488 = vadd.xlane.f32.xlu0 %v3487_v16 }
0x17bb   : > { %v5288_v18 = vpop.eup %5287 }
0x17bc   : > { %v3490_v19 = vsel %vm1774_vm0, %v5288_v18, 0.0 }
0x17bd   : > { %3491 = vadd.xlane.f32.xlu1 %v3490_v19 }
0x17ce   : > { %3625 = vrot.lane.b32.xlu1 %v6095_v4, %s6390_s25 }
0x1817   : > { %v3604_v20 = vpop.xlane.xlu0 %3603 }
0x1818   : > { %v3608_v17 = vsub.f32 %v3600_v44, %v3604_v20 }
0x181a   : > { %v3610_v21 = vmul.f32 1.442695, %v3608_v17 }
0x181b   : > { %v3607_v22 = vpop.xlane.xlu1 %3606 }
0x181c   : > { %5289 = vpow2.f32 %v3610_v21  ;;  %v3609_v23 = vsub.f32 %v3601_v51, %v3607_v22 }
0x181e   : > { %v3612_v24 = vmul.f32 1.442695, %v3609_v23 }
0x1820   : > { %5291 = vpow2.f32 %v3612_v24 }
0x1823   : > { %v3729_v44 = vpop.xlane.xlu0 %3728 }
0x1824   : > { %v3733_v48 = vsub.f32 %v6162_v57, %v3729_v44 }
0x1826   : > { %v3735_v50 = vmul.f32 1.442695, %v3733_v48 }
0x1827   : > { %v3732_v34 = vpop.xlane.xlu1 %3731 }
0x1828   : > { %v3734_v25 = vsub.f32 %v3726_v61, %v3732_v34 }
0x1829   : > { %v5290_v26 = vpop.eup %5289 }
0x182a   : > { %v3737_v27 = vmul.f32 1.442695, %v3734_v25  ;;  %v3614_v29 = vsel %vm1770_vm15, %v5290_v26, 0.0 }
0x182b   : > { %3615 = vadd.xlane.f32.xlu0 %v3614_v29  ;;  %v3854_v49 = vpop.xlane.xlu0 %3853 }
0x182c   : > { %5293 = vpow2.f32 %v3737_v27  ;;  %v3858_v51 = vsub.f32 %v3850_v8, %v3854_v49 }
0x182d   : > { %v5292_v33 = vpop.eup %5291 }
0x182e   : > { %v3617_v38 = vsel %vm1774_vm0, %v5292_v33, 0.0  ;;  %v3860_v52 = vmul.f32 1.442695, %v3858_v51 }
0x182f   : > { %3618 = vadd.xlane.f32.xlu1 %v3617_v38  ;;  %v3857_v31 = vpop.xlane.xlu1 %3856 }
0x1830   : > { %v3859_v54 = vsub.f32 %v3851_v3, %v3857_v31 }
0x1832   : > { %v3862_v39 = vmul.f32 1.442695, %v3859_v54 }
0x1834   : > { %5295 = vpow2.f32 %v3862_v39 }
0x1835   : > { %5297 = vpow2.f32 %v3735_v50 }
0x1836   : > { %5299 = vpow2.f32 %v3860_v52  ;;  %v5164_v52 = vld [vmem:[%s6327_s12 + $0x30] sm:$0xff]  }
0x1839   : > { %v6178_v40 = vpop.eup %5293 }
0x183a   : > { %v3742_v55 = vsel %vm1774_vm0, %v6178_v40, 0.0 }
0x183b   : > { %3743 = vadd.xlane.f32.xlu1 %v3742_v55 }
0x1841   : > { %v6182_v42 = vpop.eup %5295  ;;  %3499 = vrot.lane.b32.xlu0 %v6095_v4, %s6394_s4 }
0x1842   : > { %v3867_v43 = vsel %vm1774_vm0, %v6182_v42, 0.0  ;;  %v5298_v53 = vpop.eup %5297  ;;  %v3489_v32 = vpop.xlane.xlu0 %3488 }
0x1843   : > { %3868 = vadd.xlane.f32.xlu1 %v3867_v43  ;;  %v3739_v56 = vsel %vm1770_vm15, %v5298_v53, 0.0  ;;  %v5300_v58 = vpop.eup %5299 }
0x1844   : > { %v3864_v62 = vsel %vm1770_vm15, %v5300_v58, 0.0 }
0x1846   : > { %v3492_v57 = vpop.xlane.xlu1 %3491 }
0x1847   : > { %5301 = vrcp.f32 %v3492_v57 }
0x1848   : > { %5303 = vrcp.f32 %v3489_v32 }
0x184a   : > { %v3626_v0 = vpop.permute.xlu1 %3625 }
0x1854   : > { %3750 = vrot.lane.b32.xlu1 %v6095_v4, %s6388_s5  ;;  %v5302_v61 = vpop.eup %5301 }
0x1855   : > { %v5304_v7 = vpop.eup %5303  ;;  %v3496_v8 = vmul.f32 %v5302_v61, %v5288_v18 }
0x1856   : > { %v3495_v3 = vmul.f32 %v5304_v7, %v6169_v15 }
0x1858   : > { %v3497_v11 = vpack.c.bf16 %v3496_v8, %v3495_v3 }
0x1860   : > { %3740 = vadd.xlane.f32.xlu0 %v3739_v56 }
0x1864   : > { %3865 = vadd.xlane.f32.xlu0 %v3864_v62 }
0x187a   : > { %3875 = vrot.lane.b32.xlu0 %v6095_v4, %s6389_s22  ;;  %v3631_v4 = vsel %vm1008_vm11, %v3626_v0, 0 }
0x18b4   : > { %v3616_v2 = vpop.xlane.xlu0 %3615 }
0x18b5   : > { %5305 = vrcp.f32 %v3616_v2 }
0x18b8   : > { %v3500_v35 = vpop.permute.xlu0 %3499  ;;  %v3619_v9 = vpop.xlane.xlu1 %3618 }
0x18b9   : > { %v3505_v10 = vsel %vm1008_vm11, %v3500_v35, 0  ;;  %5307 = vrcp.f32 %v3619_v9 }
0x18ba   : > { %4970 = vmatpush3.bf16.msra.mxu1 %v3505_v10 }
0x18bb   : > { %4981 = vmatprep.subr.bf16.mxu1 %v5345_v1 }
0x18bd   : > { %4972 = vmatmul.mubr.msk.bf16.vlgmr.msra.gmra.mxu1 %vm1770_vm15, %v3497_v11 }
0x18be   : > { %4982 = vmatpush3.bf16.msra.mxu1 %v3631_v4  ;;  %4983 = vmatprep.mubr.msk.bf16.mxu1 %vm5347_vm2, %v5345_v1 }
0x18bf   : > { %4993 = vmatprep.subr.bf16.mxu1 %v5345_v1 }
0x18c2   : > { %v5306_v63 = vpop.eup %5305 }
0x18c3   : > { %v3622_v45 = vmul.f32 %v5306_v63, %v5290_v26 }
0x18c4   : > { %v3744_v30 = vpop.xlane.xlu1 %3743 }
0x18c5   : > { %5309 = vrcp.f32 %v3744_v30 }
0x18c6   : > { %v5308_v12 = vpop.eup %5307 }
0x18c7   : > { %v3623_v14 = vmul.f32 %v5308_v12, %v5292_v33 }
0x18c9   : > { %v3624_v46 = vpack.c.bf16 %v3623_v14, %v3622_v45 }
0x18cb   : > { %4984 = vmatmul.mubr.msk.bf16.vlgmr.msra.gmra.mxu1 %vm1770_vm15, %v3624_v46 }
0x18cc   : > { %v3869_v6 = vpop.xlane.xlu1 %3868  ;;  %4995 = vmatprep.mubr.msk.bf16.mxu1 %vm5347_vm2, %v5345_v1 }
0x18d0   : > { %v3751_v15 = vpop.permute.xlu1 %3750 }
0x18d1   : > { %v3756_v16 = vsel %vm1008_vm11, %v3751_v15, 0 }
0x18d2   : > { %4994 = vmatpush3.bf16.msra.mxu1 %v3756_v16  ;;  %v5310_v20 = vpop.eup %5309 }
0x18d3   : > { %5005 = vmatprep.subr.bf16.mxu1 %v5345_v1  ;;  %v3748_v22 = vmul.f32 %v5310_v20, %v6178_v40 }
0x18e9   : > { %v3741_v18 = vpop.xlane.xlu0 %3740 }
0x18ea   : > { %5311 = vrcp.f32 %v3741_v18 }
0x18ed   : > { %v3866_v19 = vpop.xlane.xlu0 %3865 }
0x18ee   : > { %5313 = vrcp.f32 %v3866_v19 }
0x18ef   : > { %5315 = vrcp.f32 %v3869_v6  ;;  %v4546_v6 = vld [vmem:[%s6328_s13 + $0x3] ss:$0 sm:$0xff] }
0x18f1   : > { %v3876_v23 = vpop.permute.xlu0 %3875 }
0x18f2   : > { %v3881_v25 = vsel %vm1008_vm11, %v3876_v23, 0 }
0x18f7   : > { %v5312_v17 = vpop.eup %5311 }
0x18f8   : > { %v3747_v21 = vmul.f32 %v5312_v17, %v5298_v53 }
0x18fa   : > { %v3749_v24 = vpack.c.bf16 %v3748_v22, %v3747_v21 }
0x18fb   : > { %v5314_v34 = vpop.eup %5313 }
0x18fc   : > { %4996 = vmatmul.mubr.msk.bf16.vlgmr.msra.gmra.mxu1 %vm1770_vm15, %v3749_v24  ;;  %v5316_v26 = vpop.eup %5315  ;;  %v3872_v27 = vmul.f32 %v5314_v34, %v5300_v58 }
0x18fd   : > { %5006 = vmatpush3.bf16.msra.mxu1 %v3881_v25  ;;  %5007 = vmatprep.mubr.msk.bf16.mxu1 %vm5347_vm2, %v5345_v1  ;;  %v3873_v29 = vmul.f32 %v5316_v26, %v6182_v42  ;;  %v5163_v42 = vld [vmem:[%s6327_s12 + $0x38] sm:$0xff]  }
0x18fe   : > { %5019 = vmatprep.subr.bf16.mxu1 %v5345_v1  ;;  %5012 = vmatpush3.bf16.msra.mxu0 %v5163_v42 }
0x18ff   : > { %v3874_v33 = vpack.c.bf16 %v3873_v29, %v3872_v27  ;;  %5013 = vmatprep.subr.bf16.mxu0 %v5345_v1  ;;  %v5166_v29 = vld [vmem:[%s6330_s15 + $0x10] sm:$0xff]  }
0x1902   : > { %5014 = vmatpush3.bf16.msra.mxu0 %v5164_v52 }
0x1903   : > { %5027 = vmatprep.subr.bf16.mxu0 %v5345_v1 }
0x1904   : > { %5008 = vmatmul.mubr.msk.bf16.vlgmr.msra.gmra.mxu1 %vm1770_vm15, %v3874_v33 }
0x1905   : > { %5023 = vmatprep.mubr.msk.bf16.mxu1 %vm5347_vm2, %v5345_v1 }
0x197d   : > { %v3541_v38 = vpop.f32.mrf.mxu1 }
0x197f   : > { %v4973_v31 = vpop.f32.mrf.mxu1 }
0x1981   : > { %v3544_v54 = vpop.f32.mrf.mxu1 }
0x1983   : > { %v4974_v39 = vpop.f32.mrf.mxu1 }
0x198b   : > { %v3667_v40 = vpop.f32.mrf.mxu1 }
0x198d   : > { %v4985_v55 = vpop.f32.mrf.mxu1 }
0x198f   : > { %v3670_v43 = vpop.f32.mrf.mxu1 }
0x1990   : > { %v5117_v44 = vpack.i.bf16 %v3670_v43, %v3667_v40 }
0x1991   : > { %v4986_v48 = vpop.f32.mrf.mxu1 }
0x1992   : > { %5118 = vrot.lane.b32.xlu1 %v5117_v44, %s6391_s28 }
0x19bc   : > { %v3792_v49 = vpop.f32.mrf.mxu1 }
0x19be   : > { %v4997_v50 = vpop.f32.mrf.mxu1 }
0x19c0   : > { %v3795_v51 = vpop.f32.mrf.mxu1 }
0x19c1   : > { %v5122_v53 = vpack.i.bf16 %v3795_v51, %v3792_v49 }
0x19c2   : > { %v4998_v56 = vpop.f32.mrf.mxu1 }
0x19c3   : > { %5123 = vrot.lane.b32.xlu0 %v5122_v53, %s6392_s29 }
0x19c4   : > { %v3917_v58 = vpop.f32.mrf.mxu1 }
0x19c6   : > { %v5009_v62 = vpop.f32.mrf.mxu1 }
0x19c8   : > { %v3920_v57 = vpop.f32.mrf.mxu1 }
0x19c9   : > { %v5127_v32 = vpack.i.bf16 %v3920_v57, %v3917_v58  ;;  %v4052_v58 = vrot.slane %v6110_v5, %v2348_v28  ;;  %v5168_v28 = vld [vmem:[%s6332_s17 + $0x30] sm:$0xff]  }
0x19ca   : > { %v5010_v61 = vpop.f32.mrf.mxu1 }
0x19cb   : > { %5128 = vrot.lane.b32.xlu1 %v5127_v32, %s6393_s27 }
0x1a04   : > { %v5119_v0 = vpop.permute.xlu1 %5118 }
0x1a05   : > { %v5121_v7 = vunpack.i.h.bf16 %v5119_v0  ;;  %v5120_v8 = vunpack.i.l.bf16 %v5119_v0  ;;  %v4058_v0 = vrot.slane %v6110_v5, %v2354_v37  ;;  %v5169_v37 = vld [vmem:[%s6332_s17 + $0x28] sm:$0xff]  }
0x1a07   : > { %v3949_v3 = vsel %vm926_vm6, %v3544_v54, %v5121_v7  ;;  %v3948_v11 = vsel %vm926_vm6, %v3541_v38, %v5120_v8 }
0x1a35   : > { %v5124_v2 = vpop.permute.xlu0 %5123 }
0x1a36   : > { %v5126_v35 = vunpack.i.h.bf16 %v5124_v2  ;;  %v5125_v9 = vunpack.i.l.bf16 %v5124_v2 }
0x1a38   : > { %v3950_v12 = vsel %vm1462_vm12, %v3948_v11, %v5125_v9  ;;  %v3951_v45 = vsel %vm1462_vm12, %v3949_v3, %v5126_v35  ;;  %v5170_v9 = vld [vmem:[%s6332_s17 + $0x20] sm:$0xff]  }
0x1a3d   : > { %v5129_v10 = vpop.permute.xlu1 %5128 }
0x1a3e   : > { %v5131_v4 = vunpack.i.h.bf16 %v5129_v10  ;;  %v5130_v63 = vunpack.i.l.bf16 %v5129_v10  ;;  %v4555_v10 = vld [vmem:[%s6331_s16 + $0x1] ss:$0 sm:$0xff] }
0x1a40   : > { %v3952_v14 = vsel %vm1465_vm13, %v3950_v12, %v5130_v63  ;;  %v3953_v30 = vsel %vm1465_vm13, %v3951_v45, %v5131_v4 }
0x1a41   : > { %v3954_v46 = vpack.c.bf16 %v3953_v30, %v3952_v14 }
0x1a43   : > { %5016 = vmatmul.mubr.msk.bf16.vlgmr.msra.gmra.mxu0 %vm872_vm5, %v3954_v46 }
0x1a44   : > { %5035 = vmatprep.mubr.msk.bf16.mxu0 %vm5347_vm2, %v5345_v1 }
0x1b03   : > { %v4010_v15 = vpop.f32.mrf.mxu0 }
0x1b04   : > { %v4011_v16 = vadd.f32 %v4546_v6, %v4010_v15 }
0x1b05   : > { %v5017_v18 = vpop.f32.mrf.mxu0 }
0x1b06   : > { %v4017_v19 = vadd.f32 %v4011_v16, %v6118_v47  ;;  %v5165_v47 = vld [vmem:[%s6330_s15 + $0x18] sm:$0xff]  }
0x1b07   : > { %v4013_v20 = vpop.f32.mrf.mxu0  ;;  %5020 = vmatpush3.bf16.msra.mxu1 %v5165_v47  ;;  %v5171_v47 = vld [vmem:[%s6334_s19 + $0x8] sm:$0xff]  }
0x1b08   : > { %v4014_v17 = vadd.f32 %v4546_v6, %v4013_v20  ;;  %v4019_v21 = vsel %vm872_vm5, %v4017_v19, 0.0  ;;  %v4027_v22 = vmul.f32 %v4017_v19, %v4017_v19  ;;  %5021 = vmatprep.subr.bf16.mxu1 %v5345_v1  ;;  %v4568_v6 = vld [vmem:[%s6333_s18 + $0x1] ss:$0 sm:$0xff] }
0x1b09   : > { %4020 = vadd.xlane.f32.xlu0 %v4019_v21  ;;  %v5018_v23 = vpop.f32.mrf.mxu0 }
0x1b0a   : > { %v4018_v24 = vadd.f32 %v4014_v17, %v6120_v36  ;;  %v4029_v34 = vsel %vm872_vm5, %v4027_v22, 0.0  ;;  %v5167_v36 = vld [vmem:[%s6332_s17 + $0x38] sm:$0xff]  }
0x1b0b   : > { %5022 = vmatpush3.bf16.msra.mxu1 %v5166_v29  ;;  %5028 = vmatpush3.bf16.msra.mxu0 %v5167_v36  ;;  %v5172_v29 = vld [vmem:[%s6334_s19] sm:$0xff]  }
0x1b0c   : > { %v4022_v25 = vsel %vm1536_vm14, %v4018_v24, 0.0  ;;  %v4028_v26 = vmul.f32 %v4018_v24, %v4018_v24  ;;  %5039 = vmatprep.subr.bf16.mxu1 %v5345_v1  ;;  %5029 = vmatprep.subr.bf16.mxu0 %v5345_v1 }
0x1b0d   : > { %4030 = vadd.xlane.f32.xlu0 %v4029_v34  ;;  %4023 = vadd.xlane.f32.xlu1 %v4022_v25 }
0x1b0e   : > { %v4032_v27 = vsel %vm1536_vm14, %v4028_v26, 0.0 }
0x1b0f   : > { %5030 = vmatpush3.bf16.msra.mxu0 %v5168_v28 }
0x1b10   : > { %5031 = vmatprep.subr.bf16.mxu0 %v5345_v1 }
0x1b11   : > { %4033 = vadd.xlane.f32.xlu0 %v4032_v27 }
0x1b13   : > { %5032 = vmatpush3.bf16.msra.mxu0 %v5169_v37 }
0x1b14   : > { %5033 = vmatprep.subr.bf16.mxu0 %v5345_v1 }
0x1b17   : > { %5034 = vmatpush3.bf16.msra.mxu0 %v5170_v9 }
0x1b92   : > { %v4021_v33 = vpop.xlane.xlu0 %4020 }
0x1b93   : > { %v4025_v38 = vmul.f32 0.03125, %v4021_v33 }
0x1b95   : > { %v4037_v39 = vmul.f32 %v4025_v38, %v4025_v38  ;;  %v4041_v52 = vsub.f32 %v4017_v19, %v4025_v38 }
0x1b96   : > { %v4031_v31 = vpop.xlane.xlu0 %4030  ;;  %v4024_v54 = vpop.xlane.xlu1 %4023 }
0x1b97   : > { %v4035_v40 = vmul.f32 0.03125, %v4031_v31  ;;  %v4026_v55 = vmul.f32 0.03125, %v4024_v54 }
0x1b99   : > { %v4039_v43 = vsub.f32 %v4035_v40, %v4037_v39  ;;  %v4038_v42 = vmul.f32 %v4026_v55, %v4026_v55  ;;  %v4042_v62 = vsub.f32 %v4018_v24, %v4026_v55 }
0x1b9a   : > { %v4034_v44 = vpop.xlane.xlu0 %4033 }
0x1b9b   : > { %v4043_v48 = vadd.f32 1e-05, %v4039_v43  ;;  %v4036_v49 = vmul.f32 0.03125, %v4034_v44 }
0x1b9d   : > { %5317 = vrsqrt.f32 %v4043_v48  ;;  %v4040_v50 = vsub.f32 %v4036_v49, %v4038_v42 }
0x1b9f   : > { %v4044_v51 = vadd.f32 1e-05, %v4040_v50 }
0x1ba1   : > { %5319 = vrsqrt.f32 %v4044_v51 }
0x1baa   : > { %v5318_v53 = vpop.eup %5317 }
0x1bab   : > { %v4047_v56 = vmul.f32 %v5318_v53, %v4041_v52  ;;  %v4254_v53 = vrot.slane %v6110_v5, %v2547_v41 }
0x1bad   : > { %v4053_v61 = vmul.f32 %v4052_v58, %v4047_v56 }
0x1bae   : > { %v5320_v57 = vpop.eup %5319 }
0x1baf   : > { %v4048_v32 = vmul.f32 %v5320_v57, %v4042_v62  ;;  %v4059_v7 = vadd.f32 %v4058_v0, %v4053_v61 }
0x1bb1   : > { %v4054_v2 = vmul.f32 %v4052_v58, %v4048_v32  ;;  %v4260_v32 = vrot.slane %v6110_v5, %v2553_v13 }
0x1bb3   : > { %v4060_v8 = vadd.f32 %v4058_v0, %v4054_v2 }
0x1bb5   : > { %v4061_v35 = vpack.c.bf16 %v4060_v8, %v4059_v7 }
0x1bb7   : > { %5024 = vmatmul.mubr.msk.bf16.vlgmr.msra.gmra.mxu1 %vm872_vm5, %v4061_v35 }
0x1bb8   : > { %5043 = vmatprep.mubr.msk.bf16.mxu1 %vm5347_vm2, %v5345_v1  ;;  %5040 = vmatpush3.bf16.msra.mxu1 %v5171_v47  ;;  %vm4343_vm2 = vcmp.lt.s32.totalorder %v5604_v60, 52 }
0x1bb9   : > { %5041 = vmatprep.subr.bf16.mxu1 %v5345_v1 }
0x1bbc   : > { %5042 = vmatpush3.bf16.msra.mxu1 %v5172_v29 }
0x1c77   : > { %v4124_v3 = vpop.f32.mrf.mxu1 }
0x1c78   : > { %v4125_v4 = vadd.f32 %v4555_v10, %v4124_v3 }
0x1c79   : > { %v5025_v11 = vpop.f32.mrf.mxu1 }
0x1c7a   : > { %v4131_v14 = vmax.f32 %v4125_v4, 0.0 }
0x1c7b   : > { %v4127_v63 = vpop.f32.mrf.mxu1 }
0x1c7c   : > { %v4128_v12 = vadd.f32 %v4555_v10, %v4127_v63 }
0x1c7d   : > { %v5026_v45 = vpop.f32.mrf.mxu1 }
0x1c7e   : > { %v4132_v30 = vmax.f32 %v4128_v12, 0.0 }
0x1c80   : > { %v4133_v46 = vpack.c.bf16 %v4132_v30, %v4131_v14 }
0x1c82   : > { %5036 = vmatmul.mubr.msk.bf16.vlgmr.msra.gmra.mxu0 %vm2468_vm1, %v4133_v46 }
0x1d42   : > { %v4212_v15 = vpop.f32.mrf.mxu0 }
0x1d43   : > { %v4213_v16 = vadd.f32 %v4568_v6, %v4212_v15 }
0x1d44   : > { %v5037_v18 = vpop.f32.mrf.mxu0 }
0x1d45   : > { %v4219_v19 = vadd.f32 %v4213_v16, %v4059_v7 }
0x1d46   : > { %v4215_v20 = vpop.f32.mrf.mxu0 }
0x1d47   : > { %v4216_v17 = vadd.f32 %v4568_v6, %v4215_v20  ;;  %v4221_v21 = vsel %vm872_vm5, %v4219_v19, 0.0  ;;  %v4229_v22 = vmul.f32 %v4219_v19, %v4219_v19 }
0x1d48   : > { %4222 = vadd.xlane.f32.xlu1 %v4221_v21  ;;  %v5038_v23 = vpop.f32.mrf.mxu0 }
0x1d49   : > { %v4220_v24 = vadd.f32 %v4216_v17, %v4060_v8  ;;  %v4231_v34 = vsel %vm872_vm5, %v4229_v22, 0.0  ;;  %v4574_v8 = vld [vmem:[%s6335_s20] ss:$0 sm:$0xff] }
0x1d4b   : > { %v4224_v25 = vsel %vm1536_vm14, %v4220_v24, 0.0  ;;  %v4230_v26 = vmul.f32 %v4220_v24, %v4220_v24 }
0x1d4c   : > { %4232 = vadd.xlane.f32.xlu1 %v4231_v34  ;;  %4225 = vadd.xlane.f32.xlu0 %v4224_v25 }
0x1d4d   : > { %v4234_v27 = vsel %vm1536_vm14, %v4230_v26, 0.0 }
0x1d50   : > { %4235 = vadd.xlane.f32.xlu0 %v4234_v27 }
0x1dd1   : > { %v4223_v36 = vpop.xlane.xlu1 %4222 }
0x1dd2   : > { %v4227_v33 = vmul.f32 0.03125, %v4223_v36 }
0x1dd4   : > { %v4239_v54 = vmul.f32 %v4227_v33, %v4227_v33  ;;  %v4243_v51 = vsub.f32 %v4219_v19, %v4227_v33 }
0x1dd5   : > { %v4233_v38 = vpop.xlane.xlu1 %4232  ;;  %v4226_v31 = vpop.xlane.xlu0 %4225 }
0x1dd6   : > { %v4237_v39 = vmul.f32 0.03125, %v4233_v38  ;;  %v4228_v40 = vmul.f32 0.03125, %v4226_v31 }
0x1dd8   : > { %v4241_v55 = vsub.f32 %v4237_v39, %v4239_v54  ;;  %v4240_v48 = vmul.f32 %v4228_v40, %v4228_v40  ;;  %v4244_v56 = vsub.f32 %v4220_v24, %v4228_v40 }
0x1dd9   : > { %v4236_v43 = vpop.xlane.xlu0 %4235 }
0x1dda   : > { %v4245_v44 = vadd.f32 1e-05, %v4241_v55  ;;  %v4238_v42 = vmul.f32 0.03125, %v4236_v43 }
0x1ddc   : > { %5321 = vrsqrt.f32 %v4245_v44  ;;  %v4242_v49 = vsub.f32 %v4238_v42, %v4240_v48 }
0x1dde   : > { %v4246_v50 = vadd.f32 1e-05, %v4242_v49 }
0x1de0   : > { %5323 = vrsqrt.f32 %v4246_v50 }
0x1de9   : > { %v5322_v52 = vpop.eup %5321 }
0x1dea   : > { %v4249_v1 = vmul.f32 %v5322_v52, %v4243_v51 }
0x1dec   : > { %v4255_v57 = vmul.f32 %v4254_v53, %v4249_v1 }
0x1ded   : > { %v5324_v58 = vpop.eup %5323 }
0x1dee   : > { %v4250_v62 = vmul.f32 %v5324_v58, %v4244_v56  ;;  %v4261_v0 = vadd.f32 %v4260_v32, %v4255_v57 }
0x1df0   : > { %v4256_v61 = vmul.f32 %v4254_v53, %v4250_v62 }
0x1df2   : > { %v4262_v2 = vadd.f32 %v4260_v32, %v4256_v61 }
0x1df4   : > { %v4263_v7 = vpack.c.bf16 %v4262_v2, %v4261_v0 }
0x1df6   : > { %5044 = vmatmul.mubr.msk.bf16.vlgmr.msra.gmra.mxu1 %vm872_vm5, %v4263_v7 }
0x1eb6   : > { %v4324_v35 = vpop.f32.mrf.mxu1 }
0x1eb7   : > { %v4325_v41 = vadd.f32 %v4574_v8, %v4324_v35 }
0x1eb8   : > { %v5045_v28 = vpop.f32.mrf.mxu1 }
0x1eb9   : > { %v4331_v37 = vsub.f32 0.0, %v4325_v41 }
0x1eba   : > { %v4327_v9 = vpop.f32.mrf.mxu1 }
0x1ebb   : > { %v4333_v10 = vmul.f32 1.442695, %v4331_v37  ;;  %v4328_v3 = vadd.f32 %v4574_v8, %v4327_v9 }
0x1ebc   : > { %v5046_v59 = vpop.f32.mrf.mxu1 }
0x1ebd   : > { %5325 = vpow2.f32 %v4333_v10  ;;  %v4332_v13 = vsub.f32 0.0, %v4328_v3 }
0x1ebf   : > { %v4335_v5 = vmul.f32 1.442695, %v4332_v13 }
0x1ec1   : > { %5327 = vpow2.f32 %v4335_v5 }
0x1ec2   : > { %5329 = vtanh.f32 %v4325_v41 }
0x1eca   : > { %v5326_v11 = vpop.eup %5325 }
0x1ecb   : > { %v4337_v4 = vadd.f32 1.0, %v5326_v11 }
0x1ecd   : > { %5331 = vrcp.f32 %v4337_v4 }
0x1ece   : > { %v5328_v63 = vpop.eup %5327  ;;  %5333 = vtanh.f32 %v4328_v3 }
0x1ecf   : > { %v4338_v12 = vadd.f32 1.0, %v5328_v63  ;;  %v5330_v45 = vpop.eup %5329 }
0x1ed1   : > { %5335 = vrcp.f32 %v4338_v12 }
0x1eda   : > { %v5332_v14 = vpop.eup %5331 }
0x1edb   : > { %v4346_v30 = vsel %vm4343_vm2, %v5332_v14, %v5330_v45  ;;  %v5334_v46 = vpop.eup %5333 }
0x1edc   : > { %4348 = vst [vmem:[%s676_s0] sm:$0xff] %v4346_v30 }
0x1ede   : > { %v5336_v6 = vpop.eup %5335 }
0x1edf   : > { %v4347_v15 = vsel %vm4343_vm2, %v5336_v6, %v5334_v46 }
0x1ee0   : > { %4349 = vst [vmem:[%s676_s0 + $0x8] sm:$0x1] %v4347_v15 }
0x1ee1 PF: > { %s6402_s2 = sld [smem:[#allocation2_spill]] }
0x1ee7   : > { %s31_s2 = sadd.s32 1, %s6402_s2  }
0x1ee8   : > { %p28_p4 = scmp.ge.s32.totalorder %s31_s2, 4  }
0x1eea   :  { %30 = sbr.rel (!%p28_p4) target bundleno = 10 (0xa), region = 154 }

</bundles_post_ra>
